<compile_context>
chip_gen: v7x
topology: tpu7x:2x2x1
jax: 0.10.0
libtpu: 0.0.40
codegen_flags: <defaults>
</compile_context>

<pallas_src>
import functools

import jax
import jax.numpy as jnp
import numpy as np
from jax.experimental import pallas as pl
from jax.experimental.pallas import tpu as pltpu

_LANE = 128


def _round_up(x, m):
    return ((x + m - 1) // m) * m


def _fused_gat_kernel(h_ref, adj_ref, wa1_ref, u1sT_ref, wa2_ref, u2sT_ref,
                      out_ref, *, H, D1, Dout, negative_slope):
    f32 = jnp.float32
    bf16 = jnp.bfloat16

    def attention(z_bf, er_col, el_row):
        # s[j,i] = leaky_relu(a_dst.z[j] + a_src.z[i]), restricted to edges.
        s = er_col + el_row                                   # [Np, Np] f32
        s = jnp.where(s >= 0, s, negative_slope * s)          # leaky_relu
        # int8 compare + select, recomputed per call: no resident [Np,Np] f32 bias.
        s = jnp.where(adj_ref[...] != 0, s, -1e30)
        m = jnp.max(s, axis=-1, keepdims=True)
        p = jnp.exp(s - m)                                    # masked entries -> exactly 0
        l = jnp.sum(p, axis=-1, keepdims=True)
        # bf16 attention-apply on the MXU (f32 accumulate), f32 normalization on the EUP.
        o = jnp.dot(p.astype(bf16), z_bf, preferred_element_type=f32)
        return o * pl.reciprocal(l, approx=True)

    HD1 = H * D1
    h = h_ref[...]                                            # [Np, Fin] bf16

    # ----- layer 1: features + per-head dst terms from ONE augmented bf16 matmul -----
    zA1 = jnp.dot(h, wa1_ref[...], preferred_element_type=f32)        # [Np, C1p] f32
    el1 = jax.lax.dot_general(u1sT_ref[...], h, (((1,), (1,)), ((), ())),
                              preferred_element_type=f32)             # [H, Np] f32

    outs = []
    for k in range(H):                                                # unrolled (H small)
        z_k = zA1[:, k * D1:(k + 1) * D1].astype(bf16)                # [Np, D1]
        er_k = zA1[:, HD1 + k:HD1 + k + 1]                            # [Np, 1]
        outs.append(attention(z_k, er_k, el1[k:k + 1, :]))            # [Np, D1] f32
    h1 = jnp.concatenate(outs, axis=1)                                # [Np, H*D1] in-register
    h1 = jnp.where(h1 > 0, h1, jnp.exp(jnp.minimum(h1, 0.0)) - 1.0)   # ELU (fused)
    h1 = h1.astype(bf16)

    # ----- layer 2: single head --------------------------------------------------------
    zA2 = jnp.dot(h1, wa2_ref[...], preferred_element_type=f32)       # [Np, C2p] f32
    el2 = jax.lax.dot_general(u2sT_ref[...], h1, (((1,), (1,)), ((), ())),
                              preferred_element_type=f32)             # [1, Np]
    er2 = zA2[:, Dout:Dout + 1]                                       # [Np, 1]
    # Columns >= Dout of zA2 carry the u_dst column / zero padding; they only reach output
    # columns the wrapper slices away, so the full 128-lane HBM store stays dense.
    out_ref[...] = attention(zA2.astype(bf16), er2, el2)              # [Np, C2p]


def _augment_params(W, a_src, a_dst):
    """W:[H,Fin,D], a_*:[H,1,D] ->
       WA  : [Fin, round_up(H*D+H,128)] bf16, cols [head-concat W | W@a_dst per head | 0]
       UsT : [H, Fin] bf16, row k = W[k] @ a_src[k]."""
    H, Fin, D = W.shape
    Wcat = jnp.transpose(W, (1, 0, 2)).reshape(Fin, H * D)
    Ud = jnp.einsum('hfd,hd->fh', W, a_dst[:, 0, :])
    UsT = jnp.einsum('hfd,hd->hf', W, a_src[:, 0, :])
    WA = jnp.concatenate([Wcat, Ud], axis=1)
    Cp = _round_up(WA.shape[1], _LANE)
    WA = jnp.pad(WA, ((0, 0), (0, Cp - WA.shape[1])))
    return WA.astype(jnp.bfloat16), UsT.astype(jnp.bfloat16)


def prepare_adjacency(adj):
    """Once-per-graph preprocessing (outside the jitted per-call path): pad the node axis
    to a lane multiple, store as 0/1 int8, and give padding nodes a self-loop so their
    (discarded) softmax rows stay finite."""
    N = adj.shape[0]
    Np = _round_up(N, _LANE)
    adj_i8 = jnp.zeros((Np, Np), jnp.int8).at[:N, :N].set((adj > 0).astype(jnp.int8))
    pad_idx = jnp.arange(N, Np)
    return adj_i8.at[pad_idx, pad_idx].set(1)


@functools.partial(jax.jit, static_argnames=("negative_slope",))
def gat_model(h, adj_i8, params, *, negative_slope=0.01):
    """GATModel.forward: gat1 -> elu -> gat2, fused into a single pallas_call."""
    (W1, a1s, a1d), (W2, a2s, a2d) = params
    N, Fin = h.shape
    Np = adj_i8.shape[0]
    H, _, D1 = W1.shape
    _, HD1, Dout = W2.shape
    assert HD1 == H * D1 and Np == _round_up(N, _LANE)

    WA1, U1sT = _augment_params(W1, a1s, a1d)
    WA2, U2sT = _augment_params(W2, a2s, a2d)
    C1p, C2p = WA1.shape[1], WA2.shape[1]

    h_pad = jnp.pad(h.astype(jnp.bfloat16), ((0, Np - N), (0, 0)))

    kernel = functools.partial(_fused_gat_kernel, H=H, D1=D1, Dout=Dout,
                               negative_slope=negative_slope)
    out_pad = pl.pallas_call(
        kernel,
        out_shape=jax.ShapeDtypeStruct((Np, C2p), jnp.float32),
        grid_spec=pltpu.PrefetchScalarGridSpec(
            num_scalar_prefetch=0,
            grid=(1,),
            in_specs=[
                pl.BlockSpec((Np, Fin), lambda i: (0, 0)),     # node features (bf16)
                pl.BlockSpec((Np, Np), lambda i: (0, 0)),      # int8 adjacency
                pl.BlockSpec((Fin, C1p), lambda i: (0, 0)),    # layer-1 augmented W (bf16)
                pl.BlockSpec((H, Fin), lambda i: (0, 0)),      # layer-1 (W @ a_src)^T
                pl.BlockSpec((HD1, C2p), lambda i: (0, 0)),    # layer-2 augmented W
                pl.BlockSpec((1, HD1), lambda i: (0, 0)),      # layer-2 (W @ a_src)^T
            ],
            out_specs=pl.BlockSpec((Np, C2p), lambda i: (0, 0)),
        ),
        compiler_params=pltpu.CompilerParams(
            dimension_semantics=("arbitrary",),
            vmem_limit_bytes=8 * 1024 * 1024),
        # TODO(synk): for graphs with N >> 128, split back into per-layer calls tiled over
        # destination-row blocks (grid marked "parallel" to use both v7x TensorCores) with
        # an online softmax over source tiles, single-buffer (pl.Buffered(1)) the
        # grid-invariant weight/adjacency inputs, and batch the per-head attention-apply
        # into one block-diagonal matmul instead of H narrow D1-lane dots.
    )(h_pad, adj_i8, WA1, U1sT, WA2, U2sT)
    return out_pad[:N, :Dout]


# ----------------------------- pure-JAX reference -----------------------------
def _gat_layer_ref(h, adj, W, a_src, a_dst, apply_elu, slope=0.01):
    outs = []
    for k in range(W.shape[0]):
        z = h @ W[k]
        el = z @ a_src[k, 0]
        er = z @ a_dst[k, 0]
        s = er[:, None] + el[None, :]
        s = jnp.where(s >= 0, s, slope * s)
        s = jnp.where(adj > 0, s, -jnp.inf)
        alpha = jax.nn.softmax(s, axis=-1)
        o = alpha @ z
        if apply_elu:
            o = jax.nn.elu(o)
        outs.append(o)
    return jnp.concatenate(outs, axis=1)


def _gat_model_ref(h, adj, params):
    (W1, a1s, a1d), (W2, a2s, a2d) = params
    h1 = _gat_layer_ref(h, adj, W1, a1s, a1d, True)
    return _gat_layer_ref(h1, adj, W2, a2s, a2d, False)


# ----------------------------------- main -------------------------------------
if __name__ == "__main__":
    N = 32            # number of graph nodes
    IN_DIM = 16
    HIDDEN_DIM = 8
    OUT_DIM = 7
    HEAD_NUM = 4

    key = jax.random.PRNGKey(0)
    k_h, k_adj, k_w1, k_a1, k_w2, k_a2 = jax.random.split(key, 6)

    # Node features.
    h = jax.random.normal(k_h, (N, IN_DIM), dtype=jnp.float32)

    # Deterministic graph: random edges + guaranteed self-loops.
    adj = (jax.random.uniform(k_adj, (N, N)) < 0.2).astype(jnp.float32)
    adj = jnp.maximum(adj, jnp.eye(N, dtype=jnp.float32))
    # Invariant required by the -1e30 masking: every real node has >= 1 edge.
    assert bool(jnp.all(jnp.diag(adj) > 0))

    # Layer 1 params: H heads, fc: in_dim -> hidden_dim, attn: 2*hidden_dim -> 1.
    W1 = 0.1 * jax.random.normal(k_w1, (HEAD_NUM, IN_DIM, HIDDEN_DIM), jnp.float32)
    a1 = 0.1 * jax.random.normal(k_a1, (HEAD_NUM, 1, 2 * HIDDEN_DIM), jnp.float32)
    a1_src, a1_dst = a1[:, :, :HIDDEN_DIM], a1[:, :, HIDDEN_DIM:]

    # Layer 2 params: 1 head, fc: hidden_dim*head_num -> out_dim.
    W2 = 0.1 * jax.random.normal(k_w2, (1, HIDDEN_DIM * HEAD_NUM, OUT_DIM), jnp.float32)
    a2 = 0.1 * jax.random.normal(k_a2, (1, 1, 2 * OUT_DIM), jnp.float32)
    a2_src, a2_dst = a2[:, :, :OUT_DIM], a2[:, :, OUT_DIM:]

    params = ((W1, a1_src, a1_dst), (W2, a2_src, a2_dst))

    adj_i8 = prepare_adjacency(adj)      # once per graph, outside the jitted forward
    out = gat_model(h, adj_i8, params)
    out = jax.block_until_ready(out)

    ref = _gat_model_ref(h, adj, params)
    # Tolerance loosened deliberately: bf16 MXU operands + approx EUP reciprocal (~1e-2 rel).
    np.testing.assert_allclose(np.asarray(out), np.asarray(ref), rtol=3e-2, atol=1e-2)
    assert out.shape == (N, OUT_DIM)

    print("KERNEL_OK")
</pallas_src>

<mosaic_0001>
module attributes {stable_mosaic.version = 11 : i64} {
  func.func @_fused_gat_kernel(%arg0: i32, %arg1: memref<128x16xbf16, #tpu.memory_space<vmem>>, %arg2: memref<128x128xi8, #tpu.memory_space<vmem>>, %arg3: memref<16x128xbf16, #tpu.memory_space<vmem>>, %arg4: memref<4x16xbf16, #tpu.memory_space<vmem>>, %arg5: memref<32x128xbf16, #tpu.memory_space<vmem>>, %arg6: memref<1x32xbf16, #tpu.memory_space<vmem>>, %arg7: memref<128x128xf32, #tpu.memory_space<vmem>>) attributes {dimension_semantics = [#tpu.dimension_semantics<arbitrary>], iteration_bounds = array<i64: 1>, scalar_prefetch = 0 : i64, scratch_operands = 0 : i64, tpu.core_type = #tpu.core_type<tc>, window_params = [{pipeline_mode = #tpu.pipeline_mode<synchronous>, transform_indices = @transform_0, window_bounds = array<i64: 128, 16>}, {pipeline_mode = #tpu.pipeline_mode<synchronous>, transform_indices = @transform_1, window_bounds = array<i64: 128, 128>}, {pipeline_mode = #tpu.pipeline_mode<synchronous>, transform_indices = @transform_2, window_bounds = array<i64: 16, 128>}, {pipeline_mode = #tpu.pipeline_mode<synchronous>, transform_indices = @transform_3, window_bounds = array<i64: 4, 16>}, {pipeline_mode = #tpu.pipeline_mode<synchronous>, transform_indices = @transform_4, window_bounds = array<i64: 32, 128>}, {pipeline_mode = #tpu.pipeline_mode<synchronous>, transform_indices = @transform_5, window_bounds = array<i64: 1, 32>}, {pipeline_mode = #tpu.pipeline_mode<synchronous>, transform_indices = @transform_6, window_bounds = array<i64: 128, 128>}]} {
    %c0 = arith.constant 0 : index
    %c0_0 = arith.constant 0 : index
    %0 = vector.load %arg1[%c0, %c0_0] : memref<128x16xbf16, #tpu.memory_space<vmem>>, vector<128x16xbf16>
    %c0_1 = arith.constant 0 : index
    %c0_2 = arith.constant 0 : index
    %1 = vector.load %arg3[%c0_1, %c0_2] : memref<16x128xbf16, #tpu.memory_space<vmem>>, vector<16x128xbf16>
    %cst = arith.constant dense<0.000000e+00> : vector<128x128xf32>
    %2 = tpu.matmul %0, %1, %cst {dimension_numbers = #tpu.dot_dimension_numbers<[1], [0], [0], [1], [0, 0, 1, 1], [], []>} : vector<128x16xbf16>, vector<16x128xbf16>, vector<128x128xf32> -> vector<128x128xf32>
    %c0_3 = arith.constant 0 : index
    %c0_4 = arith.constant 0 : index
    %3 = vector.load %arg4[%c0_3, %c0_4] : memref<4x16xbf16, #tpu.memory_space<vmem>>, vector<4x16xbf16>
    %cst_5 = arith.constant dense<0.000000e+00> : vector<4x128xf32>
    %4 = tpu.matmul %3, %0, %cst_5 {dimension_numbers = #tpu.dot_dimension_numbers<[1], [1], [0], [0], [0, 0, 1, 0], [], []>} : vector<4x16xbf16>, vector<128x16xbf16>, vector<4x128xf32> -> vector<4x128xf32>
    %5 = vector.extract_strided_slice %2 {offsets = [0, 0], sizes = [128, 8], strides = [1, 1]} : vector<128x128xf32> to vector<128x8xf32>
    %6 = arith.truncf %5 : vector<128x8xf32> to vector<128x8xbf16>
    %7 = vector.extract_strided_slice %2 {offsets = [0, 32], sizes = [128, 1], strides = [1, 1]} : vector<128x128xf32> to vector<128x1xf32>
    %8 = vector.extract_strided_slice %4 {offsets = [0, 0], sizes = [1, 128], strides = [1, 1]} : vector<4x128xf32> to vector<1x128xf32>
    %9 = vector.broadcast %7 : vector<128x1xf32> to vector<128x128xf32>
    %10 = vector.broadcast %8 : vector<1x128xf32> to vector<128x128xf32>
    %11 = arith.addf %9, %10 : vector<128x128xf32>
    %cst_6 = arith.constant 0.000000e+00 : f32
    %12 = vector.broadcast %cst_6 : f32 to vector<128x128xf32>
    %13 = arith.cmpf oge, %11, %12 : vector<128x128xf32>
    %cst_7 = arith.constant 0.00999999977 : f32
    %14 = vector.broadcast %cst_7 : f32 to vector<128x128xf32>
    %15 = arith.mulf %14, %11 : vector<128x128xf32>
    %16 = arith.select %13, %11, %15 : vector<128x128xi1>, vector<128x128xf32>
    %c0_8 = arith.constant 0 : index
    %c0_9 = arith.constant 0 : index
    %17 = vector.load %arg2[%c0_8, %c0_9] : memref<128x128xi8, #tpu.memory_space<vmem>>, vector<128x128xi8>
    %c0_i8 = arith.constant 0 : i8
    %18 = vector.broadcast %c0_i8 : i8 to vector<128x128xi8>
    %19 = arith.cmpi ne, %17, %18 : vector<128x128xi8>
    %cst_10 = arith.constant -1.000000e+30 : f32
    %20 = vector.broadcast %cst_10 : f32 to vector<128x128xf32>
    %21 = arith.select %19, %16, %20 : vector<128x128xi1>, vector<128x128xf32>
    %cst_11 = arith.constant dense<0xFF800000> : vector<128xf32>
    %22 = vector.multi_reduction <maximumf>, %21, %cst_11 [1] : vector<128x128xf32> to vector<128xf32>
    %23 = vector.shape_cast %22 : vector<128xf32> to vector<128x1xf32>
    %24 = vector.broadcast %23 : vector<128x1xf32> to vector<128x128xf32>
    %25 = arith.subf %21, %24 : vector<128x128xf32>
    %26 = math.exp %25 : vector<128x128xf32>
    %cst_12 = arith.constant dense<0.000000e+00> : vector<128xf32>
    %27 = vector.multi_reduction <add>, %26, %cst_12 [1] : vector<128x128xf32> to vector<128xf32>
    %28 = vector.shape_cast %27 : vector<128xf32> to vector<128x1xf32>
    %29 = arith.truncf %26 : vector<128x128xf32> to vector<128x128xbf16>
    %cst_13 = arith.constant dense<0.000000e+00> : vector<128x8xf32>
    %30 = tpu.matmul %29, %6, %cst_13 {dimension_numbers = #tpu.dot_dimension_numbers<[1], [0], [0], [1], [0, 0, 1, 1], [], []>} : vector<128x128xbf16>, vector<128x8xbf16>, vector<128x8xf32> -> vector<128x8xf32>
    %31 = tpu.reciprocal %28 {approx = true} : vector<128x1xf32> -> vector<128x1xf32>
    %32 = vector.broadcast %31 : vector<128x1xf32> to vector<128x8xf32>
    %33 = arith.mulf %30, %32 : vector<128x8xf32>
    %34 = vector.extract_strided_slice %2 {offsets = [0, 8], sizes = [128, 8], strides = [1, 1]} : vector<128x128xf32> to vector<128x8xf32>
    %35 = arith.truncf %34 : vector<128x8xf32> to vector<128x8xbf16>
    %36 = vector.extract_strided_slice %2 {offsets = [0, 33], sizes = [128, 1], strides = [1, 1]} : vector<128x128xf32> to vector<128x1xf32>
    %37 = vector.extract_strided_slice %4 {offsets = [1, 0], sizes = [1, 128], strides = [1, 1]} : vector<4x128xf32> to vector<1x128xf32>
    %38 = vector.broadcast %36 : vector<128x1xf32> to vector<128x128xf32>
    %39 = vector.broadcast %37 : vector<1x128xf32> to vector<128x128xf32>
    %40 = arith.addf %38, %39 : vector<128x128xf32>
    %cst_14 = arith.constant 0.000000e+00 : f32
    %41 = vector.broadcast %cst_14 : f32 to vector<128x128xf32>
    %42 = arith.cmpf oge, %40, %41 : vector<128x128xf32>
    %cst_15 = arith.constant 0.00999999977 : f32
    %43 = vector.broadcast %cst_15 : f32 to vector<128x128xf32>
    %44 = arith.mulf %43, %40 : vector<128x128xf32>
    %45 = arith.select %42, %40, %44 : vector<128x128xi1>, vector<128x128xf32>
    %c0_16 = arith.constant 0 : index
    %c0_17 = arith.constant 0 : index
    %46 = vector.load %arg2[%c0_16, %c0_17] : memref<128x128xi8, #tpu.memory_space<vmem>>, vector<128x128xi8>
    %c0_i8_18 = arith.constant 0 : i8
    %47 = vector.broadcast %c0_i8_18 : i8 to vector<128x128xi8>
    %48 = arith.cmpi ne, %46, %47 : vector<128x128xi8>
    %cst_19 = arith.constant -1.000000e+30 : f32
    %49 = vector.broadcast %cst_19 : f32 to vector<128x128xf32>
    %50 = arith.select %48, %45, %49 : vector<128x128xi1>, vector<128x128xf32>
    %cst_20 = arith.constant dense<0xFF800000> : vector<128xf32>
    %51 = vector.multi_reduction <maximumf>, %50, %cst_20 [1] : vector<128x128xf32> to vector<128xf32>
    %52 = vector.shape_cast %51 : vector<128xf32> to vector<128x1xf32>
    %53 = vector.broadcast %52 : vector<128x1xf32> to vector<128x128xf32>
    %54 = arith.subf %50, %53 : vector<128x128xf32>
    %55 = math.exp %54 : vector<128x128xf32>
    %cst_21 = arith.constant dense<0.000000e+00> : vector<128xf32>
    %56 = vector.multi_reduction <add>, %55, %cst_21 [1] : vector<128x128xf32> to vector<128xf32>
    %57 = vector.shape_cast %56 : vector<128xf32> to vector<128x1xf32>
    %58 = arith.truncf %55 : vector<128x128xf32> to vector<128x128xbf16>
    %cst_22 = arith.constant dense<0.000000e+00> : vector<128x8xf32>
    %59 = tpu.matmul %58, %35, %cst_22 {dimension_numbers = #tpu.dot_dimension_numbers<[1], [0], [0], [1], [0, 0, 1, 1], [], []>} : vector<128x128xbf16>, vector<128x8xbf16>, vector<128x8xf32> -> vector<128x8xf32>
    %60 = tpu.reciprocal %57 {approx = true} : vector<128x1xf32> -> vector<128x1xf32>
    %61 = vector.broadcast %60 : vector<128x1xf32> to vector<128x8xf32>
    %62 = arith.mulf %59, %61 : vector<128x8xf32>
    %63 = vector.extract_strided_slice %2 {offsets = [0, 16], sizes = [128, 8], strides = [1, 1]} : vector<128x128xf32> to vector<128x8xf32>
    %64 = arith.truncf %63 : vector<128x8xf32> to vector<128x8xbf16>
    %65 = vector.extract_strided_slice %2 {offsets = [0, 34], sizes = [128, 1], strides = [1, 1]} : vector<128x128xf32> to vector<128x1xf32>
    %66 = vector.extract_strided_slice %4 {offsets = [2, 0], sizes = [1, 128], strides = [1, 1]} : vector<4x128xf32> to vector<1x128xf32>
    %67 = vector.broadcast %65 : vector<128x1xf32> to vector<128x128xf32>
    %68 = vector.broadcast %66 : vector<1x128xf32> to vector<128x128xf32>
    %69 = arith.addf %67, %68 : vector<128x128xf32>
    %cst_23 = arith.constant 0.000000e+00 : f32
    %70 = vector.broadcast %cst_23 : f32 to vector<128x128xf32>
    %71 = arith.cmpf oge, %69, %70 : vector<128x128xf32>
    %cst_24 = arith.constant 0.00999999977 : f32
    %72 = vector.broadcast %cst_24 : f32 to vector<128x128xf32>
    %73 = arith.mulf %72, %69 : vector<128x128xf32>
    %74 = arith.select %71, %69, %73 : vector<128x128xi1>, vector<128x128xf32>
    %c0_25 = arith.constant 0 : index
    %c0_26 = arith.constant 0 : index
    %75 = vector.load %arg2[%c0_25, %c0_26] : memref<128x128xi8, #tpu.memory_space<vmem>>, vector<128x128xi8>
    %c0_i8_27 = arith.constant 0 : i8
    %76 = vector.broadcast %c0_i8_27 : i8 to vector<128x128xi8>
    %77 = arith.cmpi ne, %75, %76 : vector<128x128xi8>
    %cst_28 = arith.constant -1.000000e+30 : f32
    %78 = vector.broadcast %cst_28 : f32 to vector<128x128xf32>
    %79 = arith.select %77, %74, %78 : vector<128x128xi1>, vector<128x128xf32>
    %cst_29 = arith.constant dense<0xFF800000> : vector<128xf32>
    %80 = vector.multi_reduction <maximumf>, %79, %cst_29 [1] : vector<128x128xf32> to vector<128xf32>
    %81 = vector.shape_cast %80 : vector<128xf32> to vector<128x1xf32>
    %82 = vector.broadcast %81 : vector<128x1xf32> to vector<128x128xf32>
    %83 = arith.subf %79, %82 : vector<128x128xf32>
    %84 = math.exp %83 : vector<128x128xf32>
    %cst_30 = arith.constant dense<0.000000e+00> : vector<128xf32>
    %85 = vector.multi_reduction <add>, %84, %cst_30 [1] : vector<128x128xf32> to vector<128xf32>
    %86 = vector.shape_cast %85 : vector<128xf32> to vector<128x1xf32>
    %87 = arith.truncf %84 : vector<128x128xf32> to vector<128x128xbf16>
    %cst_31 = arith.constant dense<0.000000e+00> : vector<128x8xf32>
    %88 = tpu.matmul %87, %64, %cst_31 {dimension_numbers = #tpu.dot_dimension_numbers<[1], [0], [0], [1], [0, 0, 1, 1], [], []>} : vector<128x128xbf16>, vector<128x8xbf16>, vector<128x8xf32> -> vector<128x8xf32>
    %89 = tpu.reciprocal %86 {approx = true} : vector<128x1xf32> -> vector<128x1xf32>
    %90 = vector.broadcast %89 : vector<128x1xf32> to vector<128x8xf32>
    %91 = arith.mulf %88, %90 : vector<128x8xf32>
    %92 = vector.extract_strided_slice %2 {offsets = [0, 24], sizes = [128, 8], strides = [1, 1]} : vector<128x128xf32> to vector<128x8xf32>
    %93 = arith.truncf %92 : vector<128x8xf32> to vector<128x8xbf16>
    %94 = vector.extract_strided_slice %2 {offsets = [0, 35], sizes = [128, 1], strides = [1, 1]} : vector<128x128xf32> to vector<128x1xf32>
    %95 = vector.extract_strided_slice %4 {offsets = [3, 0], sizes = [1, 128], strides = [1, 1]} : vector<4x128xf32> to vector<1x128xf32>
    %96 = vector.broadcast %94 : vector<128x1xf32> to vector<128x128xf32>
    %97 = vector.broadcast %95 : vector<1x128xf32> to vector<128x128xf32>
    %98 = arith.addf %96, %97 : vector<128x128xf32>
    %cst_32 = arith.constant 0.000000e+00 : f32
    %99 = vector.broadcast %cst_32 : f32 to vector<128x128xf32>
    %100 = arith.cmpf oge, %98, %99 : vector<128x128xf32>
    %cst_33 = arith.constant 0.00999999977 : f32
    %101 = vector.broadcast %cst_33 : f32 to vector<128x128xf32>
    %102 = arith.mulf %101, %98 : vector<128x128xf32>
    %103 = arith.select %100, %98, %102 : vector<128x128xi1>, vector<128x128xf32>
    %c0_34 = arith.constant 0 : index
    %c0_35 = arith.constant 0 : index
    %104 = vector.load %arg2[%c0_34, %c0_35] : memref<128x128xi8, #tpu.memory_space<vmem>>, vector<128x128xi8>
    %c0_i8_36 = arith.constant 0 : i8
    %105 = vector.broadcast %c0_i8_36 : i8 to vector<128x128xi8>
    %106 = arith.cmpi ne, %104, %105 : vector<128x128xi8>
    %cst_37 = arith.constant -1.000000e+30 : f32
    %107 = vector.broadcast %cst_37 : f32 to vector<128x128xf32>
    %108 = arith.select %106, %103, %107 : vector<128x128xi1>, vector<128x128xf32>
    %cst_38 = arith.constant dense<0xFF800000> : vector<128xf32>
    %109 = vector.multi_reduction <maximumf>, %108, %cst_38 [1] : vector<128x128xf32> to vector<128xf32>
    %110 = vector.shape_cast %109 : vector<128xf32> to vector<128x1xf32>
    %111 = vector.broadcast %110 : vector<128x1xf32> to vector<128x128xf32>
    %112 = arith.subf %108, %111 : vector<128x128xf32>
    %113 = math.exp %112 : vector<128x128xf32>
    %cst_39 = arith.constant dense<0.000000e+00> : vector<128xf32>
    %114 = vector.multi_reduction <add>, %113, %cst_39 [1] : vector<128x128xf32> to vector<128xf32>
    %115 = vector.shape_cast %114 : vector<128xf32> to vector<128x1xf32>
    %116 = arith.truncf %113 : vector<128x128xf32> to vector<128x128xbf16>
    %cst_40 = arith.constant dense<0.000000e+00> : vector<128x8xf32>
    %117 = tpu.matmul %116, %93, %cst_40 {dimension_numbers = #tpu.dot_dimension_numbers<[1], [0], [0], [1], [0, 0, 1, 1], [], []>} : vector<128x128xbf16>, vector<128x8xbf16>, vector<128x8xf32> -> vector<128x8xf32>
    %118 = tpu.reciprocal %115 {approx = true} : vector<128x1xf32> -> vector<128x1xf32>
    %119 = vector.broadcast %118 : vector<128x1xf32> to vector<128x8xf32>
    %120 = arith.mulf %117, %119 : vector<128x8xf32>
    %121 = tpu.concatenate %33, %62, %91, %120 in 1 : vector<128x8xf32>, vector<128x8xf32>, vector<128x8xf32>, vector<128x8xf32> -> vector<128x32xf32>
    %cst_41 = arith.constant 0.000000e+00 : f32
    %122 = vector.broadcast %cst_41 : f32 to vector<128x32xf32>
    %123 = arith.cmpf ogt, %121, %122 : vector<128x32xf32>
    %cst_42 = arith.constant 0.000000e+00 : f32
    %124 = vector.broadcast %cst_42 : f32 to vector<128x32xf32>
    %125 = arith.minimumf %121, %124 : vector<128x32xf32>
    %126 = math.exp %125 : vector<128x32xf32>
    %cst_43 = arith.constant 1.000000e+00 : f32
    %127 = vector.broadcast %cst_43 : f32 to vector<128x32xf32>
    %128 = arith.subf %126, %127 : vector<128x32xf32>
    %129 = arith.select %123, %121, %128 : vector<128x32xi1>, vector<128x32xf32>
    %130 = arith.truncf %129 : vector<128x32xf32> to vector<128x32xbf16>
    %c0_44 = arith.constant 0 : index
    %c0_45 = arith.constant 0 : index
    %131 = vector.load %arg5[%c0_44, %c0_45] : memref<32x128xbf16, #tpu.memory_space<vmem>>, vector<32x128xbf16>
    %cst_46 = arith.constant dense<0.000000e+00> : vector<128x128xf32>
    %132 = tpu.matmul %130, %131, %cst_46 {dimension_numbers = #tpu.dot_dimension_numbers<[1], [0], [0], [1], [0, 0, 1, 1], [], []>} : vector<128x32xbf16>, vector<32x128xbf16>, vector<128x128xf32> -> vector<128x128xf32>
    %c0_47 = arith.constant 0 : index
    %c0_48 = arith.constant 0 : index
    %133 = vector.load %arg6[%c0_47, %c0_48] : memref<1x32xbf16, #tpu.memory_space<vmem>>, vector<1x32xbf16>
    %cst_49 = arith.constant dense<0.000000e+00> : vector<1x128xf32>
    %134 = tpu.matmul %133, %130, %cst_49 {dimension_numbers = #tpu.dot_dimension_numbers<[1], [1], [0], [0], [0, 0, 1, 0], [], []>} : vector<1x32xbf16>, vector<128x32xbf16>, vector<1x128xf32> -> vector<1x128xf32>
    %135 = vector.extract_strided_slice %132 {offsets = [0, 7], sizes = [128, 1], strides = [1, 1]} : vector<128x128xf32> to vector<128x1xf32>
    %136 = arith.truncf %132 : vector<128x128xf32> to vector<128x128xbf16>
    %137 = vector.broadcast %135 : vector<128x1xf32> to vector<128x128xf32>
    %138 = vector.broadcast %134 : vector<1x128xf32> to vector<128x128xf32>
    %139 = arith.addf %137, %138 : vector<128x128xf32>
    %cst_50 = arith.constant 0.000000e+00 : f32
    %140 = vector.broadcast %cst_50 : f32 to vector<128x128xf32>
    %141 = arith.cmpf oge, %139, %140 : vector<128x128xf32>
    %cst_51 = arith.constant 0.00999999977 : f32
    %142 = vector.broadcast %cst_51 : f32 to vector<128x128xf32>
    %143 = arith.mulf %142, %139 : vector<128x128xf32>
    %144 = arith.select %141, %139, %143 : vector<128x128xi1>, vector<128x128xf32>
    %c0_52 = arith.constant 0 : index
    %c0_53 = arith.constant 0 : index
    %145 = vector.load %arg2[%c0_52, %c0_53] : memref<128x128xi8, #tpu.memory_space<vmem>>, vector<128x128xi8>
    %c0_i8_54 = arith.constant 0 : i8
    %146 = vector.broadcast %c0_i8_54 : i8 to vector<128x128xi8>
    %147 = arith.cmpi ne, %145, %146 : vector<128x128xi8>
    %cst_55 = arith.constant -1.000000e+30 : f32
    %148 = vector.broadcast %cst_55 : f32 to vector<128x128xf32>
    %149 = arith.select %147, %144, %148 : vector<128x128xi1>, vector<128x128xf32>
    %cst_56 = arith.constant dense<0xFF800000> : vector<128xf32>
    %150 = vector.multi_reduction <maximumf>, %149, %cst_56 [1] : vector<128x128xf32> to vector<128xf32>
    %151 = vector.shape_cast %150 : vector<128xf32> to vector<128x1xf32>
    %152 = vector.broadcast %151 : vector<128x1xf32> to vector<128x128xf32>
    %153 = arith.subf %149, %152 : vector<128x128xf32>
    %154 = math.exp %153 : vector<128x128xf32>
    %cst_57 = arith.constant dense<0.000000e+00> : vector<128xf32>
    %155 = vector.multi_reduction <add>, %154, %cst_57 [1] : vector<128x128xf32> to vector<128xf32>
    %156 = vector.shape_cast %155 : vector<128xf32> to vector<128x1xf32>
    %157 = arith.truncf %154 : vector<128x128xf32> to vector<128x128xbf16>
    %cst_58 = arith.constant dense<0.000000e+00> : vector<128x128xf32>
    %158 = tpu.matmul %157, %136, %cst_58 {dimension_numbers = #tpu.dot_dimension_numbers<[1], [0], [0], [1], [0, 0, 1, 1], [], []>} : vector<128x128xbf16>, vector<128x128xbf16>, vector<128x128xf32> -> vector<128x128xf32>
    %159 = tpu.reciprocal %156 {approx = true} : vector<128x1xf32> -> vector<128x1xf32>
    %160 = vector.broadcast %159 : vector<128x1xf32> to vector<128x128xf32>
    %161 = arith.mulf %158, %160 : vector<128x128xf32>
    %c0_59 = arith.constant 0 : index
    %c0_60 = arith.constant 0 : index
    %162 = vector.load %arg7[%c0_59, %c0_60] : memref<128x128xf32, #tpu.memory_space<vmem>>, vector<128x128xf32>
    tpu.vector_store %arg7[%c0_59, %c0_60], %161 {strides = array<i32>} : memref<128x128xf32, #tpu.memory_space<vmem>>, vector<128x128xf32>,
    return
  }
  func.func @transform_0(%arg0: i32) -> (i32, i32) {
    %c0_i32 = arith.constant 0 : i32
    %c0_i32_0 = arith.constant 0 : i32
    %c0_i32_1 = arith.constant 0 : i32
    return %c0_i32, %c0_i32_0 : i32, i32
  }
  func.func @transform_1(%arg0: i32) -> (i32, i32) {
    %c0_i32 = arith.constant 0 : i32
    %c0_i32_0 = arith.constant 0 : i32
    %c0_i32_1 = arith.constant 0 : i32
    return %c0_i32, %c0_i32_0 : i32, i32
  }
  func.func @transform_2(%arg0: i32) -> (i32, i32) {
    %c0_i32 = arith.constant 0 : i32
    %c0_i32_0 = arith.constant 0 : i32
    %c0_i32_1 = arith.constant 0 : i32
    return %c0_i32, %c0_i32_0 : i32, i32
  }
  func.func @transform_3(%arg0: i32) -> (i32, i32) {
    %c0_i32 = arith.constant 0 : i32
    %c0_i32_0 = arith.constant 0 : i32
    %c0_i32_1 = arith.constant 0 : i32
    return %c0_i32, %c0_i32_0 : i32, i32
  }
  func.func @transform_4(%arg0: i32) -> (i32, i32) {
    %c0_i32 = arith.constant 0 : i32
    %c0_i32_0 = arith.constant 0 : i32
    %c0_i32_1 = arith.constant 0 : i32
    return %c0_i32, %c0_i32_0 : i32, i32
  }
  func.func @transform_5(%arg0: i32) -> (i32, i32) {
    %c0_i32 = arith.constant 0 : i32
    %c0_i32_0 = arith.constant 0 : i32
    %c0_i32_1 = arith.constant 0 : i32
    return %c0_i32, %c0_i32_0 : i32, i32
  }
  func.func @transform_6(%arg0: i32) -> (i32, i32) {
    %c0_i32 = arith.constant 0 : i32
    %c0_i32_0 = arith.constant 0 : i32
    %c0_i32_1 = arith.constant 0 : i32
    return %c0_i32, %c0_i32_0 : i32, i32
  }
}

</mosaic_0001>

<bundles_post_ra>
// kernel: gat_model.1
= control target key start
LH: loop header
LB: loop body
LE: loop exit
PB: predicated region body
PF: predicated region fallthrough
CT: control target
= control target key end

     0   :  { %vm5887_vm0 = vcmask 130048   ;;  %v5877_v1 = vmov 0.0   ;;  %vm5890_vm1 = vmmov 0   ;;  %v3866_v3 = vmov 32   ;;  %s3872_s22 = smov 112   ;;  %s3873_s23 = smov 104   ;;  %s5869_s2 = inlined_call_operand.vmem [shape: bf16[16,128], index: 2, kind: input, shape index: {}]   ;;  %s5870_s0 = inlined_call_operand.vmem [shape: bf16[128,16], index: 0, kind: input, shape index: {}]   ;;  %s5871_s3 = inlined_call_operand.vmem [shape: bf16[4,16], index: 3, kind: input, shape index: {}]   ;;  %s5872_s1 = inlined_call_operand.vmem [shape: s8[128,128], index: 1, kind: input, shape index: {}]   ;;  %s5873_s4 = inlined_call_operand.vmem [shape: bf16[32,128], index: 4, kind: input, shape index: {}]   ;;  %s5874_s5 = inlined_call_operand.vmem [shape: bf16[1,32], index: 5, kind: input, shape index: {}]   ;;  %s5875_s6 = inlined_call_operand.vmem [shape: f32[128,128], index: 6, kind: output, shape index: {}]  }
   0x1   :  { %v3501_v0 = vld [vmem:[%s5869_s2] sm:$0xff]   ;;  %3221 = vmatprep.subr.bf16.mxu1 %v5877_v1  ;;  %3237 = vmatprep.mubr.msk.bf16.mxu1 %vm5890_vm1, %v5877_v1  ;;  %v3503_v4 = vld [vmem:[%s5870_s0 + $0x8] sm:$0xff]   ;;  %v3504_v5 = vld [vmem:[%s5870_s0 + $0x10] sm:$0xff]   ;;  %v3867_v26 = vmov 33   ;;  %v3868_v29 = vmov 34   ;;  %v5879_v31 = vmov 35   ;;  %v344_v47 = vlaneseq }
   0x2   :  { %v3502_v2 = vld [vmem:[%s5870_s0] sm:$0xff]   ;;  %3455 = vset.pattern.permute.xlu1 %v3866_v3  ;;  %3459 = vset.pattern.permute.xlu0 %v3866_v3  ;;  %v95_v7 = vsel %vm5887_vm0, %v3503_v4, 0  ;;  %v3505_v8 = vld [vmem:[%s5870_s0 + $0x18] sm:$0xff]   ;;  %v98_v10 = vsel %vm5887_vm0, %v3504_v5, 0  ;;  %v3507_v11 = vld [vmem:[%s5870_s0 + $0x28] sm:$0xff]   ;;  %s3874_s24 = smov 8  }
   0x3   :  { %3203 = vmatprep.subr.bf16.mxu0 %v3501_v0  ;;  %3205 = vmatprep.mubr.msk.bf16.mxu0 %vm5887_vm0, %v3502_v2  ;;  %v92_v6 = vsel %vm5887_vm0, %v3502_v2, 0  ;;  %v3506_v9 = vld [vmem:[%s5870_s0 + $0x20] sm:$0xff]   ;;  %v3508_v12 = vld [vmem:[%s5870_s0 + $0x30] sm:$0xff]   ;;  %v101_v13 = vsel %vm5887_vm0, %v3505_v8, 0  ;;  %v3509_v14 = vld [vmem:[%s5870_s0 + $0x38] sm:$0xff]   ;;  %v107_v16 = vsel %vm5887_vm0, %v3507_v11, 0 }
   0x4   :  { %3204 = vmatpush3.bf16.msra.mxu0 %v3501_v0  ;;  %3222 = vmatpush3.bf16.xpose.msra.mxu1 %v92_v6  ;;  %v104_v15 = vsel %vm5887_vm0, %v3506_v9, 0  ;;  %v110_v17 = vsel %vm5887_vm0, %v3508_v12, 0  ;;  %v113_v18 = vsel %vm5887_vm0, %v3509_v14, 0  ;;  %v212_v19 = vld [vmem:[%s5871_s3] sm:$0x3]  ;;  %v4074_v48 = vshrl.u32 %v344_v47, 7 }
   0x5   :  { %3223 = vmatprep.subr.bf16.mxu1 %v5877_v1  ;;  %v412_v61 = vld [vmem:[%s5872_s1] sm:$0xff]  ;;  %v5880_v0 = vmov 0   ;;  %s3875_s25 = smov 16   ;;  %s3876_s2 = smov 24  }
   0x6   :  { %5970 = vst [vmem:[#allocation5_spill] sm:$0xff] %v4074_v48  ;;  %v867_v49 = vsub.s32 1, %v4074_v48  ;;  %v1296_v50 = vsub.s32 2, %v4074_v48  ;;  %v1717_v51 = vsub.s32 3, %v4074_v48  ;;  %vm416_vm2 = vnez %v412_v61 }
   0x7   :  { %3206 = vmatmul.mubr.msk.bf16.vlgmr.msra.gmra.mrb[0].mxu0 %vm5887_vm0, %v3503_v4  ;;  %v420_v2 = vsel %vm416_vm2, 16843009, %v5880_v0 }
   0x8   :  { %3209 = vmatprep.mubr.msk.bf16.mxu0 %vm5887_vm0, %v3504_v5  ;;  %v427_v4 = vunpack.c.3.s8 %v420_v2  ;;  %v425_v6 = vunpack.c.1.s8 %v420_v2 }
   0xc   :  { %3224 = vmatpush3.bf16.xpose.msra.mxu1 %v95_v7 }
   0xd   :  { %3225 = vmatprep.subr.bf16.mxu1 %v5877_v1 }
   0xf   :  { %3210 = vmatmul.mubr.msk.bf16.gmra.mrb[4].mxu0 %vm5887_vm0, %v3505_v8  ;;  %v446_v8 = vpack.c.b16 %v427_v4, %v427_v4  ;;  %v414_v4 = vld [vmem:[%s5872_s1 + $0x10] sm:$0xff] }
  0x10   :  { %3213 = vmatprep.mubr.msk.bf16.mxu0 %vm5887_vm0, %v3506_v9  ;;  %v442_v9 = vpack.c.b16 %v425_v6, %v425_v6  ;;  %vm418_vm10 = vnez %v414_v4 }
  0x14   :  { %3226 = vmatpush3.bf16.xpose.msra.mxu1 %v98_v10 }
  0x15   :  { %3227 = vmatprep.subr.bf16.mxu1 %v5877_v1 }
  0x17   :  { %3214 = vmatmul.mubr.msk.bf16.gmra.mrb[8].mxu0 %vm5887_vm0, %v3507_v11 }
  0x18   :  { %3217 = vmatprep.mubr.msk.bf16.mxu0 %vm5887_vm0, %v3508_v12  ;;  %v447_v12 = vpack.c.b8 %v446_v8, %v446_v8  ;;  %v5982_v8 = vmov 0 }
  0x1a   :  { %vm475_vm3 = vnez %v447_v12 }
  0x1c   :  { %3228 = vmatpush3.bf16.xpose.msra.mxu1 %v101_v13  ;;  %v443_v13 = vpack.c.b8 %v442_v9, %v442_v9 }
  0x1d   :  { %3229 = vmatprep.subr.bf16.mxu1 %v5877_v1 }
  0x1e   :  { %vm473_vm4 = vnez %v443_v13 }
  0x1f   :  { %3218 = vmatmul.mubr.msk.bf16.gmra.mrb[12].mxu0 %vm5887_vm0, %v3509_v14  ;;  %v5876_v14 = vsub.s32 0, %v4074_v48 }
  0x24   :  { %3230 = vmatpush3.bf16.xpose.msra.mxu1 %v104_v15 }
  0x25   :  { %3231 = vmatprep.subr.bf16.mxu1 %v5877_v1 }
  0x2c   :  { %3232 = vmatpush3.bf16.xpose.msra.mxu1 %v107_v16  ;;  %v491_v16 = vsel %vm475_vm3, 16843009, %v5880_v0 }
  0x2d   :  { %3233 = vmatprep.subr.bf16.mxu1 %v5877_v1 }
  0x34   :  { %3234 = vmatpush3.bf16.xpose.msra.mxu1 %v110_v17  ;;  %v413_v17 = vld [vmem:[%s5872_s1 + $0x8] sm:$0xff] }
  0x35   :  { %3235 = vmatprep.subr.bf16.mxu1 %v5877_v1  ;;  %vm417_vm5 = vnez %v413_v17 }
  0x3c   :  { %3236 = vmatpush3.bf16.xpose.msra.mxu1 %v113_v18 }
  0x43   :  { %3238 = vmatmul.mubr.msk.bf16.vlgmr.msra.gmra.mrb[0].mxu1 %vm5887_vm0, %v212_v19 }
  0xda   :  { %v3207_v20 = vpop.f32.mrb[0].mxu0 }
  0xdb   :  { %276 = vperm.xlu1 %3455, %v3207_v20   ;;  %v149_v21 = vpop.f32.mrb[1].mxu0 }
  0xdc   :  { %266 = vperm.xlu0 %3459, %v149_v21   ;;  %v3208_v22 = vpop.f32.mrb[2].mxu0 }
  0xdd   :  { %v3972_v23 = vpack.c.bf16 %v3208_v22, %v3207_v20  ;;  %v3974_v24 = vpop.f32.mrb[3].mxu0 }
  0xde   :  { %v3977_v25 = vpack.c.bf16 %v3974_v24, %v149_v21 }
  0xdf   :  { %3456 = vset.pattern.permute.xlu1 %v3867_v26 }
  0xe0   :  { %810 = vperm.xlu1 %3456, %v3207_v20   ;;  %3460 = vset.pattern.permute.xlu0 %v3867_v26 }
  0xe1   :  { %3241 = vmatprep.subr.bf16.mxu0 %v3977_v25  ;;  %802 = vperm.xlu0 %3460, %v149_v21  }
  0xe2   :  { %3242 = vmatpush3.bf16.msra.mxu0 %v3977_v25  ;;  %v3983_v27 = vpop.f32.mrb[4].mxu0 }
  0xe3   :  { %3243 = vmatprep.subr.bf16.mxu0 %v3972_v23  ;;  %v3986_v28 = vpop.f32.mrb[5].mxu0 }
  0xe4   :  { %3457 = vset.pattern.permute.xlu1 %v3868_v29  ;;  %v3989_v30 = vpop.f32.mrb[6].mxu0 }
  0xe5   :  { %1239 = vperm.xlu1 %3457, %v3207_v20   ;;  %3462 = vset.pattern.permute.xlu0 %v5879_v31  ;;  %v3994_v32 = vpack.c.bf16 %v3989_v30, %v3983_v27  ;;  %v3996_v33 = vpop.f32.mrb[7].mxu0 }
  0xe6   :  { %3244 = vmatpush3.bf16.msra.mxu0 %v3972_v23  ;;  %1652 = vperm.xlu0 %3462, %v149_v21   ;;  %v4001_v34 = vpack.c.bf16 %v3996_v33, %v3986_v28 }
  0xe8   :  { %3245 = vmatprep.subr.bf16.mxu0 %v4001_v34 }
  0xe9   :  { %3458 = vset.pattern.permute.xlu1 %v5879_v31 }
  0xea   :  { %1660 = vperm.xlu1 %3458, %v3207_v20   ;;  %3464 = vset.pattern.permute.xlu0 %v3867_v26  ;;  %v4006_v35 = vpop.f32.mrb[8].mxu0  ;;  %v489_v20 = vsel %vm473_vm4, 16843009, %v5880_v0 }
  0xeb   :  { %814 = vperm.xlu0 %3464, %v3208_v22   ;;  %3246 = vmatpush3.bf16.msra.mxu0 %v4001_v34  ;;  %v4009_v36 = vpop.f32.mrb[9].mxu0  ;;  %v505_v47 = vunpack.c.0.s8 %v489_v20 }
  0xec   :  { %3247 = vmatprep.subr.bf16.mxu0 %v3994_v32  ;;  %v4012_v37 = vpop.f32.mrb[10].mxu0 }
  0xed   :  { %v4016_v38 = vpack.c.bf16 %v4012_v37, %v4006_v35  ;;  %v4018_v39 = vpop.f32.mrb[11].mxu0  ;;  %vm4192_vm9 = vcmp.ne.s32.totalorder %v505_v47, 0 }
  0xee   :  { %3461 = vset.pattern.permute.xlu1 %v3868_v29  ;;  %v4023_v40 = vpack.c.bf16 %v4018_v39, %v4009_v36  ;;  %v5983_v8 = vsel %vm4192_vm9, 4294967295, %v5982_v8 }
  0xef   :  { %5967 = vst [vmem:[#allocation2_spill] sm:$0xff] %v4016_v38  ;;  %1231 = vperm.xlu1 %3461, %v149_v21   ;;  %3466 = vset.pattern.permute.xlu0 %v5879_v31  ;;  %v426_v21 = vunpack.c.2.s8 %v420_v2  ;;  %5984 = vst [vmem:[#allocation15_spill] sm:$0xff] %v5983_v8 }
  0xf0   :  { %1664 = vperm.xlu0 %3466, %v3208_v22   ;;  %3248 = vmatpush3.bf16.msra.mxu0 %v3994_v32 }
  0xf1   :  { %3249 = vmatprep.subr.bf16.mxu0 %v4023_v40 }
  0xf2   :  { %v4028_v41 = vpop.f32.mrb[12].mxu0 }
  0xf3   :  { %3463 = vset.pattern.permute.xlu1 %v3866_v3  ;;  %v4031_v42 = vpop.f32.mrb[13].mxu0 }
  0xf4   :  { %3467 = vset.pattern.permute.xlu0 %v3866_v3  ;;  %281 = vperm.xlu1 %3463, %v3208_v22   ;;  %v4034_v43 = vpop.f32.mrb[14].mxu0 }
  0xf5   :  { %271 = vperm.xlu0 %3467, %v3974_v24   ;;  %3250 = vmatpush3.bf16.msra.mxu0 %v4023_v40  ;;  %v4040_v44 = vpack.c.bf16 %v4034_v43, %v4028_v41  ;;  %v4042_v45 = vpop.f32.mrb[15].mxu0 }
  0xf6   :  { %3251 = vmatprep.subr.bf16.mxu0 %v4016_v38  ;;  %v4047_v46 = vpack.c.bf16 %v4042_v45, %v4031_v42 }
  0xf7   :  { %5968 = vst [vmem:[#allocation3_spill] sm:$0xff] %v4040_v44 }
  0xf8   :  { %5969 = vst [vmem:[#allocation4_spill] sm:$0xff] %v4047_v46  ;;  %3465 = vset.pattern.permute.xlu1 %v3868_v29 }
  0xf9   :  { %1243 = vperm.xlu1 %3465, %v3208_v22   ;;  %296 = vperm.xlu0 %3467, %v3983_v27  }
  0xfa   :  { %3252 = vmatpush3.bf16.msra.mxu0 %v4016_v38 }
  0xfb   :  { %3253 = vmatprep.subr.bf16.mxu0 %v4047_v46 }
  0xfd   :  { %3468 = vset.pattern.permute.xlu1 %v3867_v26  ;;  %286 = vperm.xlu0 %3467, %v3986_v28  }
  0xfe   :  { %806 = vperm.xlu1 %3468, %v3974_v24   ;;  %3254 = vmatpush3.bf16.msra.mxu0 %v4047_v46 }
  0xff   :  { %3255 = vmatprep.subr.bf16.mxu0 %v4040_v44 }
 0x101   :  { %3474 = vset.pattern.permute.xlu0 %v5879_v31 }
 0x102   :  { %3469 = vset.pattern.permute.xlu1 %v5879_v31  ;;  %1668 = vperm.xlu0 %3474, %v3986_v28  }
 0x103   :  { %1656 = vperm.xlu1 %3469, %v3974_v24   ;;  %3256 = vmatpush3.bf16.msra.mxu0 %v4040_v44 }
 0x106   :  { %3476 = vset.pattern.permute.xlu0 %v3867_v26 }
 0x107   :  { %3470 = vset.pattern.permute.xlu1 %v3867_v26  ;;  %830 = vperm.xlu0 %3476, %v3989_v30  }
 0x108   :  { %826 = vperm.xlu1 %3470, %v3983_v27  }
 0x10b   :  { %822 = vperm.xlu0 %3476, %v3996_v33  }
 0x10c   :  { %3471 = vset.pattern.permute.xlu1 %v3868_v29 }
 0x10d   :  { %1255 = vperm.xlu1 %3471, %v3983_v27  }
 0x10f   :  { %3482 = vset.pattern.permute.xlu0 %v3866_v3 }
 0x110   :  { %316 = vperm.xlu0 %3482, %v4006_v35  }
 0x111   :  { %3472 = vset.pattern.permute.xlu1 %v5879_v31 }
 0x112   :  { %1676 = vperm.xlu1 %3472, %v3983_v27   ;;  %v507_v27 = vunpack.c.0.s8 %v491_v16 }
 0x114   :  { %306 = vperm.xlu0 %3482, %v4009_v36   ;;  %vm4180_vm8 = vcmp.ne.s32.totalorder %v507_v27, 0 }
 0x116   :  { %3473 = vset.pattern.permute.xlu1 %v3867_v26  ;;  %v4082_v52 = vpop.f32.mrb[0].mxu1 }
 0x117   :  { %818 = vperm.xlu1 %3473, %v3986_v28   ;;  %v4086_v53 = vrot.slane %v4082_v52, %v867_v49  ;;  %v4089_v54 = vrot.slane %v4082_v52, %v1296_v50  ;;  %v4092_v55 = vrot.slane %v4082_v52, %v1717_v51  ;;  %v3239_v56 = vpop.f32.mrb[1].mxu1  ;;  %v4170_v18 = vrot.slane %v4082_v52, %v5876_v14 }
 0x118   :  { %3488 = vset.pattern.permute.xlu0 %v3867_v26  ;;  %v253_v57 = vpop.f32.mrb[2].mxu1  ;;  %v444_v50 = vpack.c.b16 %v426_v21, %v426_v21  ;;  %v4176_v51 = vsel %vm417_vm5, 16843009, %v5880_v0  ;;  %v4205_v21 = vsel %vm418_vm10, 16843009, %v5880_v0 }
 0x119   :  { %5971 = vst [vmem:[#allocation6_spill] sm:$0xff] %v4089_v54  ;;  %5972 = vst [vmem:[#allocation7_spill] sm:$0xff] %v4092_v55  ;;  %846 = vperm.xlu0 %3488, %v4012_v37   ;;  %v3240_v58 = vpop.f32.mrb[3].mxu1  ;;  %v430_v9 = vunpack.c.2.s8 %v4176_v51  ;;  %v434_v47 = vunpack.c.2.s8 %v4205_v21 }
 0x11a   :  { %v5979_v58 = vmov 0  ;;  %v445_v12 = vpack.c.b8 %v444_v50, %v444_v50 }
 0x11b   :  { %3475 = vset.pattern.permute.xlu1 %v3866_v3  ;;  %v5980_v58 = vsel %vm4180_vm8, 4294967295, %v5979_v58  ;;  %v452_v20 = vpack.c.b16 %v430_v9, %v430_v9  ;;  %v460_v9 = vpack.c.b16 %v434_v47, %v434_v47 }
 0x11c   :  { %301 = vperm.xlu1 %3475, %v3989_v30   ;;  %5981 = vst [vmem:[#allocation14_spill] sm:$0xff] %v5980_v58  ;;  %vm474_vm11 = vnez %v445_v12 }
 0x11d   :  { %838 = vperm.xlu0 %3488, %v4018_v39  }
 0x120   :  { %3477 = vset.pattern.permute.xlu1 %v3868_v29 }
 0x121   :  { %1259 = vperm.xlu1 %3477, %v3989_v30   ;;  %3491 = vset.pattern.permute.xlu0 %v5879_v31 }
 0x122   :  { %1688 = vperm.xlu0 %3491, %v4018_v39  }
 0x125   :  { %3478 = vset.pattern.permute.xlu1 %v5879_v31 }
 0x126   :  { %1680 = vperm.xlu1 %3478, %v3989_v30   ;;  %3492 = vset.pattern.permute.xlu0 %v3866_v3  ;;  %v424_v30 = vunpack.c.0.s8 %v420_v2 }
 0x127   :  { %336 = vperm.xlu0 %3492, %v4028_v41  }
 0x128   :  { %v440_v2 = vpack.c.b16 %v424_v30, %v424_v30  ;;  %v490_v30 = vsel %vm474_vm11, 16843009, %v5880_v0 }
 0x129   :  { %v506_v50 = vunpack.c.0.s8 %v490_v30  ;;  %v431_v30 = vunpack.c.3.s8 %v4176_v51 }
 0x12a   :  { %3479 = vset.pattern.permute.xlu1 %v3866_v3 }
 0x12b   :  { %291 = vperm.xlu1 %3479, %v3996_v33   ;;  %326 = vperm.xlu0 %3492, %v4031_v42   ;;  %vm4223_vm15 = vcmp.ne.s32.totalorder %v506_v50, 0  ;;  %v5991_v50 = vmov 0 }
 0x12f   :  { %3480 = vset.pattern.permute.xlu1 %v3868_v29  ;;  %3495 = vset.pattern.permute.xlu0 %v3867_v26 }
 0x130   :  { %1251 = vperm.xlu1 %3480, %v3996_v33   ;;  %862 = vperm.xlu0 %3495, %v4034_v43  }
 0x134   :  { %3481 = vset.pattern.permute.xlu1 %v5879_v31  ;;  %854 = vperm.xlu0 %3495, %v4042_v45  }
 0x135   :  { %1672 = vperm.xlu1 %3481, %v3996_v33  }
 0x138   :  { %3497 = vset.pattern.permute.xlu0 %v3868_v29 }
 0x139   :  { %3483 = vset.pattern.permute.xlu1 %v3867_v26 }
 0x13a   :  { %842 = vperm.xlu1 %3483, %v4006_v35  }
 0x13e   :  { %3484 = vset.pattern.permute.xlu1 %v5879_v31 }
 0x13f   :  { %1692 = vperm.xlu1 %3484, %v4006_v35  }
 0x143   :  { %3485 = vset.pattern.permute.xlu1 %v3867_v26 }
 0x144   :  { %834 = vperm.xlu1 %3485, %v4009_v36  }
 0x148   :  { %3486 = vset.pattern.permute.xlu1 %v5879_v31 }
 0x149   :  { %1684 = vperm.xlu1 %3486, %v4009_v36  }
 0x14d   :  { %3487 = vset.pattern.permute.xlu1 %v3866_v3 }
 0x14e   :  { %321 = vperm.xlu1 %3487, %v4012_v37  }
 0x152   :  { %3489 = vset.pattern.permute.xlu1 %v5879_v31  ;;  %v461_v31 = vpack.c.b8 %v460_v9, %v460_v9 }
 0x153   :  { %1696 = vperm.xlu1 %3489, %v4012_v37  }
 0x154   :  { %vm482_vm5 = vnez %v461_v31  ;;  %v5996_v31 = vmov 0 }
 0x157   :  { %3490 = vset.pattern.permute.xlu1 %v3866_v3 }
 0x158   :  { %311 = vperm.xlu1 %3490, %v4018_v39  }
 0x15a   :  { %v4131_v59 = vpop.permute.xlu1 %276 }
 0x15b   :  { %v4133_v60 = vpop.permute.xlu0 %266  ;;  %v350_v27 = vadd.f32 %v4170_v18, %v4131_v59 }
 0x15c   :  { %3493 = vset.pattern.permute.xlu1 %v3867_v26 }
 0x15d   :  { %858 = vperm.xlu1 %3493, %v4028_v41   ;;  %vm366_vm14 = vcmp.ge.f32.partialorder %v350_v27, 0.0 }
 0x15f   :  { %v4140_v62 = vpop.permute.xlu1 %810 }
 0x160   :  { %v4142_v63 = vpop.permute.xlu0 %802 }
 0x161   :  { %850 = vperm.xlu1 %3493, %v4031_v42  }
 0x164   :  { %v4146_v5 = vpop.permute.xlu1 %1239 }
 0x165   :  { %5973 = vst [vmem:[#allocation8_spill] sm:$0xff] %v4146_v5  ;;  %v4148_v7 = vpop.permute.xlu0 %1652  ;;  %3494 = vset.pattern.permute.xlu1 %v3866_v3 }
 0x166   :  { %5974 = vst [vmem:[#allocation9_spill] sm:$0xff] %v4148_v7  ;;  %341 = vperm.xlu1 %3494, %v4034_v43  }
 0x169   :  { %v4152_v10 = vpop.permute.xlu1 %1660 }
 0x16a   :  { %5975 = vst [vmem:[#allocation10_spill] sm:$0xff] %v4152_v10  ;;  %v4154_v11 = vpop.permute.xlu0 %814  ;;  %331 = vperm.xlu1 %3494, %v4042_v45  }
 0x16e   :  { %v4158_v15 = vpop.permute.xlu1 %1231  ;;  %3496 = vset.pattern.permute.xlu1 %v3868_v29 }
 0x16f   :  { %5976 = vst [vmem:[#allocation11_spill] sm:$0xff] %v4158_v15  ;;  %v4161_v3 = vpop.permute.xlu0 %1664 }
 0x170   :  { %5977 = vst [vmem:[#allocation12_spill] sm:$0xff] %v4161_v3  ;;  %v6006_v3 = vmov 0 }
 0x173   :  { %v282_v19 = vpop.permute.xlu1 %281 }
 0x174   :  { %v351_v22 = vadd.f32 %v4170_v18, %v282_v19  ;;  %v272_v26 = vpop.permute.xlu0 %271  ;;  %v441_v19 = vpack.c.b8 %v440_v2, %v440_v2  ;;  %v348_v2 = vadd.f32 %v4170_v18, %v4133_v60 }
 0x175   :  { %v349_v29 = vadd.f32 %v4170_v18, %v272_v26 }
 0x176   :  { %vm367_vm6 = vcmp.ge.f32.partialorder %v351_v22, 0.0  ;;  %v383_v33 = vmul.f32 0.01, %v351_v22  ;;  %vm472_vm12 = vnez %v441_v19  ;;  %v5987_v19 = vmov 0 }
 0x177   :  { %vm365_vm7 = vcmp.ge.f32.partialorder %v349_v29, 0.0  ;;  %v381_v49 = vmul.f32 0.01, %v349_v29  ;;  %v5988_v19 = vsel %vm4223_vm15, 4294967295, %v5987_v19  ;;  %v380_v1 = vmul.f32 0.01, %v348_v2 }
 0x178   :  { %v4178_v52 = vpop.permute.xlu1 %1243  ;;  %v297_v56 = vpop.permute.xlu0 %296  ;;  %v399_v57 = vsel %vm367_vm6, %v351_v22, %v383_v33  ;;  %v428_v22 = vunpack.c.0.s8 %v4176_v51  ;;  %v453_v33 = vpack.c.b8 %v452_v20, %v452_v20  ;;  %5989 = vst [vmem:[#allocation18_spill] sm:$0xff] %v5988_v19  ;;  %vm364_vm2 = vcmp.ge.f32.partialorder %v348_v2, 0.0 }
 0x179   :  { %5978 = vst [vmem:[#allocation13_spill] sm:$0xff] %v4178_v52  ;;  %v4186_v61 = vsel %vm4180_vm8, %v399_v57, -1e+30  ;;  %v397_v6 = vsel %vm365_vm7, %v349_v29, %v381_v49  ;;  %v488_v57 = vsel %vm472_vm12, 16843009, %v5880_v0  ;;  %v354_v60 = vadd.f32 %v4170_v18, %v297_v56 }
 0x17a   :  { %558 = vmax.xlane.f32.xlu0 %v4186_v61  ;;  %v4201_v17 = vsel %vm4192_vm9, %v397_v6, -1e+30  ;;  %v448_v49 = vpack.c.b16 %v428_v22, %v428_v22  ;;  %v382_v6 = vmul.f32 0.01, %v350_v27  ;;  %vm478_vm13 = vnez %v453_v33 }
 0x17b   :  { %v504_v20 = vunpack.c.0.s8 %v488_v57  ;;  %v494_v22 = vsel %vm478_vm13, 16843009, %v5880_v0  ;;  %v454_v0 = vpack.c.b16 %v431_v30, %v431_v30  ;;  %vm370_vm6 = vcmp.ge.f32.partialorder %v354_v60, 0.0 }
 0x17c   :  { %v287_v13 = vpop.permute.xlu0 %286  ;;  %v449_v12 = vpack.c.b8 %v448_v49, %v448_v49  ;;  %v398_v14 = vsel %vm366_vm14, %v350_v27, %v382_v6  ;;  %v510_v57 = vunpack.c.0.s8 %v494_v22  ;;  %v396_v27 = vsel %vm364_vm2, %v348_v2, %v380_v1 }
 0x17d   :  { %v4197_v16 = vpop.permute.xlu1 %806  ;;  %v4236_v49 = vsel %vm4223_vm15, %v398_v14, -1e+30  ;;  %vm4238_vm4 = vcmp.ne.s32.totalorder %v504_v20, 0  ;;  %v352_v56 = vadd.f32 %v4170_v18, %v287_v13  ;;  %v386_v6 = vmul.f32 0.01, %v354_v60 }
 0x17e   :  { %554 = vmax.xlane.f32.xlu0 %v4201_v17  ;;  %vm476_vm3 = vnez %v449_v12  ;;  %v5992_v50 = vsel %vm4238_vm4, 4294967295, %v5991_v50  ;;  %v5994_v12 = vmov 0   ;;  %v4250_v20 = vsel %vm4238_vm4, %v396_v27, -1e+30 }
 0x17f   :  { %5993 = vst [vmem:[#allocation20_spill] sm:$0xff] %v5992_v50  ;;  %v492_v48 = vsel %vm476_vm3, 16843009, %v5994_v12  ;;  %v498_v22 = vsel %vm482_vm5, 16843009, %v5994_v12  ;;  %v455_v13 = vpack.c.b8 %v454_v0, %v454_v0  ;;  %v402_v1 = vsel %vm370_vm6, %v354_v60, %v386_v6 }
 0x180   :  { %vm4254_vm7 = vcmp.ne.s32.totalorder %v510_v57, 0  ;;  %v384_v2 = vmul.f32 0.01, %v352_v56  ;;  %v508_v30 = vunpack.c.0.s8 %v492_v48  ;;  %vm368_vm10 = vcmp.ge.f32.partialorder %v352_v56, 0.0 }
 0x181   :  { %v4208_v26 = vpop.permute.xlu0 %1668  ;;  %v5997_v31 = vsel %vm4254_vm7, 4294967295, %v5996_v31  ;;  %v5999_v60 = vmov 0  ;;  %vm479_vm13 = vnez %v455_v13  ;;  %v6002_v48 = vmov 0 }
 0x182   :  { %5985 = vst [vmem:[#allocation16_spill] sm:$0xff] %v4208_v26  ;;  %v4212_v29 = vpop.permute.xlu1 %1656  ;;  %5998 = vst [vmem:[#allocation22_spill] sm:$0xff] %v5997_v31  ;;  %v514_v26 = vunpack.c.0.s8 %v498_v22  ;;  %v400_v0 = vsel %vm368_vm10, %v352_v56, %v384_v2  ;;  %vm4265_vm12 = vcmp.ne.s32.totalorder %v508_v30, 0  ;;  %v495_v22 = vsel %vm479_vm13, 16843009, %v5994_v12 }
 0x183   :  { %5986 = vst [vmem:[#allocation17_spill] sm:$0xff] %v4212_v29  ;;  %v6000_v60 = vsel %vm4265_vm12, 4294967295, %v5999_v60  ;;  %v4275_v6 = vsel %vm4265_vm12, %v400_v0, -1e+30  ;;  %v432_v56 = vunpack.c.0.s8 %v4205_v21  ;;  %v511_v13 = vunpack.c.0.s8 %v495_v22 }
 0x184   :  { %6001 = vst [vmem:[#allocation23_spill] sm:$0xff] %v6000_v60  ;;  %vm4269_vm14 = vcmp.ne.s32.totalorder %v514_v26, 0 }
 0x185   :  { %v6003_v48 = vsel %vm4269_vm14, 4294967295, %v6002_v48  ;;  %vm4289_vm3 = vcmp.ne.s32.totalorder %v511_v13, 0 }
 0x186   :  { %v4219_v4 = vpop.permute.xlu0 %830  ;;  %6004 = vst [vmem:[#allocation24_spill] sm:$0xff] %v6003_v48  ;;  %v6007_v3 = vsel %vm4289_vm3, 4294967295, %v6006_v3 }
 0x187   :  { %v4221_v59 = vpop.permute.xlu1 %826  ;;  %6008 = vst [vmem:[#allocation26_spill] sm:$0xff] %v6007_v3 }
 0x18a   :  { %v4230_v33 = vpop.permute.xlu0 %822 }
 0x18c   :  { %v4232_v47 = vpop.permute.xlu1 %1255 }
 0x18d   :  { %5990 = vst [vmem:[#allocation19_spill] sm:$0xff] %v4232_v47 }
 0x18e   :  { %556 = vmax.xlane.f32.xlu1 %v4236_v49 }
 0x18f   :  { %v317_v9 = vpop.permute.xlu0 %316 }
 0x190   :  { %v358_v14 = vadd.f32 %v4170_v18, %v317_v9 }
 0x191   :  { %v4246_v47 = vpop.permute.xlu1 %1676 }
 0x192   :  { %5995 = vst [vmem:[#allocation21_spill] sm:$0xff] %v4246_v47  ;;  %552 = vmax.xlane.f32.xlu1 %v4250_v20  ;;  %v390_v9 = vmul.f32 0.01, %v358_v14  ;;  %v4260_v47 = vsel %vm4254_vm7, %v402_v1, -1e+30  ;;  %vm374_vm11 = vcmp.ge.f32.partialorder %v358_v14, 0.0  ;;  %v429_v1 = vunpack.c.1.s8 %v4176_v51 }
 0x194   :  { %v406_v57 = vsel %vm374_vm11, %v358_v14, %v390_v9  ;;  %v450_v30 = vpack.c.b16 %v429_v1, %v429_v1  ;;  %v456_v9 = vpack.c.b16 %v432_v56, %v432_v56  ;;  %v307_v1 = vpop.permute.xlu0 %306 }
 0x195   :  { %v4283_v14 = vsel %vm4269_vm14, %v406_v57, -1e+30  ;;  %v356_v56 = vadd.f32 %v4170_v18, %v307_v1 }
 0x196   :  { %v4262_v27 = vpop.permute.xlu1 %818  ;;  %564 = vmax.xlane.f32.xlu1 %v4260_v47  ;;  %v451_v29 = vpack.c.b8 %v450_v30, %v450_v30 }
 0x197   :  { %v388_v52 = vmul.f32 0.01, %v356_v56  ;;  %vm372_vm10 = vcmp.ge.f32.partialorder %v356_v56, 0.0 }
 0x198   :  { %vm477_vm5 = vnez %v451_v29 }
 0x199   :  { %v404_v1 = vsel %vm372_vm10, %v356_v56, %v388_v52  ;;  %v435_v52 = vunpack.c.3.s8 %v4205_v21 }
 0x19a   :  { %560 = vmax.xlane.f32.xlu1 %v4275_v6 }
 0x19b   :  { %v302_v2 = vpop.permute.xlu1 %301 }
 0x19c   :  { %v355_v26 = vadd.f32 %v4170_v18, %v302_v2  ;;  %v457_v2 = vpack.c.b8 %v456_v9, %v456_v9 }
 0x19e   :  { %572 = vmax.xlane.f32.xlu1 %v4283_v14  ;;  %vm371_vm2 = vcmp.ge.f32.partialorder %v355_v26, 0.0  ;;  %v387_v0 = vmul.f32 0.01, %v355_v26  ;;  %vm480_vm6 = vnez %v457_v2  ;;  %v6011_v2 = vmov 0 }
 0x19f   :  { %v496_v13 = vsel %vm480_vm6, 16843009, %v5994_v12 }
 0x1a0   :  { %v4287_v10 = vpop.permute.xlu1 %1259  ;;  %v403_v51 = vsel %vm371_vm2, %v355_v26, %v387_v0  ;;  %v493_v26 = vsel %vm477_vm5, 16843009, %v5994_v12  ;;  %v512_v30 = vunpack.c.0.s8 %v496_v13 }
 0x1a1   :  { %6005 = vst [vmem:[#allocation25_spill] sm:$0xff] %v4287_v10  ;;  %v4295_v57 = vsel %vm4289_vm3, %v403_v51, -1e+30  ;;  %v509_v51 = vunpack.c.0.s8 %v493_v26 }
 0x1a2   :  { %566 = vmax.xlane.f32.xlu0 %v4295_v57  ;;  %vm4310_vm2 = vcmp.ne.s32.totalorder %v512_v30, 0 }
 0x1a3   :  { %vm4306_vm13 = vcmp.ne.s32.totalorder %v509_v51, 0  ;;  %v4321_v13 = vsel %vm4310_vm2, %v404_v1, -1e+30  ;;  %v462_v51 = vpack.c.b16 %v435_v52, %v435_v52 }
 0x1a4   :  { %v6012_v2 = vsel %vm4306_vm13, 4294967295, %v6011_v2 }
 0x1a5   :  { %v4298_v22 = vpop.permute.xlu1 %1680  ;;  %6013 = vst [vmem:[#allocation29_spill] sm:$0xff] %v6012_v2 }
 0x1a6   :  { %6009 = vst [vmem:[#allocation27_spill] sm:$0xff] %v4298_v22  ;;  %v6014_v22 = vmov 0 }
 0x1a7   :  { %v6015_v22 = vsel %vm4310_vm2, 4294967295, %v6014_v22 }
 0x1a8   :  { %6016 = vst [vmem:[#allocation30_spill] sm:$0xff] %v6015_v22 }
 0x1aa   :  { %v292_v0 = vpop.permute.xlu1 %291 }
 0x1ab   :  { %v353_v10 = vadd.f32 %v4170_v18, %v292_v0 }
 0x1ad   :  { %vm369_vm11 = vcmp.ge.f32.partialorder %v353_v10, 0.0  ;;  %v385_v9 = vmul.f32 0.01, %v353_v10 }
 0x1af   :  { %v4304_v55 = vpop.permute.xlu1 %1251  ;;  %v401_v29 = vsel %vm369_vm11, %v353_v10, %v385_v9  ;;  %v463_v9 = vpack.c.b8 %v462_v51, %v462_v51  ;;  %v6021_v51 = vmov 0 }
 0x1b0   :  { %6010 = vst [vmem:[#allocation28_spill] sm:$0xff] %v4304_v55  ;;  %v4316_v26 = vsel %vm4306_vm13, %v401_v29, -1e+30  ;;  %v433_v29 = vunpack.c.1.s8 %v4205_v21 }
 0x1b1   :  { %562 = vmax.xlane.f32.xlu0 %v4316_v26  ;;  %vm483_vm5 = vnez %v463_v9 }
 0x1b2   :  { %v458_v1 = vpack.c.b16 %v433_v29, %v433_v29 }
 0x1b4   :  { %v4323_v10 = vpop.permute.xlu1 %1672  ;;  %v459_v44 = vpack.c.b8 %v458_v1, %v458_v1 }
 0x1b5   :  { %6017 = vst [vmem:[#allocation31_spill] sm:$0xff] %v4323_v10  ;;  %568 = vmax.xlane.f32.xlu0 %v4321_v13  ;;  %v499_v10 = vsel %vm483_vm5, 16843009, %v5994_v12 }
 0x1b6   :  { %v515_v15 = vunpack.c.0.s8 %v499_v10  ;;  %vm481_vm11 = vnez %v459_v44 }
 0x1b7   :  { %v6106_v8 = vld [vmem:[#allocation28_spill] sm:$0xff] }
 0x1b8   :  { %vm4340_vm10 = vcmp.ne.s32.totalorder %v515_v15, 0  ;;  %v4360_v15 = vpop.permute.xlu0 %846 }
 0x1b9   :  { %v4326_v0 = vpop.permute.xlu1 %842  ;;  %v6022_v51 = vsel %vm4340_vm10, 4294967295, %v6021_v51 }
 0x1ba   :  { %6023 = vst [vmem:[#allocation35_spill] sm:$0xff] %v6022_v51 }
 0x1be   :  { %v4329_v56 = vpop.permute.xlu1 %1692 }
 0x1bf   :  { %6018 = vst [vmem:[#allocation32_spill] sm:$0xff] %v4329_v56 }
 0x1c3   :  { %v4331_v30 = vpop.permute.xlu1 %834 }
 0x1c8   :  { %v4334_v55 = vpop.permute.xlu1 %1684 }
 0x1c9   :  { %6019 = vst [vmem:[#allocation33_spill] sm:$0xff] %v4334_v55 }
 0x1cd   :  { %v322_v7 = vpop.permute.xlu1 %321 }
 0x1ce   :  { %v359_v5 = vadd.f32 %v4170_v18, %v322_v7  ;;  %v497_v7 = vsel %vm481_vm11, 16843009, %v5994_v12 }
 0x1cf   :  { %v513_v29 = vunpack.c.0.s8 %v497_v7 }
 0x1d0   :  { %vm375_vm6 = vcmp.ge.f32.partialorder %v359_v5, 0.0  ;;  %v391_v54 = vmul.f32 0.01, %v359_v5 }
 0x1d2   :  { %v4338_v56 = vpop.permute.xlu1 %1696  ;;  %v407_v52 = vsel %vm375_vm6, %v359_v5, %v391_v54  ;;  %vm4351_vm6 = vcmp.ne.s32.totalorder %v513_v29, 0  ;;  %v6024_v5 = vmov 0 }
 0x1d3   :  { %6020 = vst [vmem:[#allocation34_spill] sm:$0xff] %v4338_v56  ;;  %v4346_v21 = vsel %vm4340_vm10, %v407_v52, -1e+30  ;;  %v6025_v5 = vsel %vm4351_vm6, 4294967295, %v6024_v5  ;;  %v4364_v52 = vpop.permute.xlu0 %838 }
 0x1d4   :  { %574 = vmax.xlane.f32.xlu0 %v4346_v21  ;;  %6026 = vst [vmem:[#allocation36_spill] sm:$0xff] %v6025_v5 }
 0x1d7   :  { %v312_v10 = vpop.permute.xlu1 %311  ;;  %v4369_v7 = vpop.permute.xlu0 %1688 }
 0x1d8   :  { %v357_v9 = vadd.f32 %v4170_v18, %v312_v10  ;;  %6027 = vst [vmem:[#allocation37_spill] sm:$0xff] %v4369_v7 }
 0x1da   :  { %vm373_vm5 = vcmp.ge.f32.partialorder %v357_v9, 0.0  ;;  %v389_v1 = vmul.f32 0.01, %v357_v9 }
 0x1dc   :  { %v405_v54 = vsel %vm373_vm5, %v357_v9, %v389_v1  ;;  %v4373_v10 = vpop.permute.xlu1 %858  ;;  %v6030_v9 = vmov 35  }
 0x1dd   :  { %v4357_v44 = vsel %vm4351_vm6, %v405_v54, -1e+30  ;;  %6028 = vst [vmem:[#allocation38_spill] sm:$0xff] %v4373_v10 }
 0x1de   :  { %570 = vmax.xlane.f32.xlu1 %v4357_v44 }
 0x1ea   :  { %1235 = vperm.xlu0 %3497, %v3974_v24   ;;  %v415_v24 = vld [vmem:[%s5872_s1 + $0x18] sm:$0xff]  ;;  %s3871_s1 = smov 120  }
 0x1eb   :  { %vm419_vm11 = vnez %v415_v24 }
 0x1ee   :  { %1247 = vperm.xlu0 %3497, %v3986_v28   ;;  %v337_v28 = vpop.permute.xlu0 %336 }
 0x1ef   :  { %1263 = vperm.xlu1 %3496, %v4009_v36   ;;  %v4383_v36 = vsel %vm419_vm11, 16843009, %v5994_v12 }
 0x1f0   :  { %v438_v29 = vunpack.c.2.s8 %v4383_v36 }
 0x1f2   :  { %1271 = vperm.xlu0 %3497, %v4006_v35   ;;  %v4380_v35 = vpop.permute.xlu1 %850  ;;  %v468_v56 = vpack.c.b16 %v438_v29, %v438_v29 }
 0x1f3   :  { %1267 = vperm.xlu1 %3496, %v4018_v39   ;;  %6029 = vst [vmem:[#allocation39_spill] sm:$0xff] %v4380_v35  ;;  %v437_v39 = vunpack.c.1.s8 %v4383_v36 }
 0x1f4   :  { %v469_v10 = vpack.c.b8 %v468_v56, %v468_v56 }
 0x1f5   :  { %v466_v54 = vpack.c.b16 %v437_v39, %v437_v39  ;;  %v362_v39 = vadd.f32 %v4170_v18, %v337_v28 }
 0x1f6   :  { %1279 = vperm.xlu0 %3497, %v4031_v42   ;;  %v4391_v1 = vpop.permute.xlu1 %341  ;;  %vm486_vm11 = vnez %v469_v10 }
 0x1f7   :  { %1275 = vperm.xlu1 %3496, %v4012_v37   ;;  %v4386_v37 = vpop.permute.xlu0 %326  ;;  %v467_v7 = vpack.c.b8 %v466_v54, %v466_v54  ;;  %v394_v46 = vmul.f32 0.01, %v362_v39  ;;  %vm378_vm1 = vcmp.ge.f32.partialorder %v362_v39, 0.0 }
 0x1f9   :  { %vm485_vm5 = vnez %v467_v7  ;;  %v410_v28 = vsel %vm378_vm1, %v362_v39, %v394_v46 }
 0x1fa   :  { %1291 = vperm.xlu0 %3497, %v4034_v43   ;;  %v332_v55 = vpop.permute.xlu1 %331 }
 0x1fb   :  { %1283 = vperm.xlu1 %3496, %v4042_v45   ;;  %v4394_v24 = vpop.permute.xlu0 %862 }
 0x1fc   :  { %6031 = vst [vmem:[#allocation40_spill] sm:$0xff] %v4394_v24 }
 0x1ff   :  { %1287 = vperm.xlu1 %3496, %v4028_v41   ;;  %v4398_v35 = vpop.permute.xlu0 %854 }
 0x203   :  { %3498 = vset.pattern.permute.xlu1 %v6030_v9  ;;  %v361_v9 = vadd.f32 %v4170_v18, %v332_v55 }
 0x204   :  { %1700 = vperm.xlu1 %3498, %v4031_v42   ;;  %v501_v42 = vsel %vm485_vm5, 16843009, %v5994_v12 }
 0x205   :  { %v393_v24 = vmul.f32 0.01, %v361_v9  ;;  %vm377_vm0 = vcmp.ge.f32.partialorder %v361_v9, 0.0  ;;  %v517_v56 = vunpack.c.0.s8 %v501_v42  ;;  %v6036_v42 = vmov 0 }
 0x207   :  { %v559_v29 = vpop.xlane.xlu0 %558  ;;  %v409_v54 = vsel %vm377_vm0, %v361_v9, %v393_v24  ;;  %vm4407_vm10 = vcmp.ne.s32.totalorder %v517_v56, 0  ;;  %v436_v24 = vunpack.c.0.s8 %v4383_v36 }
 0x208   :  { %1704 = vperm.xlu1 %3498, %v4042_v45   ;;  %v502_v45 = vsel %vm486_vm11, 16843009, %v5994_v12  ;;  %v4413_v10 = vsel %vm4407_vm10, %v409_v54, -1e+30  ;;  %v587_v38 = vsub.f32 %v4186_v61, %v559_v29 }
 0x209   :  { %v518_v55 = vunpack.c.0.s8 %v502_v45  ;;  %6035 = vst [vmem:[#allocation42_spill] sm:$0xff] %v4413_v10  ;;  %v464_v39 = vpack.c.b16 %v436_v24, %v436_v24 }
 0x20b   :  { %v555_v7 = vpop.xlane.xlu0 %554  ;;  %vm4416_vm5 = vcmp.ne.s32.totalorder %v518_v55, 0 }
 0x20c   :  { %1708 = vperm.xlu1 %3498, %v4028_v41   ;;  %v869_v41 = vadd.f32 %v4086_v53, %v4142_v63  ;;  %v6037_v42 = vsel %vm4416_vm5, 4294967295, %v6036_v42  ;;  %v585_v9 = vsub.f32 %v4201_v17, %v555_v7  ;;  %v4425_v54 = vsel %vm4416_vm5, %v410_v28, -1e+30 }
 0x20d   :  { %6038 = vst [vmem:[#allocation43_spill] sm:$0xff] %v6037_v42  ;;  %v606_v7 = vmul.f32 1.442695, %v587_v38  ;;  %v465_v28 = vpack.c.b8 %v464_v39, %v464_v39  ;;  %v363_v38 = vadd.f32 %v4170_v18, %v4391_v1 }
 0x20e   :  { %v901_v63 = vmul.f32 0.01, %v869_v41  ;;  %vm885_vm0 = vcmp.ge.f32.partialorder %v869_v41, 0.0  ;;  %v602_v55 = vmul.f32 1.442695, %v585_v9 }
 0x20f   :  { %vm484_vm1 = vnez %v465_v28 }
 0x210   :  { %1712 = vperm.xlu1 %3498, %v4034_v43   ;;  %v6032_v43 = vmov 0  ;;  %v917_v46 = vsel %vm885_vm0, %v869_v41, %v901_v63  ;;  %3512 = vpow2.f32 %v602_v55  ;;  %v395_v55 = vmul.f32 0.01, %v363_v38 }
 0x211   :  { %v6033_v43 = vsel %vm4407_vm10, 4294967295, %v6032_v43  ;;  %v4432_v17 = vsel %vm4238_vm4, %v917_v46, -1e+30  ;;  %vm379_vm4 = vcmp.ge.f32.partialorder %v363_v38, 0.0 }
 0x212   :  { %6034 = vst [vmem:[#allocation41_spill] sm:$0xff] %v6033_v43 }
 0x219   :  { %578 = vmax.xlane.f32.xlu0 %v4413_v10 }
 0x21a   :  { %v4439_v24 = vpop.eup %3512 }
 0x21b   :  { %v557_v45 = vpop.xlane.xlu1 %556  ;;  %6039 = vst [vmem:[#allocation44_spill] sm:$0xff] %v4439_v24 }
 0x21c   :  { %v586_v56 = vsub.f32 %v4236_v49, %v557_v45  ;;  %v439_v49 = vunpack.c.3.s8 %v4383_v36  ;;  %v6043_v45 = vmov 0 }
 0x21d   :  { %580 = vmax.xlane.f32.xlu0 %v4425_v54 }
 0x21e   :  { %v604_v43 = vmul.f32 1.442695, %v586_v56  ;;  %v470_v29 = vpack.c.b16 %v439_v49, %v439_v49 }
 0x21f   :  { %v553_v51 = vpop.xlane.xlu1 %552 }
 0x220   :  { %v584_v10 = vsub.f32 %v4250_v20, %v553_v51  ;;  %3514 = vpow2.f32 %v604_v43  ;;  %v360_v20 = vadd.f32 %v4170_v18, %v4386_v37  ;;  %v500_v51 = vsel %vm484_vm1, 16843009, %v5994_v12 }
 0x221   :  { %949 = vmax.xlane.f32.xlu0 %v4432_v17  ;;  %v471_v41 = vpack.c.b8 %v470_v29, %v470_v29  ;;  %v516_v63 = vunpack.c.0.s8 %v500_v51  ;;  %v870_v18 = vadd.f32 %v4086_v53, %v4197_v16  ;;  %v411_v16 = vsel %vm379_vm4, %v363_v38, %v395_v55 }
 0x222   :  { %v600_v61 = vmul.f32 1.442695, %v584_v10  ;;  %v392_v36 = vmul.f32 0.01, %v360_v20  ;;  %vm376_vm0 = vcmp.ge.f32.partialorder %v360_v20, 0.0  ;;  %v6046_v29 = vmov 0 }
 0x223   :  { %vm487_vm11 = vnez %v471_v41  ;;  %vm4451_vm1 = vcmp.ne.s32.totalorder %v516_v63, 0  ;;  %v565_v1 = vpop.xlane.xlu1 %564  ;;  %v902_v28 = vmul.f32 0.01, %v870_v18 }
 0x224   :  { %3516 = vpow2.f32 %v600_v61  ;;  %v6044_v45 = vsel %vm4451_vm1, 4294967295, %v6043_v45  ;;  %v503_v56 = vsel %vm487_vm11, 16843009, %v5994_v12  ;;  %v408_v39 = vsel %vm376_vm0, %v360_v20, %v392_v36 }
 0x225   :  { %3518 = vpow2.f32 %v606_v7  ;;  %6045 = vst [vmem:[#allocation48_spill] sm:$0xff] %v6044_v45  ;;  %v519_v49 = vunpack.c.0.s8 %v503_v56  ;;  %v4462_v7 = vsel %vm4451_vm1, %v408_v39, -1e+30  ;;  %v871_v12 = vadd.f32 %v4086_v53, %v4140_v62 }
 0x226   :  { %vm886_vm11 = vcmp.ge.f32.partialorder %v870_v18, 0.0  ;;  %v872_v62 = vadd.f32 %v4086_v53, %v4154_v11 }
 0x227   :  { %v561_v61 = vpop.xlane.xlu1 %560  ;;  %vm4467_vm5 = vcmp.ne.s32.totalorder %v519_v49, 0  ;;  %v918_v41 = vsel %vm886_vm11, %v870_v18, %v902_v28  ;;  %v903_v63 = vmul.f32 0.01, %v871_v12  ;;  %vm887_vm4 = vcmp.ge.f32.partialorder %v871_v12, 0.0 }
 0x228   :  { %v6047_v29 = vsel %vm4467_vm5, 4294967295, %v6046_v29  ;;  %v4475_v51 = vsel %vm4467_vm5, %v411_v16, -1e+30  ;;  %v588_v38 = vsub.f32 %v4275_v6, %v561_v61  ;;  %v904_v56 = vmul.f32 0.01, %v872_v62 }
 0x229   :  { %6048 = vst [vmem:[#allocation49_spill] sm:$0xff] %v6047_v29  ;;  %v919_v39 = vsel %vm887_vm4, %v871_v12, %v903_v63  ;;  %vm888_vm0 = vcmp.ge.f32.partialorder %v872_v62, 0.0 }
 0x22a   :  { %v4443_v10 = vpop.eup %3514  ;;  %v608_v11 = vmul.f32 1.442695, %v588_v38  ;;  %v4491_v6 = vsel %vm4223_vm15, %v919_v39, -1e+30  ;;  %v920_v16 = vsel %vm888_vm0, %v872_v62, %v904_v56 }
 0x22b   :  { %6040 = vst [vmem:[#allocation45_spill] sm:$0xff] %v4443_v10 }
 0x22c   :  { %3520 = vpow2.f32 %v608_v11 }
 0x22e   :  { %v4445_v43 = vpop.eup %3516 }
 0x22f   :  { %6041 = vst [vmem:[#allocation46_spill] sm:$0xff] %v4445_v43  ;;  %v4447_v9 = vpop.eup %3518  ;;  %v664_v37 = vpack.c.bf16 %v4439_v24, %v4445_v43  ;;  %v567_v20 = vpop.xlane.xlu0 %566 }
 0x230   :  { %6042 = vst [vmem:[#allocation47_spill] sm:$0xff] %v4447_v9  ;;  %v665_v46 = vpack.c.bf16 %v4447_v9, %v4443_v10  ;;  %v591_v36 = vsub.f32 %v4295_v57, %v567_v20 }
 0x231   :  { %3257 = vmatprep.mubr.bf16.mxu0 %v664_v37  ;;  %v4484_v37 = vsel %vm4192_vm9, %v918_v41, -1e+30 }
 0x232   :  { %3258 = vmatmul.mubr.bf16.vlgmr.msra.gmra.mrb[16].mxu0 %v665_v46  ;;  %v590_v46 = vsub.f32 %v4260_v47, %v565_v1  ;;  %v614_v55 = vmul.f32 1.442695, %v591_v36  ;;  %v4496_v47 = vsel %vm4180_vm8, %v920_v16, -1e+30 }
 0x234   :  { %576 = vmax.xlane.f32.xlu1 %v4462_v7  ;;  %v612_v57 = vmul.f32 1.442695, %v590_v46  ;;  %3522 = vpow2.f32 %v614_v55  ;;  %v573_v46 = vpop.xlane.xlu1 %572 }
 0x235   :  { %v594_v55 = vsub.f32 %v4283_v14, %v573_v46 }
 0x236   :  { %v4501_v1 = vpop.eup %3520 }
 0x237   :  { %1077 = vrot.lane.b32.xlu0 %v3977_v25, %s3871_s1  ;;  %6049 = vst [vmem:[#allocation50_spill] sm:$0xff] %v4501_v1 }
 0x238   :  { %582 = vmax.xlane.f32.xlu1 %v4475_v51 }
 0x23c   :  { %951 = vmax.xlane.f32.xlu1 %v4484_v37 }
 0x23e   :  { %v563_v18 = vpop.xlane.xlu0 %562  ;;  %v4503_v12 = vpop.eup %3522 }
 0x23f   :  { %v589_v49 = vsub.f32 %v4316_v26, %v563_v18  ;;  %v873_v26 = vadd.f32 %v4086_v53, %v4262_v27  ;;  %6050 = vst [vmem:[#allocation51_spill] sm:$0xff] %v4503_v12 }
 0x240   :  { %953 = vmax.xlane.f32.xlu1 %v4491_v6 }
 0x241   :  { %v610_v28 = vmul.f32 1.442695, %v589_v49  ;;  %v905_v41 = vmul.f32 0.01, %v873_v26  ;;  %vm889_vm11 = vcmp.ge.f32.partialorder %v873_v26, 0.0 }
 0x242   :  { %v569_v36 = vpop.xlane.xlu0 %568 }
 0x243   :  { %3524 = vpow2.f32 %v610_v28  ;;  %v921_v38 = vsel %vm889_vm11, %v873_v26, %v905_v41  ;;  %v592_v39 = vsub.f32 %v4321_v13, %v569_v36  ;;  %v874_v28 = vadd.f32 %v4086_v53, %v4230_v33 }
 0x244   :  { %3526 = vpow2.f32 %v612_v57  ;;  %955 = vmax.xlane.f32.xlu1 %v4496_v47  ;;  %v4517_v27 = vsel %vm4265_vm12, %v921_v38, -1e+30  ;;  %v620_v26 = vmul.f32 1.442695, %v594_v55  ;;  %v875_v13 = vadd.f32 %v4086_v53, %v4221_v59 }
 0x245   :  { %v616_v18 = vmul.f32 1.442695, %v592_v39  ;;  %v906_v14 = vmul.f32 0.01, %v874_v28  ;;  %vm890_vm4 = vcmp.ge.f32.partialorder %v874_v28, 0.0 }
 0x246   :  { %vm891_vm0 = vcmp.ge.f32.partialorder %v875_v13, 0.0 }
 0x247   :  { %3528 = vpow2.f32 %v616_v18  ;;  %v922_v41 = vsel %vm890_vm4, %v874_v28, %v906_v14  ;;  %v877_v18 = vadd.f32 %v4086_v53, %v4331_v30 }
 0x248   :  { %v4536_v33 = vsel %vm4306_vm13, %v922_v41, -1e+30 }
 0x249   :  { %vm893_vm4 = vcmp.ge.f32.partialorder %v877_v18, 0.0 }
 0x24d   :  { %v4505_v61 = vpop.eup %3524 }
 0x24e   :  { %6051 = vst [vmem:[#allocation52_spill] sm:$0xff] %v4505_v61  ;;  %v4507_v20 = vpop.eup %3526  ;;  %v666_v62 = vpack.c.bf16 %v4505_v61, %v4501_v1  ;;  %v882_v1 = vadd.f32 %v4086_v53, %v4398_v35 }
 0x24f   :  { %6052 = vst [vmem:[#allocation53_spill] sm:$0xff] %v4507_v20  ;;  %v667_v63 = vpack.c.bf16 %v4503_v12, %v4507_v20  ;;  %v880_v20 = vadd.f32 %v4086_v53, %v4360_v15 }
 0x250   :  { %3261 = vmatprep.mubr.bf16.mxu0 %v666_v62 }
 0x251   :  { %3262 = vmatmul.mubr.bf16.gmra.mrb[20].mxu0 %v667_v63  ;;  %v4532_v63 = vpop.eup %3528  ;;  %v912_v9 = vmul.f32 0.01, %v880_v20 }
 0x252   :  { %6053 = vst [vmem:[#allocation54_spill] sm:$0xff] %v4532_v63 }
 0x255   :  { %1079 = vrot.lane.b32.xlu1 %v3972_v23, %s3871_s1 }
 0x256   :  { %957 = vmax.xlane.f32.xlu0 %v4517_v27 }
 0x261   :  { %v575_v56 = vpop.xlane.xlu0 %574 }
 0x262   :  { %v595_v11 = vsub.f32 %v4346_v21, %v575_v56  ;;  %v876_v21 = vadd.f32 %v4086_v53, %v4219_v4 }
 0x264   :  { %v622_v49 = vmul.f32 1.442695, %v595_v11  ;;  %v908_v36 = vmul.f32 0.01, %v876_v21  ;;  %vm892_vm11 = vcmp.ge.f32.partialorder %v876_v21, 0.0 }
 0x266   :  { %3530 = vpow2.f32 %v622_v49  ;;  %v924_v55 = vsel %vm892_vm11, %v876_v21, %v908_v36 }
 0x267   :  { %v4558_v49 = vsel %vm4289_vm3, %v924_v55, -1e+30 }
 0x269   :  { %v4561_v28 = vpop.permute.xlu0 %1235 }
 0x26b   :  { %v571_v57 = vpop.xlane.xlu1 %570 }
 0x26c   :  { %v593_v16 = vsub.f32 %v4357_v44, %v571_v57  ;;  %1081 = vrot.lane.b32.xlu0 %v4001_v34, %s3871_s1  ;;  %v907_v44 = vmul.f32 0.01, %v875_v13  ;;  %v909_v57 = vmul.f32 0.01, %v877_v18 }
 0x26d   :  { %v4570_v30 = vpop.permute.xlu0 %1247 }
 0x26e   :  { %v618_v62 = vmul.f32 1.442695, %v593_v16  ;;  %v923_v59 = vsel %vm891_vm0, %v875_v13, %v907_v44  ;;  %v925_v16 = vsel %vm893_vm4, %v877_v18, %v909_v57  ;;  %vm896_vm4 = vcmp.ge.f32.partialorder %v880_v20, 0.0 }
 0x26f   :  { %v4549_v39 = vsel %vm4254_vm7, %v923_v59, -1e+30  ;;  %v928_v15 = vsel %vm896_vm4, %v880_v20, %v912_v9  ;;  %v6092_v9 = vld [vmem:[#allocation13_spill] sm:$0xff] }
 0x270   :  { %3532 = vpow2.f32 %v618_v62  ;;  %v4538_v38 = vpop.eup %3530  ;;  %v4568_v62 = vpop.permute.xlu1 %1263 }
 0x271   :  { %3534 = vpow2.f32 %v620_v26  ;;  %6054 = vst [vmem:[#allocation55_spill] sm:$0xff] %v4538_v38  ;;  %v4565_v26 = vsel %vm4310_vm2, %v925_v16, -1e+30  ;;  %v4576_v14 = vpop.permute.xlu0 %1271  ;;  %v879_v16 = vadd.f32 %v4086_v53, %v4326_v0 }
 0x273   :  { %vm895_vm11 = vcmp.ge.f32.partialorder %v879_v16, 0.0 }
 0x274   :  { %v4574_v13 = vpop.permute.xlu1 %1267 }
 0x275   :  { %v4580_v44 = vpop.permute.xlu0 %1279 }
 0x276   :  { %6057 = vst [vmem:[#allocation58_spill] sm:$0xff] %v4580_v44  ;;  %v6096_v44 = vld [vmem:[#allocation17_spill] sm:$0xff] }
 0x278   :  { %v4578_v21 = vpop.permute.xlu1 %1275 }
 0x279   :  { %959 = vmax.xlane.f32.xlu1 %v4536_v33  ;;  %v4586_v36 = vpop.permute.xlu0 %1291 }
 0x27a   :  { %v4541_v56 = vpop.eup %3532  ;;  %6058 = vst [vmem:[#allocation59_spill] sm:$0xff] %v4586_v36 }
 0x27b   :  { %6055 = vst [vmem:[#allocation56_spill] sm:$0xff] %v4541_v56  ;;  %v4543_v46 = vpop.eup %3534  ;;  %v668_v4 = vpack.c.bf16 %v4541_v56, %v4532_v63  ;;  %v911_v56 = vmul.f32 0.01, %v879_v16 }
 0x27c   :  { %6056 = vst [vmem:[#allocation57_spill] sm:$0xff] %v4543_v46  ;;  %v669_v11 = vpack.c.bf16 %v4538_v38, %v4543_v46  ;;  %v4582_v41 = vpop.permute.xlu1 %1283 }
 0x27d   :  { %961 = vmax.xlane.f32.xlu1 %v4549_v39  ;;  %3265 = vmatprep.mubr.bf16.mxu0 %v668_v4  ;;  %v927_v0 = vsel %vm895_vm11, %v879_v16, %v911_v56  ;;  %v6065_v56 = vld [vmem:[#allocation35_spill] sm:$0xff]  ;;  %v6124_v5 = vld [vmem:[#allocation58_spill] sm:$0xff] }
 0x27e   :  { %3266 = vmatmul.mubr.bf16.gmra.mrb[24].mxu0 %v669_v11  ;;  %v878_v11 = vadd.f32 %v4086_v53, %v4364_v52  ;;  %vm6066_vm11 = vnez %v6065_v56 }
 0x27f   :  { %v4619_v16 = vsel %vm6066_vm11, %v928_v15, -1e+30 }
 0x280   :  { %v4588_v59 = vpop.permute.xlu1 %1287  ;;  %v910_v57 = vmul.f32 0.01, %v878_v11  ;;  %vm894_vm0 = vcmp.ge.f32.partialorder %v878_v11, 0.0 }
 0x281   :  { %963 = vmax.xlane.f32.xlu1 %v4558_v49  ;;  %6059 = vst [vmem:[#allocation60_spill] sm:$0xff] %v4588_v59  ;;  %v6125_v60 = vld [vmem:[#allocation59_spill] sm:$0xff] }
 0x282   :  { %v926_v12 = vsel %vm894_vm0, %v878_v11, %v910_v57  ;;  %v4611_v11 = vsel %vm4269_vm14, %v927_v0, -1e+30  ;;  %v6064_v57 = vld [vmem:[#allocation42_spill] sm:$0xff]  ;;  %vm898_vm0 = vcmp.ge.f32.partialorder %v882_v1, 0.0 }
 0x283   :  { %v4602_v52 = vsel %vm4351_vm6, %v926_v12, -1e+30 }
 0x284   :  { %v4592_v18 = vpop.permute.xlu1 %1700 }
 0x285   :  { %6060 = vst [vmem:[#allocation61_spill] sm:$0xff] %v4592_v18 }
 0x288   :  { %v4596_v46 = vpop.permute.xlu1 %1704 }
 0x289   :  { %6061 = vst [vmem:[#allocation62_spill] sm:$0xff] %v4596_v46 }
 0x28b   :  { %965 = vmax.xlane.f32.xlu0 %v4565_v26 }
 0x28c   :  { %v4605_v61 = vpop.permute.xlu1 %1708  ;;  %v6126_v19 = vld [vmem:[#allocation61_spill] sm:$0xff] }
 0x28d   :  { %6062 = vst [vmem:[#allocation63_spill] sm:$0xff] %v4605_v61 }
 0x290   :  { %v4614_v12 = vpop.permute.xlu1 %1712  ;;  %v6131_v48 = vld [vmem:[#allocation62_spill] sm:$0xff] }
 0x291   :  { %6063 = vst [vmem:[#allocation64_spill] sm:$0xff] %v4614_v12 }
 0x292   :  { %1083 = vrot.lane.b32.xlu1 %v3994_v32, %s3871_s1 }
 0x2a1   :  { %1085 = vrot.lane.b32.xlu0 %v4023_v40, %s3871_s1 }
 0x2a6   :  { %v579_v4 = vpop.xlane.xlu0 %578 }
 0x2a7   :  { %v597_v10 = vsub.f32 %v6064_v57, %v579_v4 }
 0x2a9   :  { %v626_v24 = vmul.f32 1.442695, %v597_v10 }
 0x2aa   :  { %v581_v55 = vpop.xlane.xlu0 %580 }
 0x2ab   :  { %v598_v0 = vsub.f32 %v4425_v54, %v581_v55  ;;  %3536 = vpow2.f32 %v626_v24 }
 0x2ad   :  { %v628_v4 = vmul.f32 1.442695, %v598_v0 }
 0x2ae   :  { %v950_v38 = vpop.xlane.xlu0 %949 }
 0x2af   :  { %v981_v15 = vsub.f32 %v4432_v17, %v950_v38 }
 0x2b1   :  { %v997_v54 = vmul.f32 1.442695, %v981_v15 }
 0x2b2   :  { %v1078_v63 = vpop.permute.xlu0 %1077 }
 0x2b3   :  { %3273 = vmatprep.subr.bf16.mxu0 %v1078_v63 }
 0x2b4   :  { %3274 = vmatpush3.bf16.msra.mxu0 %v1078_v63  ;;  %v914_v63 = vmul.f32 0.01, %v882_v1 }
 0x2b5   :  { %v4636_v17 = vpop.eup %3536 }
 0x2b6   :  { %967 = vmax.xlane.f32.xlu1 %v4602_v52  ;;  %v930_v35 = vsel %vm898_vm0, %v882_v1, %v914_v63  ;;  %6069 = vst [vmem:[#allocation42_spill] sm:$0xff] %v4636_v17 }
 0x2b7   :  { %v4626_v20 = vsel %vm4407_vm10, %v930_v35, -1e+30  ;;  %vm6080_vm10 = vnez %v6037_v42 }
 0x2ba   :  { %969 = vmax.xlane.f32.xlu1 %v4611_v11 }
 0x2c0   :  { %971 = vmax.xlane.f32.xlu0 %v4619_v16 }
 0x2c1   :  { %v577_v43 = vpop.xlane.xlu1 %576 }
 0x2c2   :  { %v596_v61 = vsub.f32 %v4462_v7, %v577_v43  ;;  %v6068_v7 = vld [vmem:[#allocation2_spill] sm:$0xff] }
 0x2c4   :  { %v624_v12 = vmul.f32 1.442695, %v596_v61  ;;  %975 = vmax.xlane.f32.xlu0 %v4626_v20 }
 0x2c5   :  { %v583_v57 = vpop.xlane.xlu1 %582 }
 0x2c6   :  { %3538 = vpow2.f32 %v624_v12  ;;  %v599_v10 = vsub.f32 %v4475_v51, %v583_v57 }
 0x2c7   :  { %3540 = vpow2.f32 %v628_v4 }
 0x2c8   :  { %v630_v1 = vmul.f32 1.442695, %v599_v10  ;;  %v6075_v10 = vld [vmem:[#allocation4_spill] sm:$0xff] }
 0x2c9   :  { %v952_v55 = vpop.xlane.xlu1 %951 }
 0x2ca   :  { %3542 = vpow2.f32 %v630_v1  ;;  %v982_v43 = vsub.f32 %v4484_v37, %v952_v55  ;;  %v6076_v1 = vld [vmem:[#allocation39_spill] sm:$0xff] }
 0x2cb   :  { %1087 = vrot.lane.b32.xlu1 %v6068_v7, %s3871_s1  ;;  %3544 = vpow2.f32 %v997_v54  ;;  %v881_v54 = vadd.f32 %v4086_v53, %v6076_v1 }
 0x2cc   :  { %v999_v61 = vmul.f32 1.442695, %v982_v43  ;;  %v6077_v43 = vld [vmem:[#allocation38_spill] sm:$0xff] }
 0x2cd   :  { %v4634_v24 = vpop.xlane.xlu1 %953  ;;  %vm897_vm4 = vcmp.ge.f32.partialorder %v881_v54, 0.0 }
 0x2ce   :  { %3546 = vpow2.f32 %v999_v61  ;;  %v883_v61 = vadd.f32 %v4086_v53, %v6077_v43  ;;  %v6079_v43 = vld [vmem:[#allocation6_spill] sm:$0xff] }
 0x2cf   :  { %v1310_v22 = vadd.f32 %v6079_v43, %v6124_v5 }
 0x2d0   :  { %v4638_v38 = vpop.eup %3538  ;;  %vm899_vm0 = vcmp.ge.f32.partialorder %v883_v61, 0.0 }
 0x2d1   :  { %6070 = vst [vmem:[#allocation2_spill] sm:$0xff] %v4638_v38  ;;  %v4640_v51 = vpop.xlane.xlu1 %955  ;;  %v670_v63 = vpack.c.bf16 %v4636_v17, %v4638_v38  ;;  %v4644_v12 = vpop.eup %3540  ;;  %v1299_v38 = vadd.f32 %v6079_v43, %v4561_v28  ;;  %v1342_v2 = vmul.f32 0.01, %v1310_v22 }
 0x2d2   :  { %6071 = vst [vmem:[#allocation65_spill] sm:$0xff] %v4644_v12 }
 0x2d3   :  { %3269 = vmatprep.mubr.bf16.mxu0 %v670_v63  ;;  %v913_v63 = vmul.f32 0.01, %v881_v54  ;;  %vm1315_vm11 = vcmp.ge.f32.partialorder %v1299_v38, 0.0 }
 0x2d4   :  { %v4646_v37 = vpop.eup %3542 }
 0x2d5   :  { %6072 = vst [vmem:[#allocation66_spill] sm:$0xff] %v4646_v37  ;;  %v1080_v35 = vpop.permute.xlu1 %1079  ;;  %v671_v0 = vpack.c.bf16 %v4646_v37, %v4644_v12  ;;  %v4650_v4 = vpop.eup %3544  ;;  %v929_v37 = vsel %vm897_vm4, %v881_v54, %v913_v63  ;;  %v6078_v12 = vld [vmem:[#allocation40_spill] sm:$0xff] }
 0x2d6   :  { %3275 = vmatprep.subr.bf16.mxu0 %v1080_v35  ;;  %6073 = vst [vmem:[#allocation67_spill] sm:$0xff] %v4650_v4  ;;  %v884_v17 = vadd.f32 %v4086_v53, %v6078_v12  ;;  %v1331_v53 = vmul.f32 0.01, %v1299_v38 }
 0x2d7   :  { %3270 = vmatmul.mubr.bf16.gmra.mrb[28].mxu0 %v671_v0 }
 0x2d8   :  { %v4652_v15 = vpop.eup %3546  ;;  %3276 = vmatpush3.bf16.msra.mxu0 %v1080_v35  ;;  %v915_v35 = vmul.f32 0.01, %v883_v61  ;;  %vm900_vm4 = vcmp.ge.f32.partialorder %v884_v17, 0.0 }
 0x2d9   :  { %6074 = vst [vmem:[#allocation68_spill] sm:$0xff] %v4652_v15  ;;  %v1061_v57 = vpack.c.bf16 %v4652_v15, %v4650_v4  ;;  %v916_v15 = vmul.f32 0.01, %v884_v17 }
 0x2da   :  { %1089 = vrot.lane.b32.xlu0 %v6075_v10, %s3871_s1  ;;  %v931_v1 = vsel %vm899_vm0, %v883_v61, %v915_v35  ;;  %v6081_v61 = vld [vmem:[#allocation3_spill] sm:$0xff] }
 0x2db   :  { %3289 = vmatprep.mubr.bf16.mxu0 %v1061_v57  ;;  %v4668_v57 = vsel %vm4451_vm1, %v929_v37, -1e+30  ;;  %v932_v54 = vsel %vm900_vm4, %v884_v17, %v916_v15  ;;  %v1347_v37 = vsel %vm1315_vm11, %v1299_v38, %v1331_v53  ;;  %v6089_v10 = vld [vmem:[#allocation7_spill] sm:$0xff]  ;;  %vm6095_vm4 = vnez %v5992_v50 }
 0x2dc   :  { %v4680_v12 = vsel %vm4467_vm5, %v932_v54, -1e+30  ;;  %v4685_v28 = vsel %vm4192_vm9, %v1347_v37, -1e+30  ;;  %v1302_v50 = vadd.f32 %v6079_v43, %v4570_v30 }
 0x2e3   :  { %v4660_v55 = vpop.xlane.xlu0 %957 }
 0x2e7   :  { %v1082_v0 = vpop.permute.xlu0 %1081 }
 0x2e8   :  { %3277 = vmatprep.subr.bf16.mxu0 %v1082_v0 }
 0x2e9   :  { %3278 = vmatpush3.bf16.msra.mxu0 %v1082_v0  ;;  %v4675_v0 = vsel %vm6080_vm10, %v931_v1, -1e+30 }
 0x2ef   :  { %973 = vmax.xlane.f32.xlu1 %v4668_v57 }
 0x2f3   :  { %977 = vmax.xlane.f32.xlu1 %v4675_v0 }
 0x2f9   :  { %979 = vmax.xlane.f32.xlu0 %v4680_v12 }
 0x2fd   :  { %1380 = vmax.xlane.f32.xlu0 %v4685_v28 }
 0x304   :  { %1091 = vrot.lane.b32.xlu1 %v6081_v61, %s3871_s1  ;;  %v6088_v61 = vld [vmem:[#allocation9_spill] sm:$0xff] }
 0x305   :  { %v4690_v63 = vpop.f32.mrb[16].mxu0  ;;  %v1719_v29 = vadd.f32 %v6089_v10, %v6088_v61  ;;  %v1720_v61 = vadd.f32 %v6089_v10, %v6096_v44 }
 0x306   :  { %6082 = vst [vmem:[#allocation39_spill] sm:$0xff] %v4690_v63  ;;  %v4692_v17 = vpop.f32.mrb[17].mxu0  ;;  %v4694_v15 = vpop.xlane.xlu1 %959  ;;  %v6086_v63 = vld [vmem:[#allocation11_spill] sm:$0xff] }
 0x307   :  { %6083 = vst [vmem:[#allocation38_spill] sm:$0xff] %v4692_v17  ;;  %v4696_v35 = vpop.f32.mrb[18].mxu0  ;;  %v1298_v17 = vadd.f32 %v6079_v43, %v6086_v63  ;;  %v1301_v63 = vadd.f32 %v6079_v43, %v6092_v9  ;;  %v1751_v36 = vmul.f32 0.01, %v1719_v29  ;;  %vm1736_vm5 = vcmp.ge.f32.partialorder %v1720_v61, 0.0 }
 0x308   :  { %6084 = vst [vmem:[#allocation40_spill] sm:$0xff] %v4696_v35  ;;  %v4698_v1 = vpop.f32.mrb[19].mxu0  ;;  %v6087_v35 = vld [vmem:[#allocation8_spill] sm:$0xff] }
 0x309   :  { %6085 = vst [vmem:[#allocation6_spill] sm:$0xff] %v4698_v1  ;;  %v1300_v1 = vadd.f32 %v6079_v43, %v6087_v35  ;;  %v1330_v42 = vmul.f32 0.01, %v1298_v17  ;;  %vm1314_vm11 = vcmp.ge.f32.partialorder %v1298_v17, 0.0  ;;  %v1333_v9 = vmul.f32 0.01, %v1301_v63 }
 0x30a   :  { %v4700_v38 = vpop.xlane.xlu1 %961  ;;  %vm1317_vm10 = vcmp.ge.f32.partialorder %v1301_v63, 0.0 }
 0x30b   :  { %v1332_v59 = vmul.f32 0.01, %v1300_v1  ;;  %vm1316_vm0 = vcmp.ge.f32.partialorder %v1300_v1, 0.0 }
 0x30e   :  { %v4702_v54 = vpop.xlane.xlu1 %963 }
 0x312   :  { %v1084_v53 = vpop.permute.xlu1 %1083 }
 0x313   :  { %1498 = vrot.lane.b32.xlu0 %v3977_v25, %s3872_s22  ;;  %3279 = vmatprep.subr.bf16.mxu0 %v1084_v53 }
 0x314   :  { %3280 = vmatpush3.bf16.msra.mxu0 %v1084_v53  ;;  %v1346_v53 = vsel %vm1314_vm11, %v1298_v17, %v1330_v42  ;;  %v1348_v42 = vsel %vm1316_vm0, %v1300_v1, %v1332_v59  ;;  %vm1735_vm11 = vcmp.ge.f32.partialorder %v1719_v29, 0.0  ;;  %v6097_v17 = vld [vmem:[#allocation12_spill] sm:$0xff] }
 0x315   :  { %v4726_v35 = vsel %vm6095_vm4, %v1346_v53, -1e+30  ;;  %v1767_v53 = vsel %vm1735_vm11, %v1719_v29, %v1751_v36  ;;  %vm1318_vm11 = vcmp.ge.f32.partialorder %v1302_v50, 0.0 }
 0x316   :  { %v4740_v59 = vsel %vm6095_vm4, %v1767_v53, -1e+30 }
 0x318   :  { %v4706_v37 = vpop.xlane.xlu0 %965 }
 0x31c   :  { %v1086_v4 = vpop.permute.xlu0 %1085 }
 0x31d   :  { %3281 = vmatprep.subr.bf16.mxu0 %v1086_v4 }
 0x31e   :  { %3282 = vmatpush3.bf16.msra.mxu0 %v1086_v4 }
 0x324   :  { %v4714_v46 = vpop.f32.mrb[20].mxu0 }
 0x325   :  { %6090 = vst [vmem:[#allocation11_spill] sm:$0xff] %v4714_v46  ;;  %v4716_v45 = vpop.f32.mrb[21].mxu0  ;;  %v1722_v46 = vadd.f32 %v6089_v10, %v6097_v17 }
 0x326   :  { %6091 = vst [vmem:[#allocation8_spill] sm:$0xff] %v4716_v45  ;;  %v4720_v18 = vpop.f32.mrb[22].mxu0  ;;  %v1349_v45 = vsel %vm1317_vm10, %v1301_v63, %v1333_v9 }
 0x327   :  { %6093 = vst [vmem:[#allocation9_spill] sm:$0xff] %v4720_v18  ;;  %v4722_v4 = vpop.f32.mrb[23].mxu0  ;;  %v4735_v18 = vsel %vm4223_vm15, %v1348_v42, -1e+30  ;;  %v1754_v44 = vmul.f32 0.01, %v1722_v46 }
 0x328   :  { %6094 = vst [vmem:[#allocation7_spill] sm:$0xff] %v4722_v4  ;;  %1378 = vmax.xlane.f32.xlu1 %v4726_v35  ;;  %6098 = vst [vmem:[#allocation13_spill] sm:$0xff] %v4735_v18  ;;  %v1752_v4 = vmul.f32 0.01, %v1720_v61  ;;  %vm1738_vm0 = vcmp.ge.f32.partialorder %v1722_v46, 0.0 }
 0x329   :  { %v4745_v42 = vsel %vm4180_vm8, %v1349_v45, -1e+30  ;;  %v1770_v17 = vsel %vm1738_vm0, %v1722_v46, %v1754_v44 }
 0x32a   :  { %v1768_v1 = vsel %vm1736_vm5, %v1720_v61, %v1752_v4  ;;  %6099 = vst [vmem:[#allocation17_spill] sm:$0xff] %v4745_v42  ;;  %v4755_v36 = vsel %vm4180_vm8, %v1770_v17, -1e+30  ;;  %v6105_v17 = vld [vmem:[#allocation10_spill] sm:$0xff] }
 0x32b   :  { %v4750_v29 = vsel %vm4192_vm9, %v1768_v1, -1e+30  ;;  %6100 = vst [vmem:[#allocation12_spill] sm:$0xff] %v4755_v36  ;;  %v1721_v58 = vadd.f32 %v6089_v10, %v6105_v17 }
 0x32c   :  { %1382 = vmax.xlane.f32.xlu1 %v4735_v18 }
 0x32d   :  { %vm1737_vm10 = vcmp.ge.f32.partialorder %v1721_v58, 0.0 }
 0x330   :  { %1799 = vmax.xlane.f32.xlu1 %v4740_v59 }
 0x332   :  { %1384 = vmax.xlane.f32.xlu0 %v4745_v42 }
 0x334   :  { %1801 = vmax.xlane.f32.xlu1 %v4750_v29 }
 0x336   :  { %1805 = vmax.xlane.f32.xlu0 %v4755_v36  ;;  %v1334_v36 = vmul.f32 0.01, %v1302_v50 }
 0x338   :  { %v1350_v30 = vsel %vm1318_vm11, %v1302_v50, %v1334_v36  ;;  %v984_v50 = vsub.f32 %v4496_v47, %v4640_v51 }
 0x343   :  { %v4758_v63 = vpop.xlane.xlu1 %967 }
 0x345   :  { %1919 = vrot.lane.b32.xlu1 %v3977_v25, %s3873_s23 }
 0x347   :  { %v4762_v45 = vpop.xlane.xlu1 %969 }
 0x34b   :  { %v1088_v46 = vpop.permute.xlu1 %1087 }
 0x34c   :  { %1500 = vrot.lane.b32.xlu0 %v3972_v23, %s3872_s22  ;;  %3283 = vmatprep.subr.bf16.mxu0 %v1088_v46 }
 0x34d   :  { %v4766_v4 = vpop.xlane.xlu0 %971  ;;  %3284 = vmatpush3.bf16.msra.mxu0 %v1088_v46  ;;  %v1753_v46 = vmul.f32 0.01, %v1721_v58 }
 0x350   :  { %1921 = vrot.lane.b32.xlu0 %v3972_v23, %s3873_s23  ;;  %v1303_v23 = vadd.f32 %v6079_v43, %v6106_v8  ;;  %v6108_v8 = vld [vmem:[#allocation16_spill] sm:$0xff] }
 0x351   :  { %v4770_v61 = vpop.xlane.xlu0 %975  ;;  %v4772_v9 = vpop.f32.mrb[24].mxu0  ;;  %v1723_v42 = vadd.f32 %v6089_v10, %v6108_v8  ;;  %v986_v8 = vsub.f32 %v4536_v33, %v4694_v15 }
 0x352   :  { %6101 = vst [vmem:[#allocation69_spill] sm:$0xff] %v4772_v9  ;;  %v4774_v53 = vpop.f32.mrb[25].mxu0  ;;  %v1335_v9 = vmul.f32 0.01, %v1303_v23  ;;  %vm1319_vm5 = vcmp.ge.f32.partialorder %v1303_v23, 0.0 }
 0x353   :  { %6102 = vst [vmem:[#allocation70_spill] sm:$0xff] %v4774_v53  ;;  %v4776_v25 = vpop.f32.mrb[26].mxu0  ;;  %v1769_v53 = vsel %vm1737_vm10, %v1721_v58, %v1753_v46  ;;  %v6109_v46 = vld [vmem:[#allocation31_spill] sm:$0xff]  ;;  %vm1739_vm10 = vcmp.ge.f32.partialorder %v1723_v42, 0.0  ;;  %v1007_v51 = vmul.f32 1.442695, %v986_v8  ;;  %v994_v8 = vsub.f32 %v4626_v20, %v4770_v61 }
 0x354   :  { %6103 = vst [vmem:[#allocation71_spill] sm:$0xff] %v4776_v25  ;;  %v4778_v44 = vpop.f32.mrb[27].mxu0  ;;  %v6107_v25 = vld [vmem:[#allocation25_spill] sm:$0xff]  ;;  %v1351_v17 = vsel %vm1319_vm5, %v1303_v23, %v1335_v9  ;;  %v1724_v9 = vadd.f32 %v6089_v10, %v6109_v46  ;;  %v983_v46 = vsub.f32 %v4491_v6, %v4634_v24  ;;  %v987_v24 = vsub.f32 %v4549_v39, %v4700_v38 }
 0x355   :  { %6104 = vst [vmem:[#allocation72_spill] sm:$0xff] %v4778_v44  ;;  %v1090_v1 = vpop.permute.xlu0 %1089  ;;  %v1305_v44 = vadd.f32 %v6079_v43, %v6107_v25  ;;  %v4797_v58 = vsel %vm4306_vm13, %v1351_v17, -1e+30  ;;  %v1755_v25 = vmul.f32 0.01, %v1723_v42 }
 0x356   :  { %3285 = vmatprep.subr.bf16.mxu0 %v1090_v1  ;;  %v1756_v17 = vmul.f32 0.01, %v1724_v9  ;;  %vm1740_vm5 = vcmp.ge.f32.partialorder %v1724_v9, 0.0  ;;  %v1001_v33 = vmul.f32 1.442695, %v983_v46 }
 0x357   :  { %3286 = vmatpush3.bf16.msra.mxu0 %v1090_v1  ;;  %v4790_v1 = vsel %vm4223_vm15, %v1769_v53, -1e+30  ;;  %v1337_v18 = vmul.f32 0.01, %v1305_v44  ;;  %vm1321_vm0 = vcmp.ge.f32.partialorder %v1305_v44, 0.0 }
 0x358   :  { %v4802_v53 = vsel %vm4265_vm12, %v1350_v30, -1e+30  ;;  %v1771_v30 = vsel %vm1739_vm10, %v1723_v42, %v1755_v25  ;;  %v988_v42 = vsub.f32 %v4558_v49, %v4702_v54  ;;  %v989_v25 = vsub.f32 %v4565_v26, %v4706_v37 }
 0x359   :  { %v1353_v23 = vsel %vm1321_vm0, %v1305_v44, %v1337_v18  ;;  %v985_v18 = vsub.f32 %v4517_v27, %v4660_v55  ;;  %v1003_v44 = vmul.f32 1.442695, %v984_v50  ;;  %v4822_v47 = vsel %vm4265_vm12, %v1771_v30, -1e+30 }
 0x35a   :  { %v4811_v36 = vsel %vm4289_vm3, %v1353_v23, -1e+30  ;;  %v1772_v23 = vsel %vm1740_vm5, %v1724_v9, %v1756_v17  ;;  %v990_v27 = vsub.f32 %v4602_v52, %v4758_v63  ;;  %v1011_v49 = vmul.f32 1.442695, %v988_v42 }
 0x35b   :  { %v1005_v15 = vmul.f32 1.442695, %v985_v18  ;;  %3548 = vpow2.f32 %v1003_v44  ;;  %v4829_v6 = vsel %vm4306_vm13, %v1772_v23, -1e+30  ;;  %v1009_v9 = vmul.f32 1.442695, %v987_v24 }
 0x35c   :  { %3550 = vpow2.f32 %v1007_v51  ;;  %v1015_v54 = vmul.f32 1.442695, %v990_v27  ;;  %v1013_v17 = vmul.f32 1.442695, %v989_v25  ;;  %v992_v52 = vsub.f32 %v4619_v16, %v4766_v4 }
 0x35d   :  { %3552 = vpow2.f32 %v1001_v33  ;;  %v991_v26 = vsub.f32 %v4611_v11, %v4762_v45  ;;  %v1023_v44 = vmul.f32 1.442695, %v994_v8 }
 0x35e   :  { %3554 = vpow2.f32 %v1005_v15  ;;  %v1019_v16 = vmul.f32 1.442695, %v992_v52 }
 0x35f   :  { %3556 = vpow2.f32 %v1011_v49  ;;  %v1017_v11 = vmul.f32 1.442695, %v991_v26  ;;  %v6112_v26 = vld [vmem:[#allocation21_spill] sm:$0xff] }
 0x360   :  { %3558 = vpow2.f32 %v1015_v54 }
 0x361   :  { %3560 = vpow2.f32 %v1009_v9  ;;  %v6110_v9 = vld [vmem:[#allocation19_spill] sm:$0xff] }
 0x362   :  { %3562 = vpow2.f32 %v1013_v17 }
 0x363   :  { %3564 = vpow2.f32 %v1019_v16 }
 0x365   :  { %v4843_v38 = vpop.eup %3548 }
 0x366   :  { %v4847_v63 = vpop.eup %3550 }
 0x367   :  { %v4851_v30 = vpop.eup %3552 }
 0x368   :  { %v1062_v18 = vpack.c.bf16 %v4843_v38, %v4851_v30 }
 0x369   :  { %1803 = vmax.xlane.f32.xlu1 %v4790_v1 }
 0x36d   :  { %1388 = vmax.xlane.f32.xlu1 %v4797_v58 }
 0x36f   :  { %1386 = vmax.xlane.f32.xlu0 %v4802_v53 }
 0x373   :  { %1392 = vmax.xlane.f32.xlu0 %v4811_v36 }
 0x377   :  { %1807 = vmax.xlane.f32.xlu0 %v4822_v47 }
 0x37b   :  { %1809 = vmax.xlane.f32.xlu0 %v4829_v6 }
 0x37c   :  { %v974_v55 = vpop.xlane.xlu1 %973 }
 0x37d   :  { %v993_v39 = vsub.f32 %v4668_v57, %v974_v55  ;;  %v4853_v57 = vpop.eup %3554 }
 0x37e   :  { %1502 = vrot.lane.b32.xlu1 %v4001_v34, %s3872_s22  ;;  %v1063_v45 = vpack.c.bf16 %v4847_v63, %v4853_v57  ;;  %v4862_v51 = vpop.eup %3556 }
 0x37f   :  { %v1021_v46 = vmul.f32 1.442695, %v993_v39  ;;  %v4865_v33 = vpop.eup %3558 }
 0x380   :  { %v978_v50 = vpop.xlane.xlu1 %977  ;;  %v4867_v15 = vpop.eup %3560 }
 0x381   :  { %3566 = vpow2.f32 %v1021_v46  ;;  %v995_v23 = vsub.f32 %v4675_v0, %v978_v50  ;;  %v4869_v24 = vpop.eup %3562  ;;  %v1304_v50 = vadd.f32 %v6079_v43, %v6110_v9  ;;  %v6114_v46 = vld [vmem:[#allocation27_spill] sm:$0xff] }
 0x382   :  { %3568 = vpow2.f32 %v1017_v11  ;;  %v1065_v25 = vpack.c.bf16 %v4865_v33, %v4869_v24  ;;  %v4877_v0 = vpop.eup %3564 }
 0x383   :  { %3570 = vpow2.f32 %v1023_v44  ;;  %v1025_v55 = vmul.f32 1.442695, %v995_v23  ;;  %v1336_v39 = vmul.f32 0.01, %v1304_v50  ;;  %vm1320_vm11 = vcmp.ge.f32.partialorder %v1304_v50, 0.0 }
 0x384   :  { %v1092_v37 = vpop.permute.xlu1 %1091 }
 0x385   :  { %3287 = vmatprep.subr.bf16.mxu0 %v1092_v37  ;;  %v1352_v11 = vsel %vm1320_vm11, %v1304_v50, %v1336_v39 }
 0x386   :  { %v980_v4 = vpop.xlane.xlu0 %979  ;;  %3288 = vmatpush3.bf16.msra.mxu0 %v1092_v37  ;;  %v1725_v37 = vadd.f32 %v6089_v10, %v6112_v26  ;;  %v4905_v44 = vsel %vm4254_vm7, %v1352_v11, -1e+30 }
 0x387   :  { %v996_v20 = vsub.f32 %v4680_v12, %v980_v4  ;;  %v1064_v12 = vpack.c.bf16 %v4862_v51, %v4867_v15 }
 0x388   :  { %v1757_v4 = vmul.f32 0.01, %v1725_v37  ;;  %vm1741_vm0 = vcmp.ge.f32.partialorder %v1725_v37, 0.0 }
 0x389   :  { %3290 = vmatmul.mubr.bf16.vlgmr.msra.gmra.mrb[32].mxu0 %v1062_v18  ;;  %v1027_v42 = vmul.f32 1.442695, %v996_v20  ;;  %v1726_v18 = vadd.f32 %v6089_v10, %v6114_v46 }
 0x38a   :  { %v4860_v61 = vpop.xlane.xlu0 %1380  ;;  %3293 = vmatprep.mubr.bf16.mxu0 %v1063_v45  ;;  %v1773_v23 = vsel %vm1741_vm0, %v1725_v37, %v1757_v4 }
 0x38b   :  { %3572 = vpow2.f32 %v1027_v42  ;;  %v4879_v49 = vpop.eup %3566  ;;  %v1758_v20 = vmul.f32 0.01, %v1726_v18  ;;  %vm1742_vm10 = vcmp.ge.f32.partialorder %v1726_v18, 0.0  ;;  %v4910_v42 = vsel %vm4254_vm7, %v1773_v23, -1e+30 }
 0x38c   :  { %3574 = vpow2.f32 %v1025_v55  ;;  %v4883_v54 = vpop.eup %3568 }
 0x38d   :  { %v4887_v17 = vpop.eup %3570 }
 0x38e   :  { %v1499_v27 = vpop.permute.xlu0 %1498  ;;  %6111 = vst [vmem:[#allocation10_spill] sm:$0xff] %v4887_v17  ;;  %v1067_v52 = vpack.c.bf16 %v4887_v17, %v4879_v49 }
 0x38f   :  { %3305 = vmatprep.subr.bf16.mxu1 %v1499_v27 }
 0x390   :  { %3306 = vmatpush3.bf16.msra.mxu1 %v1499_v27  ;;  %v1774_v27 = vsel %vm1742_vm10, %v1726_v18, %v1758_v20 }
 0x391   :  { %1923 = vrot.lane.b32.xlu0 %v4001_v34, %s3873_s23  ;;  %3294 = vmatmul.mubr.bf16.gmra.mrb[36].mxu0 %v1064_v12  ;;  %v1066_v34 = vpack.c.bf16 %v4877_v0, %v4883_v54  ;;  %v1306_v12 = vadd.f32 %v6079_v43, %v4568_v62  ;;  %v4917_v55 = vsel %vm4289_vm3, %v1774_v27, -1e+30  ;;  %v1411_v62 = vsub.f32 %v4685_v28, %v4860_v61 }
 0x392   :  { %3297 = vmatprep.mubr.bf16.mxu0 %v1065_v25  ;;  %vm6122_vm3 = vnez %v6065_v56  ;;  %v1311_v56 = vadd.f32 %v6079_v43, %v4582_v41 }
 0x393   :  { %v1338_v50 = vmul.f32 0.01, %v1306_v12  ;;  %vm1322_vm5 = vcmp.ge.f32.partialorder %v1306_v12, 0.0  ;;  %v1428_v37 = vmul.f32 1.442695, %v1411_v62 }
 0x395   :  { %1504 = vrot.lane.b32.xlu0 %v3994_v32, %s3872_s22  ;;  %v4895_v8 = vpop.eup %3572  ;;  %v1354_v39 = vsel %vm1322_vm5, %v1306_v12, %v1338_v50  ;;  %3576 = vpow2.f32 %v1428_v37 }
 0x396   :  { %6113 = vst [vmem:[#allocation28_spill] sm:$0xff] %v4895_v8  ;;  %v4897_v16 = vpop.eup %3574  ;;  %v4932_v26 = vsel %vm4310_vm2, %v1354_v39, -1e+30 }
 0x397   :  { %v1068_v45 = vpack.c.bf16 %v4895_v8, %v4897_v16  ;;  %v6141_v8 = vld [vmem:[#allocation64_spill] sm:$0xff] }
 0x398   :  { %v1734_v17 = vadd.f32 %v6089_v10, %v6141_v8 }
 0x399   :  { %3298 = vmatmul.mubr.bf16.gmra.mrb[40].mxu0 %v1066_v34 }
 0x39a   :  { %3301 = vmatprep.mubr.bf16.mxu0 %v1067_v52 }
 0x39f   :  { %v4944_v12 = vpop.eup %3576 }
 0x3a1   :  { %3302 = vmatmul.mubr.bf16.gmra.mrb[44].mxu0 %v1068_v45 }
 0x3a2   :  { %1390 = vmax.xlane.f32.xlu1 %v4905_v44 }
 0x3a6   :  { %1811 = vmax.xlane.f32.xlu1 %v4910_v42 }
 0x3aa   :  { %1813 = vmax.xlane.f32.xlu1 %v4917_v55  ;;  %v4920_v25 = vpop.f32.mrb[28].mxu0 }
 0x3ab   :  { %6115 = vst [vmem:[#allocation25_spill] sm:$0xff] %v4920_v25  ;;  %v4922_v9 = vpop.f32.mrb[29].mxu0  ;;  %v6140_v25 = vld [vmem:[#allocation63_spill] sm:$0xff] }
 0x3ac   :  { %6116 = vst [vmem:[#allocation16_spill] sm:$0xff] %v4922_v9  ;;  %v4924_v34 = vpop.f32.mrb[30].mxu0  ;;  %v6127_v9 = vld [vmem:[#allocation41_spill] sm:$0xff] }
 0x3ad   :  { %6117 = vst [vmem:[#allocation31_spill] sm:$0xff] %v4924_v34  ;;  %v4926_v52 = vpop.f32.mrb[31].mxu0 }
 0x3ae   :  { %6118 = vst [vmem:[#allocation19_spill] sm:$0xff] %v4926_v52  ;;  %v1731_v52 = vadd.f32 %v6089_v10, %v6126_v19  ;;  %v6132_v19 = vld [vmem:[#allocation49_spill] sm:$0xff] }
 0x3b4   :  { %1394 = vmax.xlane.f32.xlu0 %v4932_v26 }
 0x3b5   :  { %v1379_v4 = vpop.xlane.xlu1 %1378 }
 0x3b6   :  { %v1410_v46 = vsub.f32 %v4726_v35, %v1379_v4 }
 0x3b8   :  { %v1426_v18 = vmul.f32 1.442695, %v1410_v46 }
 0x3b9   :  { %v4936_v11 = vpop.xlane.xlu1 %1382 }
 0x3ba   :  { %3578 = vpow2.f32 %v1426_v18  ;;  %v1307_v18 = vadd.f32 %v6079_v43, %v4574_v13  ;;  %v6120_v13 = vld [vmem:[#allocation37_spill] sm:$0xff] }
 0x3bb   :  { %1925 = vrot.lane.b32.xlu1 %v3994_v32, %s3873_s23 }
 0x3bc   :  { %vm1323_vm11 = vcmp.ge.f32.partialorder %v1307_v18, 0.0 }
 0x3bd   :  { %v1800_v45 = vpop.xlane.xlu1 %1799 }
 0x3be   :  { %v1831_v28 = vsub.f32 %v4740_v59, %v1800_v45  ;;  %v1308_v45 = vadd.f32 %v6079_v43, %v4576_v14 }
 0x3bf   :  { %v4941_v61 = vpop.xlane.xlu0 %1384 }
 0x3c0   :  { %v1847_v20 = vmul.f32 1.442695, %v1831_v28  ;;  %v1339_v28 = vmul.f32 0.01, %v1307_v18  ;;  %vm1324_vm0 = vcmp.ge.f32.partialorder %v1308_v45, 0.0 }
 0x3c1   :  { %v1802_v23 = vpop.xlane.xlu1 %1801 }
 0x3c2   :  { %v1832_v27 = vsub.f32 %v4750_v29, %v1802_v23  ;;  %3580 = vpow2.f32 %v1847_v20  ;;  %v6119_v20 = vld [vmem:[#allocation33_spill] sm:$0xff] }
 0x3c3   :  { %v4946_v35 = vpop.xlane.xlu0 %1805  ;;  %v1727_v23 = vadd.f32 %v6089_v10, %v6119_v20 }
 0x3c4   :  { %v4948_v50 = vpop.eup %3578  ;;  %v1849_v39 = vmul.f32 1.442695, %v1832_v27  ;;  %v1340_v27 = vmul.f32 0.01, %v1308_v45 }
 0x3c5   :  { %v1920_v62 = vpop.permute.xlu1 %1919  ;;  %v1490_v32 = vpack.c.bf16 %v4944_v12, %v4948_v50  ;;  %vm1743_vm10 = vcmp.ge.f32.partialorder %v1727_v23, 0.0 }
 0x3c6   :  { %3582 = vpow2.f32 %v1849_v39  ;;  %3337 = vmatprep.subr.bf16.mxu0 %v1920_v62  ;;  %v1355_v39 = vsel %vm1323_vm11, %v1307_v18, %v1339_v28  ;;  %v1356_v14 = vsel %vm1324_vm0, %v1308_v45, %v1340_v27 }
 0x3c7   :  { %v1501_v59 = vpop.permute.xlu0 %1500  ;;  %3321 = vmatprep.mubr.bf16.mxu1 %v1490_v32  ;;  %3338 = vmatpush3.bf16.msra.mxu0 %v1920_v62  ;;  %v1309_v62 = vadd.f32 %v6079_v43, %v4578_v21  ;;  %v4970_v32 = vsel %vm4351_vm6, %v1355_v39, -1e+30  ;;  %v4979_v28 = vsel %vm4269_vm14, %v1356_v14, -1e+30 }
 0x3c8   :  { %3307 = vmatprep.subr.bf16.mxu1 %v1501_v59 }
 0x3c9   :  { %3308 = vmatpush3.bf16.msra.mxu1 %v1501_v59  ;;  %v1728_v59 = vadd.f32 %v6089_v10, %v6120_v13  ;;  %v1341_v18 = vmul.f32 0.01, %v1309_v62  ;;  %vm1325_vm5 = vcmp.ge.f32.partialorder %v1309_v62, 0.0 }
 0x3ca   :  { %1506 = vrot.lane.b32.xlu0 %v4023_v40, %s3872_s22 }
 0x3cb   :  { %v1922_v29 = vpop.permute.xlu0 %1921  ;;  %v1760_v21 = vmul.f32 0.01, %v1728_v59  ;;  %vm1744_vm11 = vcmp.ge.f32.partialorder %v1728_v59, 0.0  ;;  %v1357_v3 = vsel %vm1325_vm5, %v1309_v62, %v1341_v18  ;;  %vm1327_vm5 = vcmp.ge.f32.partialorder %v1311_v56, 0.0 }
 0x3cc   :  { %3339 = vmatprep.subr.bf16.mxu0 %v1922_v29  ;;  %v4954_v37 = vpop.eup %3580  ;;  %v4989_v14 = vsel %vm6122_vm3, %v1357_v3, -1e+30 }
 0x3cd   :  { %3340 = vmatpush3.bf16.msra.mxu0 %v1922_v29  ;;  %v1759_v29 = vmul.f32 0.01, %v1727_v23  ;;  %v1776_v27 = vsel %vm1744_vm11, %v1728_v59, %v1760_v21  ;;  %vm1326_vm11 = vcmp.ge.f32.partialorder %v1310_v22, 0.0 }
 0x3ce   :  { %v1358_v5 = vsel %vm1326_vm11, %v1310_v22, %v1342_v2  ;;  %vm6133_vm11 = vnez %v6132_v19 }
 0x3cf   :  { %v1775_v39 = vsel %vm1743_vm10, %v1727_v23, %v1759_v29  ;;  %v4994_v23 = vsel %vm4351_vm6, %v1776_v27, -1e+30 }
 0x3d0   :  { %v4956_v4 = vpop.eup %3582  ;;  %v4984_v45 = vsel %vm4310_vm2, %v1775_v39, -1e+30 }
 0x3d1   :  { %v1911_v46 = vpack.c.bf16 %v4956_v4, %v4954_v37 }
 0x3d3   :  { %3353 = vmatprep.mubr.bf16.mxu0 %v1911_v46  ;;  %v6121_v46 = vld [vmem:[#allocation34_spill] sm:$0xff] }
 0x3d4   :  { %v1730_v20 = vadd.f32 %v6089_v10, %v6121_v46 }
 0x3d6   :  { %v1762_v13 = vmul.f32 0.01, %v1730_v20  ;;  %vm1746_vm0 = vcmp.ge.f32.partialorder %v1730_v20, 0.0 }
 0x3d8   :  { %v1778_v46 = vsel %vm1746_vm0, %v1730_v20, %v1762_v13  ;;  %vm6128_vm0 = vnez %v6127_v9 }
 0x3d9   :  { %v4999_v62 = vsel %vm6122_vm3, %v1778_v46, -1e+30 }
 0x3df   :  { %1396 = vmax.xlane.f32.xlu1 %v4970_v32 }
 0x3e3   :  { %1398 = vmax.xlane.f32.xlu1 %v4979_v28 }
 0x3e7   :  { %1815 = vmax.xlane.f32.xlu1 %v4984_v45 }
 0x3e9   :  { %1400 = vmax.xlane.f32.xlu0 %v4989_v14 }
 0x3eb   :  { %1817 = vmax.xlane.f32.xlu1 %v4994_v23 }
 0x3ed   :  { %1821 = vmax.xlane.f32.xlu0 %v4999_v62 }
 0x3f6   :  { %v5002_v59 = vpop.xlane.xlu1 %1803 }
 0x3fa   :  { %v5004_v29 = vpop.xlane.xlu1 %1388 }
 0x3fc   :  { %v5006_v3 = vpop.xlane.xlu0 %1386  ;;  %1927 = vrot.lane.b32.xlu1 %v4023_v40, %s3873_s23  ;;  %v6123_v40 = vld [vmem:[#allocation32_spill] sm:$0xff] }
 0x3fd   :  { %v1729_v46 = vadd.f32 %v6089_v10, %v6123_v40 }
 0x3fe   :  { %v1503_v20 = vpop.permute.xlu1 %1502 }
 0x3ff   :  { %3309 = vmatprep.subr.bf16.mxu1 %v1503_v20  ;;  %vm1745_vm10 = vcmp.ge.f32.partialorder %v1729_v46, 0.0 }
 0x400   :  { %v5010_v18 = vpop.xlane.xlu0 %1392  ;;  %3310 = vmatpush3.bf16.msra.mxu1 %v1503_v20  ;;  %v1761_v20 = vmul.f32 0.01, %v1729_v46 }
 0x402   :  { %v1777_v31 = vsel %vm1745_vm10, %v1729_v46, %v1761_v20  ;;  %v1763_v20 = vmul.f32 0.01, %v1731_v52 }
 0x403   :  { %1508 = vrot.lane.b32.xlu0 %v6068_v7, %s3872_s22 }
 0x404   :  { %v5014_v21 = vpop.xlane.xlu0 %1807 }
 0x407   :  { %1929 = vrot.lane.b32.xlu0 %v6068_v7, %s3873_s23  ;;  %v1343_v7 = vmul.f32 0.01, %v1311_v56 }
 0x408   :  { %v5018_v39 = vpop.xlane.xlu0 %1809 }
 0x409   :  { %v1359_v40 = vsel %vm1327_vm5, %v1311_v56, %v1343_v7  ;;  %v1732_v56 = vadd.f32 %v6089_v10, %v6131_v48  ;;  %vm1747_vm5 = vcmp.ge.f32.partialorder %v1731_v52, 0.0 }
 0x40a   :  { %v5037_v46 = vsel %vm6128_vm0, %v1359_v40, -1e+30  ;;  %v1779_v40 = vsel %vm1747_vm5, %v1731_v52, %v1763_v20  ;;  %v6137_v52 = vld [vmem:[#allocation4_spill] sm:$0xff] }
 0x40b   :  { %6129 = vst [vmem:[#allocation21_spill] sm:$0xff] %v5037_v46  ;;  %v1764_v2 = vmul.f32 0.01, %v1732_v56  ;;  %vm1748_vm3 = vcmp.ge.f32.partialorder %v1732_v56, 0.0 }
 0x40c   :  { %v1924_v13 = vpop.permute.xlu0 %1923 }
 0x40d   :  { %3341 = vmatprep.subr.bf16.mxu0 %v1924_v13  ;;  %v1780_v48 = vsel %vm1748_vm3, %v1732_v56, %v1764_v2  ;;  %v6138_v2 = vld [vmem:[#allocation3_spill] sm:$0xff] }
 0x40e   :  { %3342 = vmatpush3.bf16.msra.mxu0 %v1924_v13  ;;  %v1313_v13 = vadd.f32 %v6079_v43, %v6125_v60 }
 0x410   :  { %v1505_v27 = vpop.permute.xlu0 %1504  ;;  %v1345_v41 = vmul.f32 0.01, %v1313_v13  ;;  %vm1329_vm10 = vcmp.ge.f32.partialorder %v1313_v13, 0.0 }
 0x411   :  { %3311 = vmatprep.subr.bf16.mxu1 %v1505_v27 }
 0x412   :  { %3312 = vmatpush3.bf16.msra.mxu1 %v1505_v27  ;;  %v5030_v27 = vsel %vm4269_vm14, %v1777_v31, -1e+30  ;;  %v5042_v31 = vsel %vm4451_vm1, %v1358_v5, -1e+30  ;;  %v1361_v7 = vsel %vm1329_vm10, %v1313_v13, %v1345_v41  ;;  %v5054_v5 = vsel %vm4451_vm1, %v1779_v40, -1e+30 }
 0x413   :  { %v5049_v22 = vsel %vm6133_vm11, %v1361_v7, -1e+30  ;;  %6135 = vst [vmem:[#allocation33_spill] sm:$0xff] %v5054_v5  ;;  %v5061_v13 = vsel %vm6128_vm0, %v1780_v48, -1e+30  ;;  %v6139_v48 = vld [vmem:[#allocation60_spill] sm:$0xff] }
 0x414   :  { %6134 = vst [vmem:[#allocation27_spill] sm:$0xff] %v5049_v22  ;;  %6136 = vst [vmem:[#allocation37_spill] sm:$0xff] %v5061_v13  ;;  %v1312_v9 = vadd.f32 %v6079_v43, %v6139_v48  ;;  %vm1750_vm0 = vcmp.ge.f32.partialorder %v1734_v17, 0.0  ;;  %vm6224_vm14 = vcmask 130048  }
 0x416   :  { %v1344_v60 = vmul.f32 0.01, %v1312_v9  ;;  %vm1328_vm3 = vcmp.ge.f32.partialorder %v1312_v9, 0.0 }
 0x420   :  { %1819 = vmax.xlane.f32.xlu1 %v5030_v27 }
 0x424   :  { %1404 = vmax.xlane.f32.xlu1 %v5037_v46 }
 0x426   :  { %1402 = vmax.xlane.f32.xlu0 %v5042_v31 }
 0x42a   :  { %1408 = vmax.xlane.f32.xlu0 %v5049_v22  ;;  %v1766_v22 = vmul.f32 0.01, %v1734_v17 }
 0x42c   :  { %v1782_v8 = vsel %vm1750_vm0, %v1734_v17, %v1766_v22  ;;  %v6150_v17 = vld [vmem:[#allocation13_spill] sm:$0xff]  ;;  %vm6174_vm0 = vmmov 0  }
 0x42d   :  { %v1412_v22 = vsub.f32 %v6150_v17, %v4936_v11  ;;  %v1833_v11 = vsub.f32 %v4790_v1, %v5002_v59 }
 0x42e   :  { %1823 = vmax.xlane.f32.xlu0 %v5054_v5  ;;  %v1733_v5 = vadd.f32 %v6089_v10, %v6140_v25 }
 0x42f   :  { %v5057_v34 = vpop.xlane.xlu1 %1390 }
 0x430   :  { %vm1749_vm10 = vcmp.ge.f32.partialorder %v1733_v5, 0.0 }
 0x432   :  { %1825 = vmax.xlane.f32.xlu0 %v5061_v13  ;;  %v1360_v13 = vsel %vm1328_vm3, %v1312_v9, %v1344_v60  ;;  %vm2264_vm3 = vcmask 64512  }
 0x433   :  { %v5064_v41 = vpop.xlane.xlu1 %1811 }
 0x435   :  { %1510 = vrot.lane.b32.xlu1 %v6137_v52, %s3872_s22 }
 0x437   :  { %v5068_v20 = vpop.xlane.xlu1 %1813 }
 0x43b   :  { %v1926_v7 = vpop.permute.xlu1 %1925 }
 0x43c   :  { %3343 = vmatprep.subr.bf16.mxu0 %v1926_v7 }
 0x43d   :  { %3344 = vmatpush3.bf16.msra.mxu0 %v1926_v7  ;;  %v1765_v7 = vmul.f32 0.01, %v1733_v5 }
 0x43f   :  { %v1781_v46 = vsel %vm1749_vm10, %v1733_v5, %v1765_v7  ;;  %vm5963_vm10 = vcmask 195584  }
 0x441   :  { %v5070_v40 = vpop.xlane.xlu0 %1394 }
 0x445   :  { %v1507_v56 = vpop.permute.xlu0 %1506 }
 0x446   :  { %3313 = vmatprep.subr.bf16.mxu1 %v1507_v56 }
 0x447   :  { %3314 = vmatpush3.bf16.msra.mxu1 %v1507_v56  ;;  %v6142_v56 = vld [vmem:[#allocation43_spill] sm:$0xff] }
 0x448   :  { %1931 = vrot.lane.b32.xlu0 %v6137_v52, %s3873_s23  ;;  %vm6143_vm5 = vnez %v6142_v56  ;;  %v6149_v56 = vld [vmem:[#allocation67_spill] sm:$0xff] }
 0x449   :  { %v5084_v52 = vsel %vm6143_vm5, %v1360_v13, -1e+30  ;;  %v5091_v25 = vsel %vm6143_vm5, %v1781_v46, -1e+30  ;;  %v5102_v13 = vsel %vm6133_vm11, %v1782_v8, -1e+30 }
 0x44c   :  { %1512 = vrot.lane.b32.xlu0 %v6138_v2, %s3872_s22 }
 0x459   :  { %1406 = vmax.xlane.f32.xlu1 %v5084_v52 }
 0x45c   :  { %v5087_v43 = vpop.f32.mrb[32].mxu0 }
 0x45d   :  { %6144 = vst [vmem:[#allocation34_spill] sm:$0xff] %v5087_v43  ;;  %1827 = vmax.xlane.f32.xlu1 %v5091_v25  ;;  %v5094_v10 = vpop.f32.mrb[33].mxu0 }
 0x45e   :  { %v5096_v9 = vpop.f32.mrb[34].mxu0 }
 0x45f   :  { %6145 = vst [vmem:[#allocation32_spill] sm:$0xff] %v5096_v9  ;;  %v5098_v60 = vpop.f32.mrb[35].mxu0 }
 0x461   :  { %1829 = vmax.xlane.f32.xlu1 %v5102_v13 }
 0x464   :  { %v5105_v5 = vpop.f32.mrb[36].mxu0 }
 0x465   :  { %6146 = vst [vmem:[#allocation58_spill] sm:$0xff] %v5105_v5  ;;  %v5107_v48 = vpop.f32.mrb[37].mxu0 }
 0x466   :  { %6147 = vst [vmem:[#allocation59_spill] sm:$0xff] %v5107_v48  ;;  %v5109_v46 = vpop.f32.mrb[38].mxu0 }
 0x467   :  { %6148 = vst [vmem:[#allocation61_spill] sm:$0xff] %v5109_v46  ;;  %v5111_v7 = vpop.f32.mrb[39].mxu0  ;;  %v1430_v46 = vmul.f32 1.442695, %v1412_v22 }
 0x469   :  { %3584 = vpow2.f32 %v1430_v46 }
 0x46b   :  { %1029 = vadd.xlane.f32.xlu0 %v6149_v56 }
 0x46c   :  { %v5116_v9 = vpop.f32.mrb[40].mxu0  ;;  %v5118_v19 = vpop.xlane.xlu1 %1396 }
 0x46d   :  { %6151 = vst [vmem:[#allocation62_spill] sm:$0xff] %v5116_v9  ;;  %v5120_v8 = vpop.f32.mrb[41].mxu0 }
 0x46e   :  { %v5122_v43 = vpop.f32.mrb[42].mxu0 }
 0x46f   :  { %6152 = vst [vmem:[#allocation4_spill] sm:$0xff] %v5122_v43  ;;  %1033 = vadd.xlane.f32.xlu0 %v4851_v30  ;;  %v5125_v5 = vpop.f32.mrb[43].mxu0 }
 0x470   :  { %v5127_v48 = vpop.xlane.xlu1 %1398 }
 0x472   :  { %1933 = vrot.lane.b32.xlu1 %v6138_v2, %s3873_s23  ;;  %v1851_v2 = vmul.f32 1.442695, %v1833_v11 }
 0x473   :  { %1035 = vadd.xlane.f32.xlu0 %v4843_v38  ;;  %v5152_v59 = vpop.eup %3584 }
 0x474   :  { %v5134_v56 = vpop.f32.mrb[44].mxu0  ;;  %v5136_v17 = vpop.xlane.xlu1 %1815  ;;  %3586 = vpow2.f32 %v1851_v2 }
 0x475   :  { %6153 = vst [vmem:[#allocation3_spill] sm:$0xff] %v5134_v56  ;;  %v5138_v43 = vpop.f32.mrb[45].mxu0 }
 0x476   :  { %v5140_v30 = vpop.xlane.xlu0 %1400  ;;  %v5142_v22 = vpop.f32.mrb[46].mxu0 }
 0x477   :  { %6154 = vst [vmem:[#allocation60_spill] sm:$0xff] %v5142_v22  ;;  %v5144_v9 = vpop.f32.mrb[47].mxu0  ;;  %1458 = vadd.xlane.f32.xlu0 %v4948_v50  ;;  %v1414_v50 = vsub.f32 %v4802_v53, %v5006_v3  ;;  %v1835_v53 = vsub.f32 %v4822_v47, %v5014_v21  ;;  %v6158_v21 = vld [vmem:[#allocation68_spill] sm:$0xff] }
 0x478   :  { %6155 = vst [vmem:[#allocation63_spill] sm:$0xff] %v5144_v9  ;;  %v5147_v38 = vpop.xlane.xlu1 %1817 }
 0x479   :  { %v1434_v22 = vmul.f32 1.442695, %v1414_v50 }
 0x47a   :  { %v5149_v46 = vpop.xlane.xlu0 %1821 }
 0x47b   :  { %1460 = vadd.xlane.f32.xlu0 %v4944_v12  ;;  %v1416_v12 = vsub.f32 %v4905_v44, %v5057_v34  ;;  %3588 = vpow2.f32 %v1434_v22  ;;  %v1837_v44 = vsub.f32 %v4910_v42, %v5064_v41  ;;  %v6157_v34 = vld [vmem:[#allocation12_spill] sm:$0xff]  ;;  %v1418_v42 = vsub.f32 %v4932_v26, %v5070_v40 }
 0x47c   :  { %v1928_v1 = vpop.permute.xlu1 %1927  ;;  %v1834_v50 = vsub.f32 %v6157_v34, %v4946_v35  ;;  %v1415_v41 = vsub.f32 %v4797_v58, %v5004_v29  ;;  %v1417_v40 = vsub.f32 %v4811_v36, %v5010_v18  ;;  %v1839_v58 = vsub.f32 %v4984_v45, %v5136_v17 }
 0x47d   :  { %3345 = vmatprep.subr.bf16.mxu0 %v1928_v1  ;;  %v1438_v3 = vmul.f32 1.442695, %v1416_v12  ;;  %v1838_v45 = vsub.f32 %v4917_v55, %v5068_v20  ;;  %v1421_v34 = vsub.f32 %v4989_v14, %v5140_v30  ;;  %v1842_v30 = vsub.f32 %v4999_v62, %v5149_v46 }
 0x47e   :  { %v1509_v56 = vpop.permute.xlu0 %1508  ;;  %3346 = vmatpush3.bf16.msra.mxu0 %v1928_v1  ;;  %v5160_v2 = vpop.eup %3586  ;;  %v6156_v1 = vld [vmem:[#allocation17_spill] sm:$0xff]  ;;  %v1853_v47 = vmul.f32 1.442695, %v1834_v50  ;;  %v1436_v26 = vmul.f32 1.442695, %v1415_v41 }
 0x47f   :  { %1462 = vadd.xlane.f32.xlu0 %v5152_v59  ;;  %3315 = vmatprep.subr.bf16.mxu1 %v1509_v56  ;;  %v1413_v9 = vsub.f32 %v6156_v1, %v4941_v61  ;;  %3590 = vpow2.f32 %v1438_v3  ;;  %v1859_v61 = vmul.f32 1.442695, %v1837_v44  ;;  %v1863_v36 = vmul.f32 1.442695, %v1839_v58 }
 0x480   :  { %3316 = vmatpush3.bf16.msra.mxu1 %v1509_v56 }
 0x481   :  { %v1432_v56 = vmul.f32 1.442695, %v1413_v9  ;;  %v1442_v9 = vmul.f32 1.442695, %v1418_v42 }
 0x482   :  { %v1930_v11 = vpop.permute.xlu0 %1929 }
 0x483   :  { %1879 = vadd.xlane.f32.xlu0 %v4954_v37  ;;  %3347 = vmatprep.subr.bf16.mxu0 %v1930_v11  ;;  %v1855_v37 = vmul.f32 1.442695, %v1835_v53  ;;  %3592 = vpow2.f32 %v1432_v56  ;;  %v1419_v53 = vsub.f32 %v4970_v32, %v5118_v19  ;;  %v1448_v19 = vmul.f32 1.442695, %v1421_v34 }
 0x484   :  { %3348 = vmatpush3.bf16.msra.mxu0 %v1930_v11  ;;  %v1420_v11 = vsub.f32 %v4979_v28, %v5127_v48  ;;  %v1440_v28 = vmul.f32 1.442695, %v1417_v40  ;;  %v6160_v40 = vld [vmem:[#allocation27_spill] sm:$0xff] }
 0x485   :  { %3594 = vpow2.f32 %v1855_v37  ;;  %v5173_v22 = vpop.eup %3588  ;;  %v1444_v44 = vmul.f32 1.442695, %v1419_v53 }
 0x486   :  { %3596 = vpow2.f32 %v1859_v61  ;;  %v1446_v1 = vmul.f32 1.442695, %v1420_v11  ;;  %v6159_v11 = vld [vmem:[#allocation21_spill] sm:$0xff] }
 0x487   :  { %1883 = vadd.xlane.f32.xlu0 %v5160_v2  ;;  %3598 = vpow2.f32 %v1853_v47  ;;  %v1840_v47 = vsub.f32 %v4994_v23, %v5147_v38  ;;  %v1869_v23 = vmul.f32 1.442695, %v1842_v30 }
 0x488   :  { %3600 = vpow2.f32 %v1442_v9 }
 0x489   :  { %3602 = vpow2.f32 %v1436_v26  ;;  %v1865_v14 = vmul.f32 1.442695, %v1840_v47  ;;  %v6165_v47 = vmov 0.0  }
 0x48a   :  { %3604 = vpow2.f32 %v1446_v1 }
 0x48b   :  { %1037 = vadd.xlane.f32.xlu0 %v4853_v57  ;;  %v5176_v57 = vpop.eup %3590  ;;  %3606 = vpow2.f32 %v1440_v28  ;;  %v6161_v28 = vld [vmem:[#allocation37_spill] sm:$0xff] }
 0x48c   :  { %3608 = vpow2.f32 %v1863_v36  ;;  %v6162_v36 = vld [vmem:[#allocation10_spill] sm:$0xff] }
 0x48d   :  { %v5182_v35 = vpop.eup %3592 }
 0x48f   :  { %1041 = vadd.xlane.f32.xlu0 %v4867_v15  ;;  %v5184_v15 = vpop.eup %3594 }
 0x490   :  { %v5192_v12 = vpop.eup %3596 }
 0x491   :  { %v5200_v29 = vpop.eup %3598 }
 0x492   :  { %v5210_v48 = vpop.eup %3600 }
 0x493   :  { %1466 = vadd.xlane.f32.xlu0 %v5173_v22 }
 0x496   :  { %1031 = vadd.xlane.f32.xlu1 %v6158_v21 }
 0x497   :  { %1470 = vadd.xlane.f32.xlu0 %v5176_v57 }
 0x49a   :  { %1464 = vadd.xlane.f32.xlu1 %v5182_v35 }
 0x49b   :  { %1887 = vadd.xlane.f32.xlu0 %v5184_v15 }
 0x49e   :  { %1881 = vadd.xlane.f32.xlu1 %v4956_v4  ;;  %v1836_v4 = vsub.f32 %v4829_v6, %v5018_v39  ;;  %v1861_v6 = vmul.f32 1.442695, %v1838_v45 }
 0x49f   :  { %1891 = vadd.xlane.f32.xlu0 %v5192_v12 }
 0x4a0   :  { %v1857_v18 = vmul.f32 1.442695, %v1836_v4 }
 0x4a2   :  { %1885 = vadd.xlane.f32.xlu1 %v5200_v29  ;;  %3610 = vpow2.f32 %v1857_v18 }
 0x4a3   :  { %1045 = vadd.xlane.f32.xlu0 %v4869_v24  ;;  %v5214_v24 = vpop.eup %3602  ;;  %3612 = vpow2.f32 %v1861_v6  ;;  %v6163_v6 = vld [vmem:[#allocation28_spill] sm:$0xff] }
 0x4a6   :  { %1039 = vadd.xlane.f32.xlu1 %v4847_v63  ;;  %v5216_v63 = vpop.eup %3604 }
 0x4a7   :  { %1049 = vadd.xlane.f32.xlu0 %v4883_v54  ;;  %v5221_v55 = vpop.eup %3606 }
 0x4a8   :  { %v5223_v20 = vpop.eup %3608 }
 0x4aa   :  { %1043 = vadd.xlane.f32.xlu1 %v4862_v51 }
 0x4ab   :  { %1474 = vadd.xlane.f32.xlu0 %v5210_v48 }
 0x4ad   :  { %v1820_v39 = vpop.xlane.xlu1 %1819 }
 0x4ae   :  { %v1841_v17 = vsub.f32 %v5030_v27, %v1820_v39  ;;  %1468 = vadd.xlane.f32.xlu1 %v5214_v24  ;;  %v5229_v27 = vpop.eup %3610 }
 0x4af   :  { %1478 = vadd.xlane.f32.xlu0 %v5216_v63  ;;  %v5235_v61 = vpop.eup %3612 }
 0x4b0   :  { %v1867_v54 = vmul.f32 1.442695, %v1841_v17 }
 0x4b1   :  { %v1405_v51 = vpop.xlane.xlu1 %1404 }
 0x4b2   :  { %3614 = vpow2.f32 %v1867_v54  ;;  %1472 = vadd.xlane.f32.xlu1 %v5221_v55  ;;  %v1423_v26 = vsub.f32 %v6159_v11, %v1405_v51  ;;  %v6164_v54 = vld [vmem:[#allocation33_spill] sm:$0xff] }
 0x4b3   :  { %v1403_v3 = vpop.xlane.xlu0 %1402  ;;  %1895 = vadd.xlane.f32.xlu0 %v5223_v20  ;;  %3616 = vpow2.f32 %v1444_v44 }
 0x4b4   :  { %v1422_v37 = vsub.f32 %v5042_v31, %v1403_v3  ;;  %v1452_v46 = vmul.f32 1.442695, %v1423_v26  ;;  %v6172_v26 = vld [vmem:[#allocation53_spill] sm:$0xff] }
 0x4b5   :  { %v1511_v56 = vpop.permute.xlu1 %1510 }
 0x4b6   :  { %1889 = vadd.xlane.f32.xlu1 %v5229_v27  ;;  %3317 = vmatprep.subr.bf16.mxu1 %v1511_v56  ;;  %v1450_v32 = vmul.f32 1.442695, %v1422_v37 }
 0x4b7   :  { %v1409_v50 = vpop.xlane.xlu0 %1408  ;;  %3318 = vmatpush3.bf16.msra.mxu1 %v1511_v56 }
 0x4b8   :  { %3618 = vpow2.f32 %v1450_v32  ;;  %v1425_v1 = vsub.f32 %v6160_v40, %v1409_v50  ;;  %v6178_v40 = vld [vmem:[#allocation55_spill] sm:$0xff] }
 0x4b9   :  { %3620 = vpow2.f32 %v1448_v19 }
 0x4ba   :  { %1893 = vadd.xlane.f32.xlu1 %v5235_v61  ;;  %3622 = vpow2.f32 %v1865_v14 }
 0x4bb   :  { %v5240_v31 = vpop.xlane.xlu0 %1823  ;;  %3624 = vpow2.f32 %v1869_v23  ;;  %v1914_v23 = vpack.c.bf16 %v5235_v61, %v5192_v12 }
 0x4bc   :  { %v5242_v21 = vpop.eup %3614  ;;  %3626 = vpow2.f32 %v1452_v46 }
 0x4bd   :  { %1899 = vadd.xlane.f32.xlu0 %v5242_v21  ;;  %v3617_v41 = vpop.eup %3616 }
 0x4be   :  { %1047 = vadd.xlane.f32.xlu1 %v4865_v33  ;;  %v1494_v4 = vpack.c.bf16 %v3617_v41, %v5210_v48 }
 0x4bf   :  { %v1826_v42 = vpop.xlane.xlu0 %1825 }
 0x4c1   :  { %1053 = vadd.xlane.f32.xlu0 %v4879_v49  ;;  %v1492_v49 = vpack.c.bf16 %v5214_v24, %v5173_v22  ;;  %v1844_v22 = vsub.f32 %v6161_v28, %v1826_v42  ;;  %v6182_v28 = vld [vmem:[#allocation66_spill] sm:$0xff] }
 0x4c2   :  { %1051 = vadd.xlane.f32.xlu1 %v4877_v0  ;;  %v3619_v9 = vpop.eup %3618  ;;  %v1491_v0 = vpack.c.bf16 %v5182_v35, %v5152_v59  ;;  %v1493_v59 = vpack.c.bf16 %v5221_v55, %v5176_v57  ;;  %v1456_v35 = vmul.f32 1.442695, %v1425_v1  ;;  %v1843_v55 = vsub.f32 %v6164_v54, %v5240_v31  ;;  %v6179_v1 = vld [vmem:[#allocation2_spill] sm:$0xff] }
 0x4c3   :  { %v1932_v38 = vpop.permute.xlu0 %1931  ;;  %v3621_v62 = vpop.eup %3620  ;;  %v1873_v18 = vmul.f32 1.442695, %v1844_v22 }
 0x4c4   :  { %3349 = vmatprep.subr.bf16.mxu0 %v1932_v38  ;;  %3628 = vpow2.f32 %v1456_v35  ;;  %v1495_v24 = vpack.c.bf16 %v3621_v62, %v5216_v63  ;;  %v1871_v56 = vmul.f32 1.442695, %v1843_v55  ;;  %v6181_v35 = vld [vmem:[#allocation65_spill] sm:$0xff] }
 0x4c5   :  { %3350 = vmatpush3.bf16.msra.mxu0 %v1932_v38  ;;  %1057 = vadd.xlane.f32.xlu0 %v4897_v16  ;;  %v5256_v16 = vpop.eup %3622  ;;  %3630 = vpow2.f32 %v1873_v18 }
 0x4c6   :  { %1476 = vadd.xlane.f32.xlu1 %v3617_v41  ;;  %v5260_v58 = vpop.eup %3624  ;;  %v6168_v41 = vld [vmem:[#allocation45_spill] sm:$0xff] }
 0x4c7   :  { %v1513_v33 = vpop.permute.xlu0 %1512  ;;  %v3627_v45 = vpop.eup %3626  ;;  %v1916_v38 = vpack.c.bf16 %v5260_v58, %v5242_v21  ;;  %v6175_v21 = vld [vmem:[#allocation54_spill] sm:$0xff] }
 0x4c8   :  { %3319 = vmatprep.subr.bf16.mxu1 %v1513_v33  ;;  %v1496_v39 = vpack.c.bf16 %v3627_v45, %v3619_v9 }
 0x4c9   :  { %1482 = vadd.xlane.f32.xlu0 %v3619_v9  ;;  %3320 = vmatpush3.bf16.msra.mxu1 %v1513_v33  ;;  %v6169_v33 = vld [vmem:[#allocation47_spill] sm:$0xff]  ;;  %v6170_v9 = vld [vmem:[#allocation50_spill] sm:$0xff] }
 0x4ca   :  { %1480 = vadd.xlane.f32.xlu1 %v3621_v62  ;;  %v6173_v62 = vld [vmem:[#allocation51_spill] sm:$0xff] }
 0x4cc   :  { %3322 = vmatmul.mubr.bf16.vlgmr.msra.gmra.mrb[4].mxu1 %v1491_v0 }
 0x4cd   :  { %3325 = vmatprep.mubr.bf16.mxu1 %v1492_v49  ;;  %v6176_v49 = vld [vmem:[#allocation56_spill] sm:$0xff] }
 0x4ce   :  { %1897 = vadd.xlane.f32.xlu1 %v5256_v16  ;;  %v3629_v57 = vpop.eup %3628 }
 0x4cf   :  { %v3631_v17 = vpop.eup %3630 }
 0x4d2   :  { %1901 = vadd.xlane.f32.xlu1 %v5260_v58  ;;  %v6180_v58 = vld [vmem:[#allocation42_spill] sm:$0xff] }
 0x4d4   :  { %3326 = vmatmul.mubr.bf16.gmra.mrb[8].mxu1 %v1493_v59 }
 0x4d5   :  { %3329 = vmatprep.mubr.bf16.mxu1 %v1494_v4 }
 0x4d6   :  { %1055 = vadd.xlane.f32.xlu1 %v6162_v36 }
 0x4da   :  { %1059 = vadd.xlane.f32.xlu1 %v6163_v6 }
 0x4dc   :  { %3330 = vmatmul.mubr.bf16.gmra.mrb[12].mxu1 %v1495_v24 }
 0x4dd   :  { %3333 = vmatprep.mubr.bf16.mxu1 %v1496_v39 }
 0x4de   :  { %1484 = vadd.xlane.f32.xlu1 %v3627_v45 }
 0x4e2   :  { %1488 = vadd.xlane.f32.xlu1 %v3629_v57 }
 0x4e6   :  { %1905 = vadd.xlane.f32.xlu1 %v3631_v17  ;;  %v1407_v48 = vpop.xlane.xlu1 %1406 }
 0x4e7   :  { %v1424_v51 = vsub.f32 %v5084_v52, %v1407_v48  ;;  %v1912_v52 = vpack.c.bf16 %v5200_v29, %v5160_v2  ;;  %v1915_v2 = vpack.c.bf16 %v5256_v16, %v5223_v20  ;;  %v6166_v29 = vld [vmem:[#allocation46_spill] sm:$0xff]  ;;  %v6171_v20 = vld [vmem:[#allocation52_spill] sm:$0xff]  ;;  %v6177_v16 = vld [vmem:[#allocation57_spill] sm:$0xff] }
 0x4e9   :  { %v1454_v53 = vmul.f32 1.442695, %v1424_v51 }
 0x4ea   :  { %v1828_v3 = vpop.xlane.xlu1 %1827 }
 0x4eb   :  { %3632 = vpow2.f32 %v1454_v53  ;;  %v1845_v63 = vsub.f32 %v5091_v25, %v1828_v3  ;;  %v1913_v25 = vpack.c.bf16 %v5229_v27, %v5184_v15  ;;  %v6167_v15 = vld [vmem:[#allocation44_spill] sm:$0xff]  ;;  %v6183_v3 = vld [vmem:[#allocation34_spill] sm:$0xff] }
 0x4ec   :  { %3634 = vpow2.f32 %v1871_v56 }
 0x4ed   :  { %v1875_v37 = vmul.f32 1.442695, %v1845_v63  ;;  %v6184_v63 = vld [vmem:[#allocation32_spill] sm:$0xff] }
 0x4ee   :  { %v1830_v44 = vpop.xlane.xlu1 %1829 }
 0x4ef   :  { %v1846_v34 = vsub.f32 %v5102_v13, %v1830_v44  ;;  %3636 = vpow2.f32 %v1875_v37 }
 0x4f1   :  { %v1877_v50 = vmul.f32 1.442695, %v1846_v34 }
 0x4f2   :  { %v1934_v32 = vpop.permute.xlu1 %1933 }
 0x4f3   :  { %3638 = vpow2.f32 %v1877_v50  ;;  %3351 = vmatprep.subr.bf16.mxu0 %v1934_v32 }
 0x4f4   :  { %3352 = vmatpush3.bf16.msra.mxu0 %v1934_v32 }
 0x4f5   :  { %v3633_v19 = vpop.eup %3632  ;;  %3389 = vmatprep.subr.bf16.mxu0 %v6165_v47 }
 0x4f6   :  { %1486 = vadd.xlane.f32.xlu0 %v3633_v19  ;;  %v1497_v31 = vpack.c.bf16 %v3629_v57, %v3633_v19  ;;  %v3635_v13 = vpop.eup %3634 }
 0x4f7   :  { %3354 = vmatmul.mubr.bf16.vlgmr.msra.gmra.mrb[48].mxu0 %v1912_v52  ;;  %v1917_v12 = vpack.c.bf16 %v3631_v17, %v3635_v13 }
 0x4f8   :  { %3334 = vmatmul.mubr.bf16.gmra.mrb[16].mxu1 %v1497_v31  ;;  %3357 = vmatprep.mubr.bf16.mxu0 %v1913_v25  ;;  %v1030_v42 = vpop.xlane.xlu0 %1029 }
 0x4f9   :  { %v3637_v14 = vpop.eup %3636 }
 0x4fa   :  { %1903 = vadd.xlane.f32.xlu0 %v3635_v13 }
 0x4fc   :  { %v1034_v27 = vpop.xlane.xlu0 %1033 }
 0x4fd   :  { %v3639_v30 = vpop.eup %3638 }
 0x4fe   :  { %1907 = vadd.xlane.f32.xlu0 %v3637_v14  ;;  %1909 = vadd.xlane.f32.xlu1 %v3639_v30  ;;  %v1918_v11 = vpack.c.bf16 %v3639_v30, %v3637_v14 }
 0x4ff   :  { %3358 = vmatmul.mubr.bf16.gmra.mrb[52].mxu0 %v1914_v23 }
 0x500   :  { %3361 = vmatprep.mubr.bf16.mxu0 %v1915_v2  ;;  %v1036_v61 = vpop.xlane.xlu0 %1035 }
 0x502   :  { %632 = vadd.xlane.f32.xlu0 %v6166_v29  ;;  %634 = vadd.xlane.f32.xlu1 %v6167_v15 }
 0x504   :  { %v5294_v0 = vpop.xlane.xlu0 %1458 }
 0x506   :  { %636 = vadd.xlane.f32.xlu0 %v6168_v41  ;;  %638 = vadd.xlane.f32.xlu1 %v6169_v33 }
 0x507   :  { %3362 = vmatmul.mubr.bf16.gmra.mrb[56].mxu0 %v1916_v38 }
 0x508   :  { %3365 = vmatprep.mubr.bf16.mxu0 %v1917_v12  ;;  %v5300_v46 = vpop.xlane.xlu0 %1460 }
 0x50a   :  { %640 = vadd.xlane.f32.xlu0 %v6170_v9  ;;  %642 = vadd.xlane.f32.xlu1 %v6171_v20 }
 0x50c   :  { %v5306_v59 = vpop.xlane.xlu0 %1462 }
 0x50e   :  { %644 = vadd.xlane.f32.xlu0 %v6172_v26  ;;  %646 = vadd.xlane.f32.xlu1 %v6173_v62 }
 0x50f   :  { %3366 = vmatmul.mubr.bf16.gmra.mrb[60].mxu0 %v1918_v11 }
 0x510   :  { %3405 = vmatprep.mubr.msk.bf16.mxu0 %vm6174_vm0, %v6165_v47  ;;  %v5310_v22 = vpop.xlane.xlu0 %1879  ;;  %vm6211_vm0 = vcmask 130048  }
 0x511   :  { %vm6213_vm11 = vmmov %vm6211_vm0 }
 0x512   :  { %648 = vadd.xlane.f32.xlu0 %v6175_v21  ;;  %650 = vadd.xlane.f32.xlu1 %v6176_v49  ;;  %vm6215_vm5 = vmmov %vm6211_vm0 }
 0x514   :  { %v5312_v36 = vpop.xlane.xlu0 %1883 }
 0x516   :  { %652 = vadd.xlane.f32.xlu0 %v6177_v16  ;;  %654 = vadd.xlane.f32.xlu1 %v6178_v40 }
 0x518   :  { %v5318_v6 = vpop.xlane.xlu0 %1037 }
 0x51a   :  { %656 = vadd.xlane.f32.xlu0 %v6179_v1  ;;  %658 = vadd.xlane.f32.xlu1 %v6180_v58 }
 0x51c   :  { %v5325_v51 = vpop.xlane.xlu0 %1041 }
 0x51e   :  { %660 = vadd.xlane.f32.xlu0 %v6181_v35  ;;  %662 = vadd.xlane.f32.xlu1 %v6182_v28 }
 0x520   :  { %v5336_v44 = vpop.xlane.xlu0 %1466 }
 0x523   :  { %v1032_v4 = vpop.xlane.xlu1 %1031 }
 0x524   :  { %3640 = vrcp.f32 %v1032_v4  ;;  %v5340_v34 = vpop.xlane.xlu0 %1470 }
 0x525   :  { %3642 = vrcp.f32 %v1030_v42 }
 0x526   :  { %3644 = vrcp.f32 %v1034_v27 }
 0x527   :  { %v5314_v18 = vpop.xlane.xlu1 %1464  ;;  %3646 = vrcp.f32 %v1036_v61 }
 0x528   :  { %v5346_v19 = vpop.xlane.xlu0 %1887  ;;  %3648 = vrcp.f32 %v5294_v0 }
 0x529   :  { %3650 = vrcp.f32 %v5300_v46 }
 0x52a   :  { %3652 = vrcp.f32 %v5306_v59 }
 0x52b   :  { %v5316_v45 = vpop.xlane.xlu1 %1881  ;;  %3654 = vrcp.f32 %v5314_v18 }
 0x52c   :  { %v5350_v31 = vpop.xlane.xlu0 %1891 }
 0x52e   :  { %v3641_v24 = vpop.eup %3640 }
 0x52f   :  { %v3643_v39 = vpop.eup %3642  ;;  %v5320_v57 = vpop.xlane.xlu1 %1885  ;;  %v1215_v17 = vmul.f32 %v3641_v24, %v5098_v60 }
 0x530   :  { %v3645_v48 = vpop.eup %3644  ;;  %v1214_v54 = vmul.f32 %v3643_v39, %v5094_v10  ;;  %v5354_v13 = vpop.xlane.xlu0 %1045 }
 0x531   :  { %2090 = vrot.lane.b32.xlu1 %v1215_v17, %s3874_s24  ;;  %v3647_v55 = vpop.eup %3646  ;;  %v1216_v56 = vmul.f32 %v3645_v48, %v6183_v3 }
 0x532   :  { %v1217_v37 = vmul.f32 %v3647_v55, %v6184_v63  ;;  %v3649_v0 = vpop.eup %3648 }
 0x533   :  { %v5327_v53 = vpop.xlane.xlu1 %1039 }
 0x534   :  { %2088 = vrot.lane.b32.xlu0 %v1214_v54, %s3874_s24  ;;  %v5358_v30 = vpop.xlane.xlu0 %1049 }
 0x535   :  { %2092 = vrot.lane.b32.xlu1 %v1216_v56, %s3874_s24 }
 0x537   :  { %v5333_v60 = vpop.xlane.xlu1 %1043 }
 0x538   :  { %2094 = vrot.lane.b32.xlu0 %v1217_v37, %s3874_s24  ;;  %v5362_v23 = vpop.xlane.xlu0 %1474  ;;  %v3651_v37 = vpop.eup %3650 }
 0x539   :  { %v3653_v18 = vpop.eup %3652 }
 0x53b   :  { %v5338_v10 = vpop.xlane.xlu1 %1468 }
 0x53c   :  { %v5366_v29 = vpop.xlane.xlu0 %1478 }
 0x53f   :  { %v5342_v50 = vpop.xlane.xlu1 %1472 }
 0x540   :  { %v5370_v27 = vpop.xlane.xlu0 %1895 }
 0x543   :  { %v5344_v32 = vpop.xlane.xlu1 %1889 }
 0x547   :  { %v5348_v52 = vpop.xlane.xlu1 %1893 }
 0x54a   :  { %v5374_v41 = vpop.xlane.xlu0 %1899 }
 0x54b   :  { %v5352_v25 = vpop.xlane.xlu1 %1047 }
 0x54e   :  { %v5378_v12 = vpop.xlane.xlu0 %1053 }
 0x54f   :  { %v5356_v14 = vpop.xlane.xlu1 %1051 }
 0x552   :  { %v5382_v9 = vpop.xlane.xlu0 %1057 }
 0x553   :  { %v5360_v42 = vpop.xlane.xlu1 %1476 }
 0x556   :  { %v5386_v11 = vpop.xlane.xlu0 %1482 }
 0x557   :  { %v5364_v2 = vpop.xlane.xlu1 %1480 }
 0x55b   :  { %v5368_v15 = vpop.xlane.xlu1 %1897 }
 0x55f   :  { %v5372_v38 = vpop.xlane.xlu1 %1901 }
 0x563   :  { %v5376_v33 = vpop.xlane.xlu1 %1055 }
 0x567   :  { %v5380_v61 = vpop.xlane.xlu1 %1059 }
 0x56b   :  { %v5384_v20 = vpop.xlane.xlu1 %1484 }
 0x56f   :  { %v5388_v26 = vpop.xlane.xlu1 %1488 }
 0x573   :  { %v5392_v21 = vpop.xlane.xlu1 %1905 }
 0x583   :  { %v5390_v62 = vpop.xlane.xlu0 %1486 }
 0x587   :  { %v5394_v49 = vpop.xlane.xlu0 %1903 }
 0x58b   :  { %v5396_v16 = vpop.xlane.xlu0 %1907  ;;  %v5398_v40 = vpop.xlane.xlu1 %1909 }
 0x58f   :  { %v5400_v1 = vpop.xlane.xlu0 %632  ;;  %v5402_v58 = vpop.xlane.xlu1 %634 }
 0x593   :  { %v5404_v35 = vpop.xlane.xlu0 %636  ;;  %v5406_v28 = vpop.xlane.xlu1 %638 }
 0x594   :  { %6185 = vst [vmem:[#allocation64_spill] sm:$0xff] %v5406_v28 }
 0x597   :  { %v5409_v4 = vpop.xlane.xlu0 %640  ;;  %v5411_v24 = vpop.xlane.xlu1 %642 }
 0x598   :  { %6186 = vst [vmem:[#allocation67_spill] sm:$0xff] %v5409_v4  ;;  %6187 = vst [vmem:[#allocation13_spill] sm:$0xff] %v5411_v24 }
 0x59b   :  { %v5415_v39 = vpop.xlane.xlu0 %644  ;;  %v5417_v17 = vpop.xlane.xlu1 %646 }
 0x59c   :  { %6188 = vst [vmem:[#allocation17_spill] sm:$0xff] %v5415_v39  ;;  %6189 = vst [vmem:[#allocation12_spill] sm:$0xff] %v5417_v17 }
 0x59f   :  { %v5420_v48 = vpop.xlane.xlu0 %648  ;;  %v5422_v54 = vpop.xlane.xlu1 %650 }
 0x5a0   :  { %6190 = vst [vmem:[#allocation68_spill] sm:$0xff] %v5420_v48  ;;  %6191 = vst [vmem:[#allocation21_spill] sm:$0xff] %v5422_v54  ;;  %v3323_v55 = vpop.f32.mrb[4].mxu1  ;;  %v3655_v54 = vpop.eup %3654 }
 0x5a1   :  { %v1556_v3 = vpop.f32.mrb[5].mxu1  ;;  %v1637_v17 = vmul.f32 %v3653_v18, %v3323_v55 }
 0x5a2   :  { %v1635_v56 = vmul.f32 %v3649_v0, %v1556_v3  ;;  %v3324_v63 = vpop.f32.mrb[6].mxu1 }
 0x5a3   :  { %v1559_v47 = vpop.f32.mrb[7].mxu1  ;;  %v5424_v46 = vpop.xlane.xlu0 %652  ;;  %v1638_v0 = vmul.f32 %v3655_v54, %v3324_v63 }
 0x5a4   :  { %6192 = vst [vmem:[#allocation27_spill] sm:$0xff] %v5424_v46  ;;  %v1636_v59 = vmul.f32 %v3651_v37, %v1559_v47  ;;  %v5426_v24 = vpop.xlane.xlu1 %654  ;;  %2152 = vrot.lane.b32.xlu1 %v1635_v56, %s3875_s25 }
 0x5a5   :  { %6193 = vst [vmem:[#allocation37_spill] sm:$0xff] %v5426_v24  ;;  %v6196_v24 = vld [vmem:[#allocation25_spill] sm:$0xff] }
 0x5a6   :  { %2154 = vrot.lane.b32.xlu0 %v1636_v59, %s3875_s25 }
 0x5a7   :  { %v5430_v48 = vpop.xlane.xlu0 %656  ;;  %v5432_v39 = vpop.f32.mrb[8].mxu1 }
 0x5a8   :  { %6194 = vst [vmem:[#allocation10_spill] sm:$0xff] %v5430_v48  ;;  %v5434_v3 = vpop.xlane.xlu1 %658  ;;  %2156 = vrot.lane.b32.xlu1 %v1637_v17, %s3875_s25  ;;  %v5437_v47 = vpop.f32.mrb[9].mxu1 }
 0x5a9   :  { %6195 = vst [vmem:[#allocation28_spill] sm:$0xff] %v5434_v3  ;;  %v5439_v37 = vpop.f32.mrb[10].mxu1 }
 0x5aa   :  { %2158 = vrot.lane.b32.xlu0 %v1638_v0, %s3875_s25  ;;  %v5442_v56 = vpop.f32.mrb[11].mxu1  ;;  %v6198_v0 = vld [vmem:[#allocation31_spill] sm:$0xff] }
 0x5ab   :  { %v661_v55 = vpop.xlane.xlu0 %660 }
 0x5ac   :  { %3656 = vrcp.f32 %v661_v55  ;;  %v663_v59 = vpop.xlane.xlu1 %662 }
 0x5ad   :  { %3658 = vrcp.f32 %v663_v59 }
 0x5ae   :  { %3660 = vrcp.f32 %v5310_v22 }
 0x5af   :  { %v5444_v18 = vpop.f32.mrb[12].mxu1  ;;  %3662 = vrcp.f32 %v5316_v45 }
 0x5b0   :  { %v5446_v48 = vpop.f32.mrb[13].mxu1  ;;  %3664 = vrcp.f32 %v5312_v36 }
 0x5b1   :  { %v5448_v54 = vpop.f32.mrb[14].mxu1  ;;  %3666 = vrcp.f32 %v5318_v6 }
 0x5b2   :  { %v5450_v63 = vpop.f32.mrb[15].mxu1  ;;  %3668 = vrcp.f32 %v5320_v57 }
 0x5b3   :  { %3670 = vrcp.f32 %v5327_v53 }
 0x5b4   :  { %3672 = vrcp.f32 %v5325_v51 }
 0x5b5   :  { %3674 = vrcp.f32 %v5333_v60 }
 0x5b6   :  { %v3657_v17 = vpop.eup %3656  ;;  %3676 = vrcp.f32 %v5336_v44 }
 0x5b7   :  { %v3659_v3 = vpop.eup %3658  ;;  %v5453_v46 = vmul.f32 %v3657_v17, %v6196_v24  ;;  %3678 = vrcp.f32 %v5338_v10 }
 0x5b8   :  { %v5456_v4 = vmul.f32 %v3659_v3, %v6198_v0  ;;  %v3661_v59 = vpop.eup %3660  ;;  %3680 = vrcp.f32 %v5340_v34 }
 0x5b9   :  { %6197 = vst [vmem:[#allocation33_spill] sm:$0xff] %v5453_v46  ;;  %v3663_v45 = vpop.eup %3662  ;;  %3682 = vrcp.f32 %v5342_v50 }
 0x5ba   :  { %6199 = vst [vmem:[#allocation46_spill] sm:$0xff] %v5456_v4  ;;  %v3665_v51 = vpop.eup %3664  ;;  %3684 = vrcp.f32 %v5346_v19 }
 0x5bb   :  { %v3667_v4 = vpop.eup %3666  ;;  %3686 = vrcp.f32 %v5344_v32 }
 0x5bc   :  { %3688 = vrcp.f32 %v5350_v31 }
 0x5bd   :  { %3690 = vrcp.f32 %v5354_v13 }
 0x5be   :  { %3692 = vrcp.f32 %v5348_v52 }
 0x5bf   :  { %3694 = vrcp.f32 %v5352_v25 }
 0x5c0   :  { %3696 = vrcp.f32 %v5358_v30 }
 0x5c1   :  { %3698 = vrcp.f32 %v5356_v14 }
 0x5ca   :  { %v3355_v55 = vpop.f32.mrb[48].mxu0 }
 0x5cb   :  { %v5465_v24 = vpop.f32.mrb[16].mxu1  ;;  %v1977_v3 = vpop.f32.mrb[49].mxu0  ;;  %v2058_v46 = vmul.f32 %v3665_v51, %v3355_v55  ;;  %v6200_v55 = vld [vmem:[#allocation59_spill] sm:$0xff] }
 0x5cc   :  { %v2056_v17 = vmul.f32 %v3661_v59, %v1977_v3  ;;  %v5467_v0 = vpop.f32.mrb[17].mxu1  ;;  %v3356_v22 = vpop.f32.mrb[50].mxu0 }
 0x5cd   :  { %v5470_v36 = vpop.f32.mrb[18].mxu1  ;;  %v1980_v6 = vpop.f32.mrb[51].mxu0 }
 0x5ce   :  { %v2057_v57 = vmul.f32 %v3663_v45, %v1980_v6  ;;  %2216 = vrot.lane.b32.xlu1 %v2056_v17, %s3876_s2  ;;  %v5473_v53 = vpop.f32.mrb[19].mxu1  ;;  %v3669_v59 = vpop.eup %3668  ;;  %v3510_v17 = vld [vmem:[%s5873_s4] sm:$0xff]   ;;  %3700 = vrcp.f32 %v5362_v23 }
 0x5cf   :  { %v2059_v3 = vmul.f32 %v3669_v59, %v3356_v22  ;;  %v3671_v60 = vpop.eup %3670  ;;  %3369 = vmatprep.subr.bf16.mxu1 %v3510_v17  ;;  %v3511_v22 = vld [vmem:[%s5873_s4 + $0x8] sm:$0xff]   ;;  %3702 = vrcp.f32 %v5360_v42  ;;  %v6203_v23 = vld [vmem:[#allocation62_spill] sm:$0xff]  ;;  %v6204_v42 = vld [vmem:[#allocation4_spill] sm:$0xff] }
 0x5d0   :  { %2218 = vrot.lane.b32.xlu0 %v2057_v57, %s3876_s2  ;;  %v1218_v57 = vmul.f32 %v3667_v4, %v6200_v55  ;;  %v3673_v51 = vpop.eup %3672  ;;  %3370 = vmatpush3.bf16.msra.mxu1 %v3510_v17  ;;  %v6201_v4 = vld [vmem:[#allocation58_spill] sm:$0xff]  ;;  %3704 = vrcp.f32 %v5366_v29 }
 0x5d1   :  { %v3675_v10 = vpop.eup %3674  ;;  %v1220_v59 = vmul.f32 %v3673_v51, %v6201_v4  ;;  %3371 = vmatprep.subr.bf16.mxu1 %v3511_v22  ;;  %3706 = vrcp.f32 %v5364_v2 }
 0x5d2   :  { %v3359_v28 = vpop.f32.mrb[52].mxu0  ;;  %2220 = vrot.lane.b32.xlu1 %v2058_v46, %s3876_s2  ;;  %v1219_v46 = vmul.f32 %v3671_v60, %v5111_v7  ;;  %v6202_v7 = vld [vmem:[#allocation61_spill] sm:$0xff]  ;;  %v3677_v60 = vpop.eup %3676  ;;  %3708 = vrcp.f32 %v5370_v27 }
 0x5d3   :  { %v1993_v45 = vpop.f32.mrb[53].mxu0  ;;  %v1639_v17 = vmul.f32 %v3677_v60, %v5437_v47  ;;  %v3679_v19 = vpop.eup %3678  ;;  %3710 = vrcp.f32 %v5368_v15 }
 0x5d4   :  { %v3360_v6 = vpop.f32.mrb[54].mxu0  ;;  %2222 = vrot.lane.b32.xlu0 %v2059_v3, %s3876_s2  ;;  %v1221_v3 = vmul.f32 %v3675_v10, %v6202_v7  ;;  %3372 = vmatpush3.bf16.msra.mxu1 %v3511_v22  ;;  %v1640_v51 = vmul.f32 %v3679_v19, %v5442_v56  ;;  %v3681_v32 = vpop.eup %3680  ;;  %3712 = vrcp.f32 %v5374_v41 }
 0x5d5   :  { %v1996_v44 = vpop.f32.mrb[55].mxu0  ;;  %v1641_v47 = vmul.f32 %v3681_v32, %v5432_v39 }
 0x5d6   :  { %2096 = vrot.lane.b32.xlu1 %v1218_v57, %s3874_s24 }
 0x5d8   :  { %2098 = vrot.lane.b32.xlu0 %v1219_v46, %s3874_s24  ;;  %v3683_v46 = vpop.eup %3682  ;;  %3714 = vrcp.f32 %v5378_v12 }
 0x5d9   :  { %v1642_v31 = vmul.f32 %v3683_v46, %v5439_v37  ;;  %v3685_v13 = vpop.eup %3684  ;;  %3716 = vrcp.f32 %v5372_v38 }
 0x5da   :  { %v5494_v34 = vpop.f32.mrb[56].mxu0  ;;  %2100 = vrot.lane.b32.xlu1 %v1220_v59, %s3874_s24  ;;  %v2060_v22 = vmul.f32 %v3685_v13, %v1993_v45  ;;  %v3687_v39 = vpop.eup %3686  ;;  %3718 = vrcp.f32 %v5376_v33 }
 0x5db   :  { %v5499_v50 = vpop.f32.mrb[57].mxu0  ;;  %v2061_v37 = vmul.f32 %v3687_v39, %v1996_v44  ;;  %v3689_v4 = vpop.eup %3688  ;;  %3720 = vrcp.f32 %v5382_v9 }
 0x5dc   :  { %v5502_v55 = vpop.f32.mrb[58].mxu0  ;;  %2102 = vrot.lane.b32.xlu0 %v1221_v3, %s3874_s24  ;;  %v3691_v59 = vpop.eup %3690  ;;  %v2062_v7 = vmul.f32 %v3689_v4, %v3359_v28  ;;  %3722 = vrcp.f32 %v5380_v61 }
 0x5dd   :  { %v5506_v57 = vpop.f32.mrb[59].mxu0  ;;  %v3693_v30 = vpop.eup %3692  ;;  %v1222_v14 = vmul.f32 %v3691_v59, %v5120_v8  ;;  %3724 = vrcp.f32 %v5386_v11  ;;  %v6206_v11 = vld [vmem:[#allocation3_spill] sm:$0xff] }
 0x5de   :  { %2160 = vrot.lane.b32.xlu1 %v1639_v17, %s3875_s25  ;;  %v2063_v45 = vmul.f32 %v3693_v30, %v3360_v6  ;;  %v3695_v3 = vpop.eup %3694  ;;  %3726 = vrcp.f32 %v5384_v20  ;;  %v6207_v20 = vld [vmem:[#allocation60_spill] sm:$0xff]  ;;  %v2089_v4 = vpop.permute.xlu0 %2088 }
 0x5df   :  { %v3697_v44 = vpop.eup %3696  ;;  %v1223_v28 = vmul.f32 %v3695_v3, %v5125_v5  ;;  %3728 = vrcp.f32 %v5390_v62 }
 0x5e0   :  { %2162 = vrot.lane.b32.xlu0 %v1640_v51, %s3875_s25  ;;  %v3699_v60 = vpop.eup %3698  ;;  %v1224_v6 = vmul.f32 %v3697_v44, %v6203_v23  ;;  %3730 = vrcp.f32 %v5388_v26 }
 0x5e1   :  { %v1225_v8 = vmul.f32 %v3699_v60, %v6204_v42  ;;  %v3701_v17 = vpop.eup %3700  ;;  %3732 = vrcp.f32 %v5394_v49 }
 0x5e2   :  { %v5516_v10 = vpop.f32.mrb[60].mxu0  ;;  %2164 = vrot.lane.b32.xlu1 %v1641_v47, %s3875_s25  ;;  %v1643_v29 = vmul.f32 %v3701_v17, %v5446_v48  ;;  %v3703_v5 = vpop.eup %3702  ;;  %3734 = vrcp.f32 %v5392_v21  ;;  %v6212_v17 = vld [vmem:[#allocation39_spill] sm:$0xff] }
 0x5e3   :  { %v5520_v56 = vpop.f32.mrb[61].mxu0  ;;  %v1644_v2 = vmul.f32 %v3703_v5, %v5450_v63  ;;  %v3705_v27 = vpop.eup %3704  ;;  %3736 = vrcp.f32 %v5396_v16 }
 0x5e4   :  { %v5522_v52 = vpop.f32.mrb[62].mxu0  ;;  %2166 = vrot.lane.b32.xlu0 %v1642_v31, %s3875_s25  ;;  %v1645_v19 = vmul.f32 %v3705_v27, %v5444_v18  ;;  %v3707_v15 = vpop.eup %3706  ;;  %3738 = vrcp.f32 %v5398_v40 }
 0x5e5   :  { %v5526_v25 = vpop.f32.mrb[63].mxu0  ;;  %v1646_v48 = vmul.f32 %v3707_v15, %v5448_v54  ;;  %v3709_v41 = vpop.eup %3708  ;;  %3740 = vrcp.f32 %v5400_v1  ;;  %v6214_v15 = vld [vmem:[#allocation40_spill] sm:$0xff] }
 0x5e6   :  { %2224 = vrot.lane.b32.xlu1 %v2060_v22, %s3876_s2  ;;  %v2064_v12 = vmul.f32 %v3709_v41, %v5499_v50  ;;  %v3711_v63 = vpop.eup %3710  ;;  %3742 = vrcp.f32 %v5402_v58  ;;  %v2095_v59 = vpop.permute.xlu0 %2094  ;;  %v6210_v58 = vld [vmem:[#allocation6_spill] sm:$0xff] }
 0x5e7   :  { %v2065_v38 = vmul.f32 %v3711_v63, %v5506_v57  ;;  %v3713_v18 = vpop.eup %3712  ;;  %3744 = vrcp.f32 %v5404_v35 }
 0x5e8   :  { %2226 = vrot.lane.b32.xlu0 %v2061_v37, %s3876_s2  ;;  %v3715_v33 = vpop.eup %3714  ;;  %v2066_v54 = vmul.f32 %v3713_v18, %v5494_v34  ;;  %v6205_v34 = vld [vmem:[#allocation63_spill] sm:$0xff] }
 0x5e9   :  { %v3717_v51 = vpop.eup %3716  ;;  %v1226_v61 = vmul.f32 %v3715_v33, %v5138_v43 }
 0x5ea   :  { %2228 = vrot.lane.b32.xlu1 %v2062_v7, %s3876_s2  ;;  %v2067_v9 = vmul.f32 %v3717_v51, %v5502_v55  ;;  %v3719_v50 = vpop.eup %3718 }
 0x5eb   :  { %v3721_v57 = vpop.eup %3720  ;;  %v1227_v32 = vmul.f32 %v3719_v50, %v6205_v34 }
 0x5ec   :  { %2230 = vrot.lane.b32.xlu0 %v2063_v45, %s3876_s2  ;;  %v3723_v47 = vpop.eup %3722  ;;  %v1228_v55 = vmul.f32 %v3721_v57, %v6206_v11 }
 0x5ed   :  { %v1229_v43 = vmul.f32 %v3723_v47, %v6207_v20  ;;  %v3725_v46 = vpop.eup %3724 }
 0x5ee   :  { %2104 = vrot.lane.b32.xlu1 %v1222_v14, %s3874_s24  ;;  %v1647_v62 = vmul.f32 %v3725_v46, %v5467_v0  ;;  %v3727_v31 = vpop.eup %3726  ;;  %v6209_v14 = vld [vmem:[#allocation38_spill] sm:$0xff] }
 0x5ef   :  { %v1648_v26 = vmul.f32 %v3727_v31, %v5473_v53  ;;  %v3729_v13 = vpop.eup %3728 }
 0x5f0   :  { %2106 = vrot.lane.b32.xlu0 %v1223_v28, %s3874_s24  ;;  %v1649_v49 = vmul.f32 %v3729_v13, %v5465_v24  ;;  %v3731_v22 = vpop.eup %3730 }
 0x5f1   :  { %v1650_v21 = vmul.f32 %v3731_v22, %v5470_v36  ;;  %v3733_v0 = vpop.eup %3732 }
 0x5f2   :  { %2108 = vrot.lane.b32.xlu1 %v1224_v6, %s3874_s24  ;;  %v2068_v39 = vmul.f32 %v3733_v0, %v5520_v56  ;;  %v3735_v16 = vpop.eup %3734  ;;  %v2091_v56 = vpop.permute.xlu1 %2090 }
 0x5f3   :  { %v2069_v53 = vmul.f32 %v3735_v16, %v5526_v25  ;;  %v3737_v40 = vpop.eup %3736 }
 0x5f4   :  { %2110 = vrot.lane.b32.xlu0 %v1225_v8, %s3874_s24  ;;  %v2070_v24 = vmul.f32 %v3737_v40, %v5516_v10  ;;  %v3739_v37 = vpop.eup %3738  ;;  %v6208_v10 = vld [vmem:[#allocation64_spill] sm:$0xff] }
 0x5f5   :  { %v2071_v36 = vmul.f32 %v3739_v37, %v5522_v52  ;;  %3746 = vrcp.f32 %v6208_v10  ;;  %v3741_v45 = vpop.eup %3740 }
 0x5f6   :  { %2168 = vrot.lane.b32.xlu1 %v1643_v29, %s3875_s25  ;;  %v2093_v25 = vpop.permute.xlu1 %2092  ;;  %v3743_v52 = vpop.eup %3742  ;;  %v785_v44 = vmul.f32 %v3741_v45, %v6209_v14  ;;  %v6222_v14 = vld [vmem:[#allocation7_spill] sm:$0xff] }
 0x5f7   :  { %v3745_v28 = vpop.eup %3744  ;;  %v786_v23 = vmul.f32 %v3743_v52, %v6210_v58 }
 0x5f8   :  { %2170 = vrot.lane.b32.xlu0 %v1644_v2, %s3875_s25  ;;  %v2265_v1 = vsel %vm2264_vm3, %v785_v44, %v2089_v4  ;;  %v787_v29 = vmul.f32 %v3745_v28, %v6212_v17  ;;  %v6223_v28 = vld [vmem:[#allocation11_spill] sm:$0xff] }
 0x5f9   :  { %v2266_v8 = vsel %vm2264_vm3, %v786_v23, %v2091_v56 }
 0x5fa   :  { %2172 = vrot.lane.b32.xlu1 %v1645_v19, %s3875_s25  ;;  %v2267_v41 = vsel %vm2264_vm3, %v787_v29, %v2093_v25 }
 0x5fc   :  { %2174 = vrot.lane.b32.xlu0 %v1646_v48, %s3875_s25 }
 0x5fe   :  { %2232 = vrot.lane.b32.xlu1 %v2064_v12, %s3876_s2 }
 0x5ff   :  { %v3747_v6 = vpop.eup %3746 }
 0x600   :  { %2234 = vrot.lane.b32.xlu0 %v2065_v38, %s3876_s2  ;;  %v788_v48 = vmul.f32 %v3747_v6, %v6214_v15 }
 0x602   :  { %2236 = vrot.lane.b32.xlu1 %v2066_v54, %s3876_s2  ;;  %v6216_v54 = vld [vmem:[#allocation67_spill] sm:$0xff]  ;;  %v2268_v51 = vsel %vm2264_vm3, %v788_v48, %v2095_v59  ;;  %v6228_v48 = vld [vmem:[#allocation9_spill] sm:$0xff] }
 0x603   :  { %3748 = vrcp.f32 %v6216_v54  ;;  %v6231_v54 = vld [vmem:[#allocation68_spill] sm:$0xff] }
 0x604   :  { %2238 = vrot.lane.b32.xlu0 %v2067_v9, %s3876_s2 }
 0x606   :  { %2112 = vrot.lane.b32.xlu1 %v1226_v61, %s3874_s24 }
 0x608   :  { %2114 = vrot.lane.b32.xlu0 %v1227_v32, %s3874_s24  ;;  %v6218_v32 = vld [vmem:[#allocation13_spill] sm:$0xff] }
 0x60a   :  { %2116 = vrot.lane.b32.xlu1 %v1228_v55, %s3874_s24 }
 0x60c   :  { %2118 = vrot.lane.b32.xlu0 %v1229_v43, %s3874_s24  ;;  %v6219_v43 = vld [vmem:[#allocation17_spill] sm:$0xff] }
 0x60e   :  { %2176 = vrot.lane.b32.xlu1 %v1647_v62, %s3875_s25 }
 0x610   :  { %2178 = vrot.lane.b32.xlu0 %v1648_v26, %s3875_s25  ;;  %v6220_v26 = vld [vmem:[#allocation12_spill] sm:$0xff] }
 0x612   :  { %2180 = vrot.lane.b32.xlu1 %v1649_v49, %s3875_s25  ;;  %v3749_v49 = vpop.eup %3748 }
 0x614   :  { %2182 = vrot.lane.b32.xlu0 %v1650_v21, %s3875_s25 }
 0x616   :  { %2240 = vrot.lane.b32.xlu1 %v2068_v39, %s3876_s2  ;;  %v2153_v7 = vpop.permute.xlu1 %2152 }
 0x617   :  { %v2281_v35 = vsel %vm6211_vm0, %v2265_v1, %v2153_v7 }
 0x618   :  { %2242 = vrot.lane.b32.xlu0 %v2069_v53, %s3876_s2  ;;  %v2155_v30 = vpop.permute.xlu0 %2154 }
 0x619   :  { %v2282_v2 = vsel %vm6213_vm11, %v2266_v8, %v2155_v30  ;;  %vm6217_vm11 = vmmov %vm6211_vm0 }
 0x61a   :  { %2244 = vrot.lane.b32.xlu1 %v2070_v24, %s3876_s2  ;;  %v2157_v3 = vpop.permute.xlu1 %2156 }
 0x61b   :  { %v2283_v63 = vsel %vm6215_vm5, %v2267_v41, %v2157_v3 }
 0x61c   :  { %2246 = vrot.lane.b32.xlu0 %v2071_v36, %s3876_s2  ;;  %v2159_v60 = vpop.permute.xlu0 %2158  ;;  %v6221_v36 = vld [vmem:[#allocation8_spill] sm:$0xff] }
 0x61d   :  { %v2284_v50 = vsel %vm6217_vm11, %v2268_v51, %v2159_v60  ;;  %v789_v56 = vmul.f32 %v3749_v49, %v6221_v36  ;;  %vm5966_vm11 = vcmask 261120  }
 0x640   :  { %v2217_v42 = vpop.permute.xlu1 %2216 }
 0x641   :  { %v2298_v5 = vsel %vm5963_vm10, %v2281_v35, %v2217_v42 }
 0x642   :  { %v2330_v27 = vmin.f32 %v2298_v5, 0.0  ;;  %v2219_v19 = vpop.permute.xlu0 %2218  ;;  %vm2314_vm5 = vcmp.gt.f32.partialorder %v2298_v5, 0.0 }
 0x643   :  { %v2299_v12 = vsel %vm5963_vm10, %v2282_v2, %v2219_v19  ;;  %v6227_v19 = vmov 0.0  }
 0x644   :  { %v2346_v38 = vmul.f32 1.442695, %v2330_v27  ;;  %v2331_v18 = vmin.f32 %v2299_v12, 0.0  ;;  %v2221_v33 = vpop.permute.xlu1 %2220  ;;  %vm2315_vm0 = vcmp.gt.f32.partialorder %v2299_v12, 0.0 }
 0x645   :  { %v2300_v9 = vsel %vm5963_vm10, %v2283_v63, %v2221_v33 }
 0x646   :  { %3750 = vpow2.f32 %v2346_v38  ;;  %v2348_v61 = vmul.f32 1.442695, %v2331_v18  ;;  %v2332_v57 = vmin.f32 %v2300_v9, 0.0  ;;  %v2223_v34 = vpop.permute.xlu0 %2222 }
 0x647   :  { %3752 = vrcp.f32 %v6218_v32  ;;  %v2301_v47 = vsel %vm5963_vm10, %v2284_v50, %v2223_v34  ;;  %vm2316_vm10 = vcmp.gt.f32.partialorder %v2300_v9, 0.0  ;;  %v6234_v32 = vld [vmem:[#allocation21_spill] sm:$0xff] }
 0x648   :  { %3754 = vpow2.f32 %v2348_v61  ;;  %v2350_v11 = vmul.f32 1.442695, %v2332_v57  ;;  %v2333_v55 = vmin.f32 %v2301_v47, 0.0  ;;  %v2097_v20 = vpop.permute.xlu1 %2096  ;;  %vm2317_vm1 = vcmp.gt.f32.partialorder %v2301_v47, 0.0 }
 0x649   :  { %3756 = vrcp.f32 %v6219_v43  ;;  %v2269_v3 = vsel %vm2264_vm3, %v789_v56, %v2097_v20 }
 0x64a   :  { %3758 = vpow2.f32 %v2350_v11  ;;  %v2352_v46 = vmul.f32 1.442695, %v2333_v55  ;;  %v2099_v62 = vpop.permute.xlu0 %2098 }
 0x64c   :  { %3760 = vpow2.f32 %v2352_v46  ;;  %v2101_v31 = vpop.permute.xlu1 %2100  ;;  %v6236_v46 = vld [vmem:[#allocation27_spill] sm:$0xff] }
 0x64d   :  { %3762 = vrcp.f32 %v6220_v26 }
 0x64e   :  { %v2103_v13 = vpop.permute.xlu0 %2102  ;;  %3764 = vrcp.f32 %v6231_v54 }
 0x650   :  { %v3751_v22 = vpop.eup %3750  ;;  %v2161_v21 = vpop.permute.xlu1 %2160 }
 0x651   :  { %v3753_v0 = vpop.eup %3752  ;;  %v3059_v39 = vadd.f32 -1.0, %v3751_v22  ;;  %v2285_v58 = vsel %vm6224_vm14, %v2269_v3, %v2161_v21 }
 0x652   :  { %v3755_v16 = vpop.eup %3754  ;;  %v2163_v53 = vpop.permute.xlu0 %2162  ;;  %v790_v44 = vmul.f32 %v3753_v0, %v6222_v14 }
 0x653   :  { %v3757_v40 = vpop.eup %3756  ;;  %v3060_v24 = vadd.f32 -1.0, %v3755_v16  ;;  %v2394_v25 = vsel %vm2314_vm5, %v2298_v5, %v3059_v39  ;;  %vm6225_vm5 = vcmask 195584  }
 0x654   :  { %v3759_v37 = vpop.eup %3758  ;;  %v2165_v4 = vpop.permute.xlu1 %2164  ;;  %v791_v60 = vmul.f32 %v3757_v40, %v6223_v28  ;;  %v2270_v8 = vsel %vm2264_vm3, %v790_v44, %v2099_v62  ;;  %v6239_v44 = vld [vmem:[#allocation72_spill] sm:$0xff] }
 0x655   :  { %v2395_v59 = vsel %vm2315_vm0, %v2299_v12, %v3060_v24  ;;  %v3061_v10 = vadd.f32 -1.0, %v3759_v37  ;;  %vm6226_vm0 = vmmov %vm6224_vm14 }
 0x656   :  { %v3761_v7 = vpop.eup %3760  ;;  %v2410_v30 = vpack.c.bf16 %v2395_v59, %v2394_v25  ;;  %v2167_v45 = vpop.permute.xlu0 %2166  ;;  %v2286_v5 = vsel %vm6226_vm0, %v2270_v8, %v2163_v53  ;;  %v2271_v15 = vsel %vm2264_vm3, %v791_v60, %v2101_v31  ;;  %vm6229_vm14 = vmmov %vm6225_vm5  ;;  %v6240_v60 = vld [vmem:[#allocation69_spill] sm:$0xff] }
 0x657   :  { %v3062_v52 = vadd.f32 -1.0, %v3761_v7  ;;  %v3763_v1 = vpop.eup %3762  ;;  %v2396_v35 = vsel %vm2316_vm10, %v2300_v9, %v3061_v10  ;;  %vm6230_vm10 = vmmov %vm6226_vm0  ;;  %v6238_v10 = vld [vmem:[#allocation70_spill] sm:$0xff] }
 0x658   :  { %3373 = vmatprep.mubr.msk.bf16.mxu1 %vm5966_vm11, %v2410_v30  ;;  %v2225_v23 = vpop.permute.xlu1 %2224  ;;  %v2436_v6 = vsel %vm5966_vm11, %v2410_v30, 0  ;;  %v792_v41 = vmul.f32 %v3763_v1, %v6228_v48  ;;  %v2287_v63 = vsel %vm6230_vm10, %v2271_v15, %v2165_v4  ;;  %v3765_v22 = vpop.eup %3764 }
 0x659   :  { %v2397_v42 = vsel %vm2317_vm1, %v2301_v47, %v3062_v52  ;;  %v2302_v17 = vsel %vm6225_vm5, %v2285_v58, %v2225_v23  ;;  %3390 = vmatpush3.bf16.xpose.msra.mxu0 %v2436_v6  ;;  %vm6232_vm1 = vmmov %vm6225_vm5  ;;  %v793_v7 = vmul.f32 %v3765_v22, %v6238_v10 }
 0x65a   :  { %v2411_v29 = vpack.c.bf16 %v2397_v42, %v2396_v35  ;;  %v2334_v2 = vmin.f32 %v2302_v17, 0.0  ;;  %v2227_v27 = vpop.permute.xlu0 %2226  ;;  %3391 = vmatprep.subr.bf16.mxu0 %v6227_v19  ;;  %v2272_v51 = vsel %vm2264_vm3, %v792_v41, %v2103_v13  ;;  %vm6233_vm5 = vmmov %vm6226_vm0  ;;  %v6237_v13 = vld [vmem:[#allocation37_spill] sm:$0xff]  ;;  %v6244_v41 = vld [vmem:[#allocation71_spill] sm:$0xff] }
 0x65b   :  { %v2303_v12 = vsel %vm6229_vm14, %v2286_v5, %v2227_v27  ;;  %v2288_v50 = vsel %vm6233_vm5, %v2272_v51, %v2167_v45  ;;  %vm6235_vm0 = vmmov %vm6232_vm1  ;;  %vm2318_vm14 = vcmp.gt.f32.partialorder %v2302_v17, 0.0 }
 0x65c   :  { %v2354_v38 = vmul.f32 1.442695, %v2334_v2  ;;  %v2335_v18 = vmin.f32 %v2303_v12, 0.0  ;;  %3374 = vmatmul.mubr.msk.bf16.vlgmr.msra.gmra.mrb[20].mxu1 %vm5966_vm11, %v2411_v29  ;;  %v2229_v33 = vpop.permute.xlu1 %2228  ;;  %v2439_v43 = vsel %vm5966_vm11, %v2411_v29, 0  ;;  %vm2319_vm10 = vcmp.gt.f32.partialorder %v2303_v12, 0.0 }
 0x65d   :  { %v2304_v9 = vsel %vm6232_vm1, %v2287_v63, %v2229_v33 }
 0x65e   :  { %3766 = vpow2.f32 %v2354_v38  ;;  %v2356_v61 = vmul.f32 1.442695, %v2335_v18  ;;  %v2336_v57 = vmin.f32 %v2304_v9, 0.0  ;;  %v2231_v34 = vpop.permute.xlu0 %2230  ;;  %vm2320_vm1 = vcmp.gt.f32.partialorder %v2304_v9, 0.0 }
 0x65f   :  { %3768 = vrcp.f32 %v6234_v32  ;;  %v2305_v47 = vsel %vm6235_vm0, %v2288_v50, %v2231_v34  ;;  %vm6241_vm0 = vcmask 130048   ;;  %v6249_v32 = vld [vmem:[#allocation10_spill] sm:$0xff] }
 0x660   :  { %3770 = vpow2.f32 %v2356_v61  ;;  %v2358_v11 = vmul.f32 1.442695, %v2336_v57  ;;  %v2337_v55 = vmin.f32 %v2305_v47, 0.0  ;;  %v2105_v20 = vpop.permute.xlu1 %2104  ;;  %vm2321_vm5 = vcmp.gt.f32.partialorder %v2305_v47, 0.0 }
 0x661   :  { %3772 = vrcp.f32 %v6236_v46  ;;  %3392 = vmatpush3.bf16.xpose.msra.mxu0 %v2439_v43  ;;  %v2273_v14 = vsel %vm2264_vm3, %v793_v7, %v2105_v20  ;;  %v6251_v46 = vld [vmem:[#allocation28_spill] sm:$0xff] }
 0x662   :  { %3774 = vpow2.f32 %v2358_v11  ;;  %v2360_v62 = vmul.f32 1.442695, %v2337_v55  ;;  %v2107_v31 = vpop.permute.xlu0 %2106  ;;  %3393 = vmatprep.subr.bf16.mxu0 %v6227_v19 }
 0x664   :  { %3776 = vpow2.f32 %v2360_v62  ;;  %v2109_v26 = vpop.permute.xlu1 %2108 }
 0x665   :  { %3778 = vrcp.f32 %v6237_v13 }
 0x666   :  { %v2111_v49 = vpop.permute.xlu0 %2110 }
 0x668   :  { %v3767_v21 = vpop.eup %3766  ;;  %v2169_v0 = vpop.permute.xlu1 %2168 }
 0x669   :  { %v3769_v39 = vpop.eup %3768  ;;  %v3063_v16 = vadd.f32 -1.0, %v3767_v21  ;;  %v2289_v23 = vsel %vm6241_vm0, %v2273_v14, %v2169_v0 }
 0x66a   :  { %v3771_v53 = vpop.eup %3770  ;;  %v2171_v40 = vpop.permute.xlu0 %2170  ;;  %v794_v28 = vmul.f32 %v3769_v39, %v6239_v44 }
 0x66b   :  { %v3773_v24 = vpop.eup %3772  ;;  %v3064_v37 = vadd.f32 -1.0, %v3771_v53  ;;  %v2398_v4 = vsel %vm2318_vm14, %v2302_v17, %v3063_v16  ;;  %vm6242_vm14 = vcmask 195584  }
 0x66c   :  { %v3775_v36 = vpop.eup %3774  ;;  %v2173_v56 = vpop.permute.xlu1 %2172  ;;  %v795_v1 = vmul.f32 %v3773_v24, %v6240_v60  ;;  %v2274_v17 = vsel %vm2264_vm3, %v794_v28, %v2107_v31 }
 0x66d   :  { %v2399_v25 = vsel %vm2319_vm10, %v2303_v12, %v3064_v37  ;;  %v3065_v59 = vadd.f32 -1.0, %v3775_v36  ;;  %vm6243_vm10 = vmmov %vm6241_vm0 }
 0x66e   :  { %v3777_v30 = vpop.eup %3776  ;;  %v2412_v45 = vpack.c.bf16 %v2399_v25, %v2398_v4  ;;  %v2175_v52 = vpop.permute.xlu0 %2174  ;;  %v2290_v2 = vsel %vm6243_vm10, %v2274_v17, %v2171_v40  ;;  %v2275_v48 = vsel %vm2264_vm3, %v795_v1, %v2109_v26  ;;  %vm6245_vm0 = vmmov %vm6242_vm14  ;;  %v6252_v25 = vld [vmem:[#allocation16_spill] sm:$0xff] }
 0x66f   :  { %v3066_v3 = vadd.f32 -1.0, %v3777_v30  ;;  %v3779_v58 = vpop.eup %3778  ;;  %v2400_v42 = vsel %vm2320_vm1, %v2304_v9, %v3065_v59  ;;  %vm6246_vm1 = vmmov %vm6243_vm10 }
 0x670   :  { %3377 = vmatprep.mubr.msk.bf16.mxu1 %vm5966_vm11, %v2412_v45  ;;  %v2233_v6 = vpop.permute.xlu1 %2232  ;;  %v2442_v35 = vsel %vm5966_vm11, %v2412_v45, 0  ;;  %v796_v12 = vmul.f32 %v3779_v58, %v6244_v41  ;;  %v2291_v38 = vsel %vm6246_vm1, %v2275_v48, %v2173_v56  ;;  %vm6250_vm10 = vmmov %vm6245_vm0 }
 0x671   :  { %v2401_v8 = vsel %vm2321_vm5, %v2305_v47, %v3066_v3  ;;  %v2306_v29 = vsel %vm6242_vm14, %v2289_v23, %v2233_v6  ;;  %3394 = vmatpush3.bf16.xpose.msra.mxu0 %v2442_v35  ;;  %vm6247_vm5 = vmmov %vm6245_vm0  ;;  %v6253_v3 = vld [vmem:[#allocation19_spill] sm:$0xff] }
 0x672   :  { %v2413_v5 = vpack.c.bf16 %v2401_v8, %v2400_v42  ;;  %v2338_v27 = vmin.f32 %v2306_v29, 0.0  ;;  %v2235_v15 = vpop.permute.xlu0 %2234  ;;  %3395 = vmatprep.subr.bf16.mxu0 %v6227_v19  ;;  %v2276_v51 = vsel %vm2264_vm3, %v796_v12, %v2111_v49  ;;  %vm6248_vm14 = vmmov %vm6246_vm1  ;;  %v6261_v12 = vld [vmem:[#allocation46_spill] sm:$0xff] }
 0x673   :  { %v2307_v63 = vsel %vm6245_vm0, %v2290_v2, %v2235_v15  ;;  %v2292_v50 = vsel %vm6248_vm14, %v2276_v51, %v2175_v52  ;;  %vm2322_vm0 = vcmp.gt.f32.partialorder %v2306_v29, 0.0 }
 0x674   :  { %v2362_v18 = vmul.f32 1.442695, %v2338_v27  ;;  %v2339_v33 = vmin.f32 %v2307_v63, 0.0  ;;  %3378 = vmatmul.mubr.msk.bf16.gmra.mrb[24].mxu1 %vm5966_vm11, %v2413_v5  ;;  %v2237_v54 = vpop.permute.xlu1 %2236  ;;  %v2445_v43 = vsel %vm5966_vm11, %v2413_v5, 0  ;;  %vm2323_vm1 = vcmp.gt.f32.partialorder %v2307_v63, 0.0 }
 0x675   :  { %v2308_v9 = vsel %vm6247_vm5, %v2291_v38, %v2237_v54 }
 0x676   :  { %3780 = vpow2.f32 %v2362_v18  ;;  %v2364_v61 = vmul.f32 1.442695, %v2339_v33  ;;  %v2340_v57 = vmin.f32 %v2308_v9, 0.0  ;;  %v2239_v34 = vpop.permute.xlu0 %2238  ;;  %vm2324_vm5 = vcmp.gt.f32.partialorder %v2308_v9, 0.0 }
 0x677   :  { %3782 = vrcp.f32 %v6249_v32  ;;  %v2309_v47 = vsel %vm6250_vm10, %v2292_v50, %v2239_v34  ;;  %vm6254_vm10 = vcmask 130048  }
 0x678   :  { %3784 = vpow2.f32 %v2364_v61  ;;  %v2366_v11 = vmul.f32 1.442695, %v2340_v57  ;;  %v2341_v55 = vmin.f32 %v2309_v47, 0.0  ;;  %v2113_v20 = vpop.permute.xlu1 %2112  ;;  %vm2325_vm14 = vcmp.gt.f32.partialorder %v2309_v47, 0.0 }
 0x679   :  { %3786 = vrcp.f32 %v6251_v46  ;;  %3396 = vmatpush3.bf16.xpose.msra.mxu0 %v2445_v43 }
 0x67a   :  { %3788 = vpow2.f32 %v2366_v11  ;;  %v2368_v62 = vmul.f32 1.442695, %v2341_v55  ;;  %v2115_v31 = vpop.permute.xlu0 %2114  ;;  %3397 = vmatprep.subr.bf16.mxu0 %v6227_v19 }
 0x67c   :  { %3790 = vpow2.f32 %v2368_v62  ;;  %v2117_v26 = vpop.permute.xlu1 %2116 }
 0x67e   :  { %v2119_v13 = vpop.permute.xlu0 %2118 }
 0x680   :  { %v3781_v49 = vpop.eup %3780  ;;  %v2177_v22 = vpop.permute.xlu1 %2176 }
 0x681   :  { %v3783_v21 = vpop.eup %3782  ;;  %v3067_v0 = vadd.f32 -1.0, %v3781_v49 }
 0x682   :  { %v3785_v39 = vpop.eup %3784  ;;  %v2179_v16 = vpop.permute.xlu0 %2178  ;;  %v797_v59 = vmul.f32 %v3783_v21, %v6252_v25 }
 0x683   :  { %v3787_v53 = vpop.eup %3786  ;;  %v3068_v40 = vadd.f32 -1.0, %v3785_v39  ;;  %v2402_v36 = vsel %vm2322_vm0, %v2306_v29, %v3067_v0  ;;  %vm6255_vm0 = vcmask 195584   ;;  %v6257_v29 = vld [vmem:[#allocation33_spill] sm:$0xff] }
 0x684   :  { %v3789_v24 = vpop.eup %3788  ;;  %v2181_v37 = vpop.permute.xlu1 %2180  ;;  %v2277_v52 = vsel %vm2264_vm3, %v797_v59, %v2113_v20  ;;  %v798_v14 = vmul.f32 %v3787_v53, %v6253_v3  ;;  %v2279_v5 = vsel %vm2264_vm3, %v6257_v29, %v2117_v26  ;;  %v3877_v53 = vmov 7  }
 0x685   :  { %v2403_v56 = vsel %vm2323_vm1, %v2307_v63, %v3068_v40  ;;  %v3069_v4 = vadd.f32 -1.0, %v3789_v24  ;;  %v2293_v44 = vsel %vm6254_vm10, %v2277_v52, %v2177_v22  ;;  %vm6256_vm1 = vmmov %vm6254_vm10  ;;  %v2280_v63 = vsel %vm2264_vm3, %v6261_v12, %v2119_v13  ;;  %3499 = vset.pattern.permute.xlu1 %v3877_v53  ;;  %3500 = vset.pattern.permute.xlu0 %v3877_v53 }
 0x686   :  { %v3791_v10 = vpop.eup %3790  ;;  %v2414_v7 = vpack.c.bf16 %v2403_v56, %v2402_v36  ;;  %v2183_v30 = vpop.permute.xlu0 %2182  ;;  %v2278_v23 = vsel %vm2264_vm3, %v798_v14, %v2115_v31  ;;  %vm6258_vm10 = vmmov %vm6255_vm0 }
 0x687   :  { %v3070_v45 = vadd.f32 -1.0, %v3791_v10  ;;  %v2404_v1 = vsel %vm2324_vm5, %v2308_v9, %v3069_v4  ;;  %v2294_v42 = vsel %vm6256_vm1, %v2278_v23, %v2179_v16  ;;  %vm6260_vm5 = vcmask 261120   ;;  %v2556_v16 = vld [vmem:[%s5874_s5] sm:$0x1] }
 0x688   :  { %3381 = vmatprep.mubr.msk.bf16.mxu1 %vm5966_vm11, %v2414_v7  ;;  %v2241_v28 = vpop.permute.xlu1 %2240  ;;  %v2448_v60 = vsel %vm5966_vm11, %v2414_v7, 0  ;;  %vm6259_vm11 = vmmov %vm6256_vm1 }
 0x689   :  { %v2405_v58 = vsel %vm2325_vm14, %v2309_v47, %v3070_v45  ;;  %v2310_v6 = vsel %vm6255_vm0, %v2293_v44, %v2241_v28  ;;  %3398 = vmatpush3.bf16.xpose.msra.mxu0 %v2448_v60  ;;  %v2295_v27 = vsel %vm6259_vm11, %v2279_v5, %v2181_v37  ;;  %vm6262_vm14 = vmmov %vm6255_vm0  ;;  %v6271_v5 = vld [vmem:[#allocation5_spill] sm:$0xff] }
 0x68a   :  { %v2415_v35 = vpack.c.bf16 %v2405_v58, %v2404_v1  ;;  %v2342_v8 = vmin.f32 %v2310_v6, 0.0  ;;  %v2243_v17 = vpop.permute.xlu0 %2242  ;;  %3399 = vmatprep.subr.bf16.mxu0 %v6227_v19  ;;  %vm6263_vm0 = vmmov %vm6256_vm1  ;;  %vm2326_vm3 = vcmp.gt.f32.partialorder %v2310_v6, 0.0 }
 0x68b   :  { %v2311_v2 = vsel %vm6258_vm10, %v2294_v42, %v2243_v17  ;;  %v2296_v18 = vsel %vm6263_vm0, %v2280_v63, %v2183_v30  ;;  %vm6264_vm1 = vmmov %vm6258_vm10 }
 0x68c   :  { %v2370_v15 = vmul.f32 1.442695, %v2342_v8  ;;  %v2343_v48 = vmin.f32 %v2311_v2, 0.0  ;;  %3382 = vmatmul.mubr.msk.bf16.gmra.mrb[28].mxu1 %vm6260_vm5, %v2415_v35  ;;  %v2245_v41 = vpop.permute.xlu1 %2244  ;;  %vm6265_vm11 = vmmov %vm6260_vm5  ;;  %vm2327_vm10 = vcmp.gt.f32.partialorder %v2311_v2, 0.0 }
 0x68d   :  { %v2312_v38 = vsel %vm6262_vm14, %v2295_v27, %v2245_v41  ;;  %v2451_v57 = vsel %vm6265_vm11, %v2415_v35, 0  ;;  %vm6266_vm0 = vmmov %vm6265_vm11 }
 0x68e   :  { %3792 = vpow2.f32 %v2370_v15  ;;  %v2372_v33 = vmul.f32 1.442695, %v2343_v48  ;;  %v2344_v54 = vmin.f32 %v2312_v38, 0.0  ;;  %v2247_v51 = vpop.permute.xlu0 %2246  ;;  %vm2328_vm5 = vcmp.gt.f32.partialorder %v2312_v38, 0.0  ;;  %vm6268_vm11 = vmmov %vm6266_vm0 }
 0x68f   :  { %v2313_v9 = vsel %vm6264_vm1, %v2296_v18, %v2247_v51  ;;  %vm6267_vm1 = vmmov %vm6266_vm0 }
 0x690   :  { %3794 = vpow2.f32 %v2372_v33  ;;  %v2374_v50 = vmul.f32 1.442695, %v2344_v54  ;;  %v2345_v61 = vmin.f32 %v2313_v9, 0.0  ;;  %vm2329_vm14 = vcmp.gt.f32.partialorder %v2313_v9, 0.0 }
 0x691   :  { %3400 = vmatpush3.bf16.xpose.msra.mxu0 %v2451_v57 }
 0x692   :  { %3796 = vpow2.f32 %v2374_v50  ;;  %v2376_v34 = vmul.f32 1.442695, %v2345_v61  ;;  %3401 = vmatprep.subr.bf16.mxu0 %v6227_v19 }
 0x694   :  { %3798 = vpow2.f32 %v2376_v34 }
 0x698   :  { %v3793_v32 = vpop.eup %3792 }
 0x699   :  { %v3071_v47 = vadd.f32 -1.0, %v3793_v32 }
 0x69a   :  { %v3795_v11 = vpop.eup %3794 }
 0x69b   :  { %v3072_v55 = vadd.f32 -1.0, %v3795_v11  ;;  %v2406_v43 = vsel %vm2326_vm3, %v2310_v6, %v3071_v47  ;;  %vm6269_vm3 = vmmov %vm6266_vm0 }
 0x69c   :  { %v3797_v20 = vpop.eup %3796 }
 0x69d   :  { %v2407_v46 = vsel %vm2327_vm10, %v2311_v2, %v3072_v55  ;;  %v3073_v62 = vadd.f32 -1.0, %v3797_v20  ;;  %vm6270_vm10 = vmmov %vm6266_vm0  ;;  %v6272_v2 = vsub.s32 0, %v6271_v5 }
 0x69e   :  { %v3799_v31 = vpop.eup %3798  ;;  %v2416_v26 = vpack.c.bf16 %v2407_v46, %v2406_v43 }
 0x69f   :  { %v3074_v13 = vadd.f32 -1.0, %v3799_v31  ;;  %v2408_v22 = vsel %vm2328_vm5, %v2312_v38, %v3073_v62  ;;  %v6288_v62 = vld [vmem:[#allocation48_spill] sm:$0xff] }
 0x6a0   :  { %3385 = vmatprep.mubr.msk.bf16.mxu1 %vm6266_vm0, %v2416_v26  ;;  %v2454_v49 = vsel %vm6267_vm1, %v2416_v26, 0 }
 0x6a1   :  { %v2409_v21 = vsel %vm2329_vm14, %v2313_v9, %v3074_v13  ;;  %3402 = vmatpush3.bf16.xpose.msra.mxu0 %v2454_v49 }
 0x6a2   :  { %v2417_v0 = vpack.c.bf16 %v2409_v21, %v2408_v22  ;;  %3403 = vmatprep.subr.bf16.mxu0 %v6227_v19 }
 0x6a4   :  { %3386 = vmatmul.mubr.msk.bf16.gmra.mrb[32].mxu1 %vm6268_vm11, %v2417_v0  ;;  %v2457_v39 = vsel %vm6269_vm3, %v2417_v0, 0 }
 0x6a9   :  { %3404 = vmatpush3.bf16.xpose.msra.mxu0 %v2457_v39 }
 0x6b0   :  { %3406 = vmatmul.mubr.msk.bf16.vlgmr.msra.gmra.mrb[64].mxu0 %vm6270_vm10, %v2556_v16 }
 0x72f   :  { %v3375_v40 = vpop.f32.mrb[20].mxu1 }
 0x730   :  { %v2493_v24 = vpop.f32.mrb[21].mxu1 }
 0x731   :  { %2610 = vperm.xlu1 %3499, %v2493_v24   ;;  %v3376_v37 = vpop.f32.mrb[22].mxu1 }
 0x732   :  { %v2601_v36 = vpack.c.bf16 %v3376_v37, %v3375_v40  ;;  %v2496_v19 = vpop.f32.mrb[23].mxu1 }
 0x733   :  { %v2600_v56 = vpack.c.bf16 %v2496_v19, %v2493_v24  ;;  %2615 = vperm.xlu0 %3500, %v2496_v19   ;;  %v6294_v24 = vld [vmem:[#allocation49_spill] sm:$0xff] }
 0x735   :  { %2620 = vperm.xlu1 %3499, %v3375_v40   ;;  %3409 = vmatprep.subr.bf16.mxu1 %v2600_v56 }
 0x736   :  { %3410 = vmatpush3.bf16.msra.mxu1 %v2600_v56 }
 0x737   :  { %3411 = vmatprep.subr.bf16.mxu1 %v2601_v36 }
 0x739   :  { %2625 = vperm.xlu1 %3499, %v3376_v37  }
 0x73a   :  { %3412 = vmatpush3.bf16.msra.mxu1 %v2601_v36 }
 0x747   :  { %v3379_v4 = vpop.f32.mrb[24].mxu1 }
 0x748   :  { %v2509_v25 = vpop.f32.mrb[25].mxu1 }
 0x749   :  { %v3380_v59 = vpop.f32.mrb[26].mxu1  ;;  %2630 = vperm.xlu0 %3500, %v2509_v25  }
 0x74a   :  { %v2603_v10 = vpack.c.bf16 %v3380_v59, %v3379_v4  ;;  %v2512_v7 = vpop.f32.mrb[27].mxu1 }
 0x74b   :  { %v2602_v30 = vpack.c.bf16 %v2512_v7, %v2509_v25  ;;  %2635 = vperm.xlu1 %3499, %v2512_v7  }
 0x74d   :  { %3413 = vmatprep.subr.bf16.mxu1 %v2602_v30  ;;  %2640 = vperm.xlu0 %3500, %v3379_v4  }
 0x74e   :  { %3414 = vmatpush3.bf16.msra.mxu1 %v2602_v30 }
 0x74f   :  { %2645 = vperm.xlu1 %3499, %v3380_v59   ;;  %3415 = vmatprep.subr.bf16.mxu1 %v2603_v10 }
 0x752   :  { %3416 = vmatpush3.bf16.msra.mxu1 %v2603_v10 }
 0x75f   :  { %v3383_v45 = vpop.f32.mrb[28].mxu1 }
 0x760   :  { %v2525_v52 = vpop.f32.mrb[29].mxu1 }
 0x761   :  { %v3384_v3 = vpop.f32.mrb[30].mxu1  ;;  %2650 = vperm.xlu0 %3500, %v2525_v52  }
 0x762   :  { %v2605_v14 = vpack.c.bf16 %v3384_v3, %v3383_v45  ;;  %v2528_v44 = vpop.f32.mrb[31].mxu1 }
 0x763   :  { %v2604_v28 = vpack.c.bf16 %v2528_v44, %v2525_v52  ;;  %2655 = vperm.xlu1 %3499, %v2528_v44   ;;  %v6280_v52 = vld [vmem:[#allocation26_spill] sm:$0xff] }
 0x765   :  { %3417 = vmatprep.subr.bf16.mxu1 %v2604_v28  ;;  %2660 = vperm.xlu0 %3500, %v3383_v45  }
 0x766   :  { %3418 = vmatpush3.bf16.msra.mxu1 %v2604_v28 }
 0x767   :  { %2665 = vperm.xlu1 %3499, %v3384_v3   ;;  %3419 = vmatprep.subr.bf16.mxu1 %v2605_v14 }
 0x76a   :  { %3420 = vmatpush3.bf16.msra.mxu1 %v2605_v14 }
 0x777   :  { %v3387_v60 = vpop.f32.mrb[32].mxu1 }
 0x778   :  { %v2541_v1 = vpop.f32.mrb[33].mxu1 }
 0x779   :  { %2670 = vperm.xlu0 %3500, %v2541_v1   ;;  %v3388_v58 = vpop.f32.mrb[34].mxu1 }
 0x77a   :  { %v2607_v23 = vpack.c.bf16 %v3388_v58, %v3387_v60  ;;  %v2544_v6 = vpop.f32.mrb[35].mxu1 }
 0x77b   :  { %v2606_v35 = vpack.c.bf16 %v2544_v6, %v2541_v1  ;;  %2675 = vperm.xlu1 %3499, %v2544_v6  }
 0x77d   :  { %2680 = vperm.xlu0 %3500, %v3387_v60   ;;  %3421 = vmatprep.subr.bf16.mxu1 %v2606_v35 }
 0x77e   :  { %3422 = vmatpush3.bf16.msra.mxu1 %v2606_v35 }
 0x77f   :  { %2685 = vperm.xlu1 %3499, %v3388_v58   ;;  %3423 = vmatprep.subr.bf16.mxu1 %v2607_v23 }
 0x782   :  { %3424 = vmatpush3.bf16.msra.mxu1 %v2607_v23 }
 0x783   :  { %v2594_v42 = vpop.f32.mrb[64].mxu0 }
 0x784   :  { %v3407_v8 = vpop.f32.mrb[65].mxu0  ;;  %v5707_v27 = vrot.slane %v2594_v42, %v6272_v2 }
 0x785   :  { %v2597_v17 = vpop.f32.mrb[66].mxu0 }
 0x786   :  { %v3408_v29 = vpop.f32.mrb[67].mxu0 }
 0x7b0   :  { %v2611_v15 = vpop.permute.xlu1 %2610 }
 0x7b1   :  { %v2692_v48 = vadd.f32 %v5707_v27, %v2611_v15 }
 0x7b2   :  { %v2616_v41 = vpop.permute.xlu0 %2615 }
 0x7b3   :  { %v2724_v12 = vmul.f32 0.01, %v2692_v48  ;;  %v2693_v63 = vadd.f32 %v5707_v27, %v2616_v41  ;;  %vm2708_vm5 = vcmp.ge.f32.partialorder %v2692_v48, 0.0 }
 0x7b4   :  { %v2621_v38 = vpop.permute.xlu1 %2620 }
 0x7b5   :  { %v2725_v18 = vmul.f32 0.01, %v2693_v63  ;;  %v2694_v33 = vadd.f32 %v5707_v27, %v2621_v38  ;;  %v2740_v54 = vsel %vm2708_vm5, %v2692_v48, %v2724_v12  ;;  %vm2709_vm14 = vcmp.ge.f32.partialorder %v2693_v63, 0.0 }
 0x7b6   :  { %v5714_v9 = vsel %vm6095_vm4, %v2740_v54, -1e+30 }
 0x7b7   :  { %v2726_v50 = vmul.f32 0.01, %v2694_v33  ;;  %2772 = vmax.xlane.f32.xlu0 %v5714_v9  ;;  %v2741_v61 = vsel %vm2709_vm14, %v2693_v63, %v2725_v18  ;;  %vm2710_vm0 = vcmp.ge.f32.partialorder %v2694_v33, 0.0  ;;  %v6284_v63 = vld [vmem:[#allocation24_spill] sm:$0xff]  ;;  %vm6289_vm14 = vnez %v6288_v62 }
 0x7b8   :  { %v2626_v57 = vpop.permute.xlu1 %2625  ;;  %v5719_v32 = vsel %vm4192_vm9, %v2741_v61, -1e+30  ;;  %vm6285_vm10 = vnez %v6284_v63 }
 0x7b9   :  { %v2695_v47 = vadd.f32 %v5707_v27, %v2626_v57  ;;  %2774 = vmax.xlane.f32.xlu1 %v5719_v32  ;;  %v2742_v11 = vsel %vm2710_vm0, %v2694_v33, %v2726_v50  ;;  %v6286_v33 = vld [vmem:[#allocation35_spill] sm:$0xff] }
 0x7ba   :  { %v5725_v20 = vsel %vm4223_vm15, %v2742_v11, -1e+30 }
 0x7bb   :  { %v2727_v43 = vmul.f32 0.01, %v2695_v47  ;;  %2776 = vmax.xlane.f32.xlu0 %v5725_v20  ;;  %vm2711_vm4 = vcmp.ge.f32.partialorder %v2695_v47, 0.0 }
 0x7bd   :  { %v2743_v46 = vsel %vm2711_vm4, %v2695_v47, %v2727_v43 }
 0x7be   :  { %v5730_v31 = vsel %vm4180_vm8, %v2743_v46, -1e+30 }
 0x7bf   :  { %2778 = vmax.xlane.f32.xlu0 %v5730_v31 }
 0x7c8   :  { %v2631_v26 = vpop.permute.xlu0 %2630 }
 0x7c9   :  { %v2696_v13 = vadd.f32 %v5707_v27, %v2631_v26 }
 0x7ca   :  { %v2636_v49 = vpop.permute.xlu1 %2635 }
 0x7cb   :  { %v2728_v22 = vmul.f32 0.01, %v2696_v13  ;;  %v2697_v21 = vadd.f32 %v5707_v27, %v2636_v49  ;;  %vm2712_vm9 = vcmp.ge.f32.partialorder %v2696_v13, 0.0 }
 0x7cc   :  { %v2641_v0 = vpop.permute.xlu0 %2640 }
 0x7cd   :  { %v2729_v39 = vmul.f32 0.01, %v2697_v21  ;;  %v2698_v16 = vadd.f32 %v5707_v27, %v2641_v0  ;;  %v2744_v53 = vsel %vm2712_vm9, %v2696_v13, %v2728_v22  ;;  %vm2713_vm15 = vcmp.ge.f32.partialorder %v2697_v21, 0.0 }
 0x7ce   :  { %v2646_v40 = vpop.permute.xlu1 %2645  ;;  %v5738_v37 = vsel %vm4265_vm12, %v2744_v53, -1e+30  ;;  %vm6281_vm12 = vnez %v6280_v52  ;;  %v6292_v53 = vld [vmem:[#allocation43_spill] sm:$0xff] }
 0x7cf   :  { %v2730_v36 = vmul.f32 0.01, %v2698_v16  ;;  %v2699_v19 = vadd.f32 %v5707_v27, %v2646_v40  ;;  %2780 = vmax.xlane.f32.xlu1 %v5738_v37  ;;  %v2745_v56 = vsel %vm2713_vm15, %v2697_v21, %v2729_v39  ;;  %vm2714_vm8 = vcmp.ge.f32.partialorder %v2698_v16, 0.0  ;;  %v6290_v21 = vld [vmem:[#allocation41_spill] sm:$0xff] }
 0x7d0   :  { %v5744_v25 = vsel %vm4306_vm13, %v2745_v56, -1e+30  ;;  %vm6291_vm4 = vnez %v6290_v21  ;;  %vm6293_vm15 = vnez %v6292_v53 }
 0x7d1   :  { %v2731_v59 = vmul.f32 0.01, %v2699_v19  ;;  %2782 = vmax.xlane.f32.xlu0 %v5744_v25  ;;  %v2746_v10 = vsel %vm2714_vm8, %v2698_v16, %v2730_v36  ;;  %vm2715_vm1 = vcmp.ge.f32.partialorder %v2699_v19, 0.0  ;;  %vm6295_vm8 = vnez %v6294_v24 }
 0x7d2   :  { %v5749_v30 = vsel %vm4254_vm7, %v2746_v10, -1e+30 }
 0x7d3   :  { %2784 = vmax.xlane.f32.xlu1 %v5749_v30  ;;  %v2747_v45 = vsel %vm2715_vm1, %v2699_v19, %v2731_v59 }
 0x7d4   :  { %v5754_v3 = vsel %vm6281_vm12, %v2747_v45, -1e+30 }
 0x7d5   :  { %2786 = vmax.xlane.f32.xlu0 %v5754_v3 }
 0x7e0   :  { %v2651_v14 = vpop.permute.xlu0 %2650 }
 0x7e1   :  { %v2700_v44 = vadd.f32 %v5707_v27, %v2651_v14 }
 0x7e2   :  { %v2656_v28 = vpop.permute.xlu1 %2655 }
 0x7e3   :  { %v2732_v60 = vmul.f32 0.01, %v2700_v44  ;;  %v2701_v1 = vadd.f32 %v5707_v27, %v2656_v28  ;;  %vm2716_vm13 = vcmp.ge.f32.partialorder %v2700_v44, 0.0 }
 0x7e4   :  { %v2661_v58 = vpop.permute.xlu0 %2660 }
 0x7e5   :  { %v2733_v23 = vmul.f32 0.01, %v2701_v1  ;;  %v2702_v6 = vadd.f32 %v5707_v27, %v2661_v58  ;;  %v2748_v35 = vsel %vm2716_vm13, %v2700_v44, %v2732_v60  ;;  %vm2717_vm7 = vcmp.ge.f32.partialorder %v2701_v1, 0.0 }
 0x7e6   :  { %v2666_v42 = vpop.permute.xlu1 %2665  ;;  %v5762_v17 = vsel %vm4310_vm2, %v2748_v35, -1e+30  ;;  %vm6287_vm2 = vnez %v6286_v33 }
 0x7e7   :  { %v2734_v29 = vmul.f32 0.01, %v2702_v6  ;;  %v2703_v5 = vadd.f32 %v5707_v27, %v2666_v42  ;;  %2788 = vmax.xlane.f32.xlu1 %v5762_v17  ;;  %v2749_v2 = vsel %vm2717_vm7, %v2701_v1, %v2733_v23  ;;  %vm2718_vm11 = vcmp.ge.f32.partialorder %v2702_v6, 0.0 }
 0x7e8   :  { %v5768_v48 = vsel %vm4351_vm6, %v2749_v2, -1e+30 }
 0x7e9   :  { %v2735_v41 = vmul.f32 0.01, %v2703_v5  ;;  %2790 = vmax.xlane.f32.xlu0 %v5768_v48  ;;  %v2750_v12 = vsel %vm2718_vm11, %v2702_v6, %v2734_v29  ;;  %vm2719_vm3 = vcmp.ge.f32.partialorder %v2703_v5, 0.0 }
 0x7ea   :  { %v5773_v38 = vsel %vm6285_vm10, %v2750_v12, -1e+30 }
 0x7eb   :  { %2792 = vmax.xlane.f32.xlu1 %v5773_v38  ;;  %v2751_v18 = vsel %vm2719_vm3, %v2703_v5, %v2735_v41 }
 0x7ec   :  { %v5778_v54 = vsel %vm6287_vm2, %v2751_v18, -1e+30 }
 0x7ed   :  { %2794 = vmax.xlane.f32.xlu0 %v5778_v54 }
 0x7f8   :  { %v2671_v51 = vpop.permute.xlu0 %2670 }
 0x7f9   :  { %v2704_v50 = vadd.f32 %v5707_v27, %v2671_v51 }
 0x7fa   :  { %v2676_v61 = vpop.permute.xlu1 %2675 }
 0x7fb   :  { %v2736_v57 = vmul.f32 0.01, %v2704_v50  ;;  %v2705_v34 = vadd.f32 %v5707_v27, %v2676_v61  ;;  %vm2720_vm6 = vcmp.ge.f32.partialorder %v2704_v50, 0.0 }
 0x7fc   :  { %v2681_v47 = vpop.permute.xlu0 %2680 }
 0x7fd   :  { %v2737_v11 = vmul.f32 0.01, %v2705_v34  ;;  %v2706_v55 = vadd.f32 %v5707_v27, %v2681_v47  ;;  %v2752_v43 = vsel %vm2720_vm6, %v2704_v50, %v2736_v57  ;;  %vm2721_vm5 = vcmp.ge.f32.partialorder %v2705_v34, 0.0 }
 0x7fe   :  { %v2686_v46 = vpop.permute.xlu1 %2685  ;;  %v5786_v26 = vsel %vm6289_vm14, %v2752_v43, -1e+30 }
 0x7ff   :  { %v2738_v13 = vmul.f32 0.01, %v2706_v55  ;;  %v2707_v49 = vadd.f32 %v5707_v27, %v2686_v46  ;;  %2796 = vmax.xlane.f32.xlu1 %v5786_v26  ;;  %v2753_v22 = vsel %vm2721_vm5, %v2705_v34, %v2737_v11  ;;  %vm2722_vm0 = vcmp.ge.f32.partialorder %v2706_v55, 0.0 }
 0x800   :  { %v5792_v0 = vsel %vm6291_vm4, %v2753_v22, -1e+30 }
 0x801   :  { %v2739_v39 = vmul.f32 0.01, %v2707_v49  ;;  %2798 = vmax.xlane.f32.xlu0 %v5792_v0  ;;  %v2754_v16 = vsel %vm2722_vm0, %v2706_v55, %v2738_v13  ;;  %vm2723_vm9 = vcmp.ge.f32.partialorder %v2707_v49, 0.0 }
 0x802   :  { %v5797_v40 = vsel %vm6293_vm15, %v2754_v16, -1e+30 }
 0x803   :  { %2800 = vmax.xlane.f32.xlu1 %v5797_v40  ;;  %v2755_v27 = vsel %vm2723_vm9, %v2707_v49, %v2739_v39 }
 0x804   :  { %v5802_v36 = vsel %vm6295_vm8, %v2755_v27, -1e+30 }
 0x805   :  { %2802 = vmax.xlane.f32.xlu0 %v5802_v36 }
 0x844   :  { %v2773_v19 = vpop.xlane.xlu0 %2772 }
 0x845   :  { %v2804_v56 = vsub.f32 %v5714_v9, %v2773_v19 }
 0x846   :  { %v2775_v4 = vpop.xlane.xlu1 %2774 }
 0x847   :  { %v2820_v59 = vmul.f32 1.442695, %v2804_v56  ;;  %v2805_v10 = vsub.f32 %v5719_v32, %v2775_v4 }
 0x848   :  { %v2777_v7 = vpop.xlane.xlu0 %2776 }
 0x849   :  { %v2822_v45 = vmul.f32 1.442695, %v2805_v10  ;;  %v2806_v52 = vsub.f32 %v5725_v20, %v2777_v7  ;;  %3800 = vpow2.f32 %v2820_v59 }
 0x84b   :  { %3802 = vpow2.f32 %v2822_v45  ;;  %v2824_v14 = vmul.f32 1.442695, %v2806_v52 }
 0x84c   :  { %v2779_v44 = vpop.xlane.xlu0 %2778 }
 0x84d   :  { %3804 = vpow2.f32 %v2824_v14  ;;  %v2807_v28 = vsub.f32 %v5730_v31, %v2779_v44 }
 0x84f   :  { %v2826_v60 = vmul.f32 1.442695, %v2807_v28 }
 0x851   :  { %3806 = vpow2.f32 %v2826_v60 }
 0x853   :  { %v3801_v1 = vpop.eup %3800 }
 0x855   :  { %v3803_v58 = vpop.eup %3802 }
 0x856   :  { %v2884_v9 = vpack.c.bf16 %v3803_v58, %v3801_v1 }
 0x857   :  { %v3805_v23 = vpop.eup %3804 }
 0x858   :  { %3425 = vmatprep.mubr.bf16.mxu1 %v2884_v9  ;;  %2856 = vadd.xlane.f32.xlu1 %v3805_v23 }
 0x85b   :  { %v3807_v32 = vpop.eup %3806 }
 0x85c   :  { %v2781_v6 = vpop.xlane.xlu1 %2780  ;;  %2852 = vadd.xlane.f32.xlu1 %v3801_v1  ;;  %2858 = vadd.xlane.f32.xlu0 %v3807_v32  ;;  %v2885_v20 = vpack.c.bf16 %v3807_v32, %v3805_v23 }
 0x85d   :  { %v2808_v35 = vsub.f32 %v5738_v37, %v2781_v6 }
 0x85e   :  { %3426 = vmatmul.mubr.bf16.vlgmr.msra.gmra.mrb[36].mxu1 %v2885_v20  ;;  %v2783_v42 = vpop.xlane.xlu0 %2782 }
 0x85f   :  { %v2828_v8 = vmul.f32 1.442695, %v2808_v35  ;;  %v2809_v31 = vsub.f32 %v5744_v25, %v2783_v42 }
 0x860   :  { %v2785_v29 = vpop.xlane.xlu1 %2784  ;;  %2854 = vadd.xlane.f32.xlu0 %v3803_v58 }
 0x861   :  { %v2830_v5 = vmul.f32 1.442695, %v2809_v31  ;;  %v2810_v2 = vsub.f32 %v5749_v30, %v2785_v29  ;;  %3808 = vpow2.f32 %v2828_v8 }
 0x862   :  { %v2787_v15 = vpop.xlane.xlu0 %2786 }
 0x863   :  { %3810 = vpow2.f32 %v2830_v5  ;;  %v2832_v41 = vmul.f32 1.442695, %v2810_v2  ;;  %v2811_v12 = vsub.f32 %v5754_v3, %v2787_v15 }
 0x865   :  { %3812 = vpow2.f32 %v2832_v41  ;;  %v2834_v63 = vmul.f32 1.442695, %v2811_v12 }
 0x867   :  { %3814 = vpow2.f32 %v2834_v63 }
 0x86b   :  { %v3809_v37 = vpop.eup %3808 }
 0x86d   :  { %v3811_v18 = vpop.eup %3810 }
 0x86e   :  { %v2886_v33 = vpack.c.bf16 %v3811_v18, %v3809_v37 }
 0x86f   :  { %v3813_v51 = vpop.eup %3812 }
 0x870   :  { %2864 = vadd.xlane.f32.xlu1 %v3813_v51  ;;  %3429 = vmatprep.mubr.bf16.mxu1 %v2886_v33 }
 0x871   :  { %v3815_v25 = vpop.eup %3814 }
 0x872   :  { %2866 = vadd.xlane.f32.xlu0 %v3815_v25  ;;  %v2887_v50 = vpack.c.bf16 %v3815_v25, %v3813_v51 }
 0x874   :  { %v2789_v61 = vpop.xlane.xlu1 %2788  ;;  %2860 = vadd.xlane.f32.xlu1 %v3809_v37  ;;  %3430 = vmatmul.mubr.bf16.gmra.mrb[40].mxu1 %v2887_v50 }
 0x875   :  { %v2812_v30 = vsub.f32 %v5762_v17, %v2789_v61 }
 0x876   :  { %2862 = vadd.xlane.f32.xlu0 %v3811_v18  ;;  %v2791_v57 = vpop.xlane.xlu0 %2790 }
 0x877   :  { %v2836_v3 = vmul.f32 1.442695, %v2812_v30  ;;  %v2813_v34 = vsub.f32 %v5768_v48, %v2791_v57 }
 0x878   :  { %v2793_v47 = vpop.xlane.xlu1 %2792 }
 0x879   :  { %v2838_v11 = vmul.f32 1.442695, %v2813_v34  ;;  %v2814_v55 = vsub.f32 %v5773_v38, %v2793_v47  ;;  %3816 = vpow2.f32 %v2836_v3 }
 0x87a   :  { %v2795_v43 = vpop.xlane.xlu0 %2794 }
 0x87b   :  { %3818 = vpow2.f32 %v2838_v11  ;;  %v2840_v46 = vmul.f32 1.442695, %v2814_v55  ;;  %v2815_v62 = vsub.f32 %v5778_v54, %v2795_v43 }
 0x87d   :  { %3820 = vpow2.f32 %v2840_v46  ;;  %v2842_v13 = vmul.f32 1.442695, %v2815_v62 }
 0x87f   :  { %3822 = vpow2.f32 %v2842_v13 }
 0x883   :  { %v3817_v49 = vpop.eup %3816 }
 0x885   :  { %v3819_v17 = vpop.eup %3818 }
 0x886   :  { %v2888_v22 = vpack.c.bf16 %v3819_v17, %v3817_v49 }
 0x887   :  { %v3821_v21 = vpop.eup %3820 }
 0x888   :  { %2872 = vadd.xlane.f32.xlu1 %v3821_v21  ;;  %3433 = vmatprep.mubr.bf16.mxu1 %v2888_v22 }
 0x889   :  { %v3823_v48 = vpop.eup %3822 }
 0x88a   :  { %2874 = vadd.xlane.f32.xlu0 %v3823_v48  ;;  %v2889_v39 = vpack.c.bf16 %v3823_v48, %v3821_v21 }
 0x88c   :  { %v2797_v16 = vpop.xlane.xlu1 %2796  ;;  %2868 = vadd.xlane.f32.xlu1 %v3817_v49  ;;  %3434 = vmatmul.mubr.bf16.gmra.mrb[44].mxu1 %v2889_v39 }
 0x88d   :  { %v2816_v38 = vsub.f32 %v5786_v26, %v2797_v16 }
 0x88e   :  { %2870 = vadd.xlane.f32.xlu0 %v3819_v17  ;;  %v2799_v53 = vpop.xlane.xlu0 %2798 }
 0x88f   :  { %v2844_v54 = vmul.f32 1.442695, %v2816_v38  ;;  %v2817_v27 = vsub.f32 %v5792_v0, %v2799_v53 }
 0x890   :  { %v2801_v24 = vpop.xlane.xlu1 %2800 }
 0x891   :  { %3824 = vpow2.f32 %v2844_v54  ;;  %v2846_v19 = vmul.f32 1.442695, %v2817_v27  ;;  %v2818_v56 = vsub.f32 %v5797_v40, %v2801_v24 }
 0x892   :  { %v2803_v4 = vpop.xlane.xlu0 %2802 }
 0x893   :  { %3826 = vpow2.f32 %v2846_v19  ;;  %v2848_v59 = vmul.f32 1.442695, %v2818_v56  ;;  %v2819_v10 = vsub.f32 %v5802_v36, %v2803_v4 }
 0x895   :  { %3828 = vpow2.f32 %v2848_v59  ;;  %v2850_v7 = vmul.f32 1.442695, %v2819_v10 }
 0x897   :  { %3830 = vpow2.f32 %v2850_v7 }
 0x89b   :  { %v3825_v45 = vpop.eup %3824 }
 0x89c   :  { %2876 = vadd.xlane.f32.xlu1 %v3825_v45 }
 0x89d   :  { %v3827_v26 = vpop.eup %3826 }
 0x89e   :  { %2878 = vadd.xlane.f32.xlu0 %v3827_v26  ;;  %v2890_v52 = vpack.c.bf16 %v3827_v26, %v3825_v45 }
 0x89f   :  { %v3829_v14 = vpop.eup %3828 }
 0x8a0   :  { %2880 = vadd.xlane.f32.xlu1 %v3829_v14  ;;  %3437 = vmatprep.mubr.bf16.mxu1 %v2890_v52 }
 0x8a1   :  { %v3831_v0 = vpop.eup %3830 }
 0x8a2   :  { %2882 = vadd.xlane.f32.xlu0 %v3831_v0  ;;  %v2891_v44 = vpack.c.bf16 %v3831_v0, %v3829_v14 }
 0x8a4   :  { %3438 = vmatmul.mubr.bf16.gmra.mrb[48].mxu1 %v2891_v44 }
 0x8e5   :  { %v2857_v40 = vpop.xlane.xlu1 %2856 }
 0x8e6   :  { %3832 = vrcp.f32 %v2857_v40 }
 0x8e9   :  { %v2859_v28 = vpop.xlane.xlu0 %2858  ;;  %v2853_v60 = vpop.xlane.xlu1 %2852 }
 0x8ea   :  { %3834 = vrcp.f32 %v2853_v60 }
 0x8eb   :  { %3836 = vrcp.f32 %v2859_v28 }
 0x8ed   :  { %v2855_v36 = vpop.xlane.xlu0 %2854 }
 0x8ee   :  { %3838 = vrcp.f32 %v2855_v36 }
 0x8f0   :  { %v3833_v1 = vpop.eup %3832 }
 0x8f4   :  { %v3835_v9 = vpop.eup %3834 }
 0x8f5   :  { %v3837_v6 = vpop.eup %3836 }
 0x8f8   :  { %v3839_v42 = vpop.eup %3838 }
 0x8fd   :  { %v2865_v29 = vpop.xlane.xlu1 %2864 }
 0x8fe   :  { %3840 = vrcp.f32 %v2865_v29 }
 0x8ff   :  { %v2867_v2 = vpop.xlane.xlu0 %2866 }
 0x901   :  { %v2861_v15 = vpop.xlane.xlu1 %2860 }
 0x902   :  { %3842 = vrcp.f32 %v2861_v15 }
 0x903   :  { %v2863_v41 = vpop.xlane.xlu0 %2862  ;;  %3844 = vrcp.f32 %v2867_v2 }
 0x904   :  { %3846 = vrcp.f32 %v2863_v41 }
 0x908   :  { %v3841_v12 = vpop.eup %3840 }
 0x90c   :  { %v3843_v37 = vpop.eup %3842 }
 0x90d   :  { %v3845_v51 = vpop.eup %3844 }
 0x90e   :  { %v3847_v61 = vpop.eup %3846 }
 0x915   :  { %v2873_v34 = vpop.xlane.xlu1 %2872 }
 0x916   :  { %3848 = vrcp.f32 %v2873_v34 }
 0x917   :  { %v2875_v47 = vpop.xlane.xlu0 %2874 }
 0x919   :  { %v2869_v11 = vpop.xlane.xlu1 %2868 }
 0x91a   :  { %3850 = vrcp.f32 %v2869_v11 }
 0x91b   :  { %v2871_v55 = vpop.xlane.xlu0 %2870  ;;  %3852 = vrcp.f32 %v2875_v47 }
 0x91c   :  { %3854 = vrcp.f32 %v2871_v55 }
 0x920   :  { %v3849_v43 = vpop.eup %3848 }
 0x924   :  { %v3851_v62 = vpop.eup %3850 }
 0x925   :  { %v3853_v17 = vpop.eup %3852 }
 0x926   :  { %v3855_v48 = vpop.eup %3854 }
 0x929   :  { %v2877_v53 = vpop.xlane.xlu1 %2876 }
 0x92b   :  { %v2879_v54 = vpop.xlane.xlu0 %2878 }
 0x92d   :  { %v2881_v27 = vpop.xlane.xlu1 %2880 }
 0x92e   :  { %3856 = vrcp.f32 %v2881_v27 }
 0x92f   :  { %v2883_v24 = vpop.xlane.xlu0 %2882  ;;  %3858 = vrcp.f32 %v2877_v53 }
 0x930   :  { %3860 = vrcp.f32 %v2883_v24 }
 0x931   :  { %v3427_v58 = vpop.f32.mrb[36].mxu1  ;;  %3862 = vrcp.f32 %v2879_v54 }
 0x932   :  { %v3007_v23 = vmul.f32 %v3833_v1, %v3427_v58  ;;  %v2926_v32 = vpop.f32.mrb[37].mxu1 }
 0x933   :  { %v3005_v20 = vmul.f32 %v3835_v9, %v2926_v32  ;;  %v3428_v35 = vpop.f32.mrb[38].mxu1 }
 0x934   :  { %3023 = vst [vmem:[%s5875_s6 + $0x10] sm:$0xff] %v3007_v23  ;;  %v3008_v8 = vmul.f32 %v3837_v6, %v3428_v35  ;;  %v2929_v31 = vpop.f32.mrb[39].mxu1 }
 0x935   :  { %3021 = vst [vmem:[%s5875_s6] sm:$0xff] %v3005_v20  ;;  %v3006_v5 = vmul.f32 %v3839_v42, %v2929_v31 }
 0x936   :  { %3024 = vst [vmem:[%s5875_s6 + $0x18] sm:$0xff] %v3008_v8 }
 0x937   :  { %3022 = vst [vmem:[%s5875_s6 + $0x8] sm:$0xff] %v3006_v5 }
 0x938   :  { %v3857_v19 = vpop.eup %3856 }
 0x939   :  { %v3859_v4 = vpop.eup %3858 }
 0x93a   :  { %v3861_v7 = vpop.eup %3860 }
 0x93b   :  { %v3863_v52 = vpop.eup %3862 }
 0x947   :  { %v3431_v63 = vpop.f32.mrb[40].mxu1 }
 0x948   :  { %v3011_v18 = vmul.f32 %v3841_v12, %v3431_v63  ;;  %v2942_v33 = vpop.f32.mrb[41].mxu1 }
 0x949   :  { %v3009_v25 = vmul.f32 %v3843_v37, %v2942_v33  ;;  %v3432_v50 = vpop.f32.mrb[42].mxu1 }
 0x94a   :  { %3027 = vst [vmem:[%s5875_s6 + $0x30] sm:$0xff] %v3011_v18  ;;  %v3012_v30 = vmul.f32 %v3845_v51, %v3432_v50  ;;  %v2945_v57 = vpop.f32.mrb[43].mxu1 }
 0x94b   :  { %3025 = vst [vmem:[%s5875_s6 + $0x20] sm:$0xff] %v3009_v25  ;;  %v3010_v3 = vmul.f32 %v3847_v61, %v2945_v57 }
 0x94c   :  { %3028 = vst [vmem:[%s5875_s6 + $0x38] sm:$0xff] %v3012_v30 }
 0x94d   :  { %3026 = vst [vmem:[%s5875_s6 + $0x28] sm:$0xff] %v3010_v3 }
 0x95f   :  { %v3435_v46 = vpop.f32.mrb[44].mxu1 }
 0x960   :  { %v3015_v13 = vmul.f32 %v3849_v43, %v3435_v46  ;;  %v2958_v49 = vpop.f32.mrb[45].mxu1 }
 0x961   :  { %v3013_v22 = vmul.f32 %v3851_v62, %v2958_v49  ;;  %v3436_v21 = vpop.f32.mrb[46].mxu1 }
 0x962   :  { %3031 = vst [vmem:[%s5875_s6 + $0x50] sm:$0xff] %v3015_v13  ;;  %v3016_v39 = vmul.f32 %v3853_v17, %v3436_v21  ;;  %v2961_v16 = vpop.f32.mrb[47].mxu1 }
 0x963   :  { %3029 = vst [vmem:[%s5875_s6 + $0x40] sm:$0xff] %v3013_v22  ;;  %v3014_v38 = vmul.f32 %v3855_v48, %v2961_v16 }
 0x964   :  { %3032 = vst [vmem:[%s5875_s6 + $0x58] sm:$0xff] %v3016_v39 }
 0x965   :  { %3030 = vst [vmem:[%s5875_s6 + $0x48] sm:$0xff] %v3014_v38 }
 0x977   :  { %v3439_v56 = vpop.f32.mrb[48].mxu1 }
 0x978   :  { %v3019_v59 = vmul.f32 %v3857_v19, %v3439_v56  ;;  %v2974_v10 = vpop.f32.mrb[49].mxu1 }
 0x979   :  { %v3017_v45 = vmul.f32 %v3859_v4, %v2974_v10  ;;  %v3440_v26 = vpop.f32.mrb[50].mxu1 }
 0x97a   :  { %3035 = vst [vmem:[%s5875_s6 + $0x70] sm:$0xff] %v3019_v59  ;;  %v3020_v14 = vmul.f32 %v3861_v7, %v3440_v26  ;;  %v2977_v0 = vpop.f32.mrb[51].mxu1 }
 0x97b   :  { %3033 = vst [vmem:[%s5875_s6 + $0x60] sm:$0xff] %v3017_v45  ;;  %v3018_v44 = vmul.f32 %v3863_v52, %v2977_v0 }
 0x97c   :  { %3036 = vst [vmem:[%s5875_s6 + $0x78] sm:$0xff] %v3020_v14 }
 0x97d   :  { %3034 = vst [vmem:[%s5875_s6 + $0x68] sm:$0xff] %v3018_v44 }

</bundles_post_ra>
